<compile_context>
chip_gen: v6e
topology: v6e:2x2x1
jax: 0.10.0
libtpu: 0.0.40
codegen_flags: <defaults>
</compile_context>

<pallas_src>
import math
import jax
import jax.numpy as jnp
from jax.experimental import pallas as pl
from jax.experimental.pallas import tpu as pltpu

PRED_LEN = 8
HIDDEN = 64
IN_FEATS = 361
IN_PAD = 384            # 361 features + 1 ones-column (bias fold) + zero pad -> 3*128
GATE_DIM = 3 * HIDDEN   # 192
GD_PAD = 256            # fused [w_hr|w_hz|w_hn|w_out] padded to a full MXU tile width
OUT_W = PRED_LEN * 2    # 16


def gru_traj_kernel(z_ref, w1_ref, w2_ref, b2_ref, w3_ref, b3_ref,
                    w_gd_ref, b_gd_ref, w_i_ref, b_in_ref, out_ref):
    f32 = jnp.float32
    bf16 = jnp.bfloat16
    H = HIDDEN

    # ---- join MLP: Linear+ReLU x3 (bf16 MXU operands, f32 accumulation) ----
    z = z_ref[...]                                                    # (B,384) bf16
    h = jnp.maximum(jnp.dot(z, w1_ref[...], preferred_element_type=f32), 0.0)  # b1 folded
    h = jnp.maximum(jnp.dot(h.astype(bf16), w2_ref[...],
                            preferred_element_type=f32) + b2_ref[...], 0.0)
    h = jnp.maximum(jnp.dot(h.astype(bf16), w3_ref[...],
                            preferred_element_type=f32) + b3_ref[...], 0.0)    # (B,64) f32

    B = h.shape[0]
    B2 = B // 2            # tile_b is a multiple of 16 -> B2 is a multiple of 8

    w_gd = w_gd_ref[...]   # (64,256) bf16: [w_hr | w_hz | w_hn | w_out | 0-pad]
    b_gd = b_gd_ref[...]   # (1,256)  f32 : [b_ir+b_hr | b_iz+b_hz | b_hn | b_out | 0]
    b_in = b_in_ref[...]   # (1,64)   f32
    w_i0 = w_i_ref[0:1, :]  # (1,192) f32 — input-gate weight rows, used lazily
    w_i1 = w_i_ref[1:2, :]

    def fused_go(hh):
        # ONE MXU push per half-step: the 3 hidden-gate matmuls + output Linear,
        # with all foldable biases added via a single (1,256) broadcast add.
        return jnp.dot(hh.astype(bf16), w_gd, preferred_element_type=f32) + b_gd

    def gru_step(h, go, x, first):
        go_r = go[:, 0:H]
        go_z = go[:, H:2 * H]
        go_n = go[:, 2 * H:3 * H]
        if first:
            # x == 0 -> the input-gate path reduces to its biases
            # (r/z input biases already live in b_gd; only b_in is explicit).
            r = jax.nn.sigmoid(go_r)
            zg = jax.nn.sigmoid(go_z)
            n = jnp.tanh(b_in + r * go_n)
        else:
            # K=2 input path on the VPU (f32): two broadcast FMAs, no MXU push.
            gi = x[:, 0:1] * w_i0 + x[:, 1:2] * w_i1
            r = jax.nn.sigmoid(gi[:, 0:H] + go_r)
            zg = jax.nn.sigmoid(gi[:, H:2 * H] + go_z)
            n = jnp.tanh(gi[:, 2 * H:3 * H] + b_in + r * go_n)
        h = (1.0 - zg) * n + zg * h            # torch.nn.GRUCell update
        go = fused_go(h)                       # next step's gates + this step's dx
        x = x + go[:, 3 * H:3 * H + 2]         # dx (b_out already folded into b_gd)
        return h, go, x

    # Two independent half-batch recurrences, interleaved so one half's matmul
    # (MXU) overlaps the other half's sigmoid/tanh (EUP) + gate math (VPU).
    h_a, h_b = h[:B2, :], h[B2:B, :]
    go_a, go_b = fused_go(h_a), fused_go(h_b)
    x_a = jnp.zeros((B2, 2), f32)
    x_b = jnp.zeros((B - B2, 2), f32)

    for t in range(PRED_LEN):                  # small static trip count -> unrolled
        h_a, go_a, x_a = gru_step(h_a, go_a, x_a, t == 0)
        h_b, go_b, x_b = gru_step(h_b, go_b, x_b, t == 0)
        # per-step direct stores (static slices) — no wps list / final concat
        out_ref[0:B2, 2 * t:2 * t + 2] = x_a
        out_ref[B2:B, 2 * t:2 * t + 2] = x_b


def init_params(key):
    """Deterministic synthetic init mirroring the PyTorch module's shapes."""
    ks = jax.random.split(key, 12)

    def lin(kw, kb, fan_in, fan_out):
        bound = 1.0 / math.sqrt(fan_in)
        w = jax.random.uniform(kw, (fan_in, fan_out), jnp.float32, -bound, bound)
        b = jax.random.uniform(kb, (1, fan_out), jnp.float32, -bound, bound)
        return w, b

    # join MLP
    w1, b1 = lin(ks[0], ks[1], 361, 256)
    w2, b2 = lin(ks[2], ks[3], 256, 128)
    w3, b3 = lin(ks[4], ks[5], 128, 64)

    # GRUCell(input_size=2, hidden_size=64); torch stores (3*H, in) / (3*H, H).
    bound = 1.0 / math.sqrt(HIDDEN)
    w_ih = jax.random.uniform(ks[6], (3 * HIDDEN, 2), jnp.float32, -bound, bound)
    w_hh = jax.random.uniform(ks[7], (3 * HIDDEN, HIDDEN), jnp.float32, -bound, bound)
    b_ih = jax.random.uniform(ks[8], (3 * HIDDEN,), jnp.float32, -bound, bound)
    b_hh = jax.random.uniform(ks[9], (3 * HIDDEN,), jnp.float32, -bound, bound)

    H = HIDDEN
    w_ir, w_iz, w_in = w_ih[0:H].T, w_ih[H:2 * H].T, w_ih[2 * H:].T
    w_hr, w_hz, w_hn = w_hh[0:H].T, w_hh[H:2 * H].T, w_hh[2 * H:].T
    b_ir, b_iz, b_in = b_ih[0:H][None, :], b_ih[H:2 * H][None, :], b_ih[2 * H:][None, :]
    b_hr, b_hz, b_hn = b_hh[0:H][None, :], b_hh[H:2 * H][None, :], b_hh[2 * H:][None, :]

    # output Linear(64, 2)
    w_out, b_out = lin(ks[10], ks[11], 64, 2)

    return [w1, b1, w2, b2, w3, b3,
            w_ir, w_iz, w_in, w_hr, w_hz, w_hn,
            b_ir, b_iz, b_in, b_hr, b_hz, b_hn,
            w_out, b_out]


def pack_params(params):
    """Pack PyTorch-layout params into the fused / padded / bf16 kernel layout."""
    (w1, b1, w2, b2, w3, b3,
     w_ir, w_iz, w_in, w_hr, w_hz, w_hn,
     b_ir, b_iz, b_in, b_hr, b_hz, b_hn,
     w_out, b_out) = params
    bf16 = jnp.bfloat16

    # Layer-1 bias folded into row 361 of w1 (z carries a ones column there).
    w1p = jnp.concatenate([w1, b1], axis=0)                               # (362, 256)
    w1p = jnp.pad(w1p, ((0, IN_PAD - w1p.shape[0]), (0, 0))).astype(bf16)  # (384, 256)

    w2b = w2.astype(bf16)
    w3b = w3.astype(bf16)

    # Fused hidden-gate + output weight: one (64,256) bf16 RHS per decoder step.
    w_gd = jnp.concatenate([w_hr, w_hz, w_hn, w_out], axis=1)             # (64, 194)
    w_gd = jnp.pad(w_gd, ((0, 0), (0, GD_PAD - w_gd.shape[1]))).astype(bf16)

    # All foldable biases as one (1,256) f32 vector added after the fused matmul.
    b_gd = jnp.concatenate([b_ir + b_hr, b_iz + b_hz, b_hn, b_out], axis=1)  # (1, 194)
    b_gd = jnp.pad(b_gd, ((0, 0), (0, GD_PAD - b_gd.shape[1])))              # (1, 256)

    w_i = jnp.concatenate([w_ir, w_iz, w_in], axis=1)                     # (2, 192) f32

    return [w1p, w2b, b2, w3b, b3, w_gd, b_gd, w_i, b_in]


def _round_up(x, m):
    return ((x + m - 1) // m) * m


def gru_trajectory_predict(z, params, tile_b=512):
    bs = z.shape[0]
    kp = pack_params(params)

    # Batch tile: multiple of 16 (so each half-batch is sublane aligned), never
    # larger than the padded batch, and capped so the grid has >=2 iterations
    # whenever the batch allows (keeps both v7x TensorCores busy).
    b16 = _round_up(bs, 16)
    tile_b = min(tile_b, b16)
    if b16 >= 32:
        tile_b = min(tile_b, _round_up((b16 + 1) // 2, 16))
    tile_b = _round_up(tile_b, 16)
    b_pad = _round_up(bs, tile_b)

    # Pad features 361 -> 384, plant the ones column at 361 (folds b1 into w1),
    # and ship z to the kernel in bf16 (halves the dominant HBM->VMEM traffic).
    z_p = jnp.pad(z.astype(jnp.float32),
                  ((0, b_pad - bs), (0, IN_PAD - IN_FEATS)))
    z_p = z_p.at[:, IN_FEATS].set(1.0)
    z_p = z_p.astype(jnp.bfloat16)

    grid = (b_pad // tile_b,)

    def resident(p):  # weights/biases: same block every grid step -> stay in VMEM
        return pl.BlockSpec(p.shape, lambda i: (0, 0))

    in_specs = ([pl.BlockSpec((tile_b, IN_PAD), lambda i: (i, 0))]
                + [resident(p) for p in kp])
    out_specs = pl.BlockSpec((tile_b, OUT_W), lambda i: (i, 0))

    out = pl.pallas_call(
        gru_traj_kernel,
        out_shape=jax.ShapeDtypeStruct((b_pad, OUT_W), jnp.float32),
        grid_spec=pltpu.PrefetchScalarGridSpec(
            num_scalar_prefetch=0,
            grid=grid,
            in_specs=in_specs,
            out_specs=out_specs),
        compiler_params=pltpu.CompilerParams(
            dimension_semantics=("parallel",),
            vmem_limit_bytes=48 * 1024 * 1024),
    )(z_p, *kp)

    return out[:bs].reshape(bs, PRED_LEN, 2)


def reference(z, params):
    (w1, b1, w2, b2, w3, b3,
     w_ir, w_iz, w_in, w_hr, w_hz, w_hn,
     b_ir, b_iz, b_in, b_hr, b_hz, b_hn,
     w_out, b_out) = params
    h = jnp.maximum(z @ w1 + b1, 0.0)
    h = jnp.maximum(h @ w2 + b2, 0.0)
    h = jnp.maximum(h @ w3 + b3, 0.0)
    x = jnp.zeros((z.shape[0], 2), jnp.float32)
    outs = []
    for _ in range(PRED_LEN):
        r = jax.nn.sigmoid(x @ w_ir + b_ir + h @ w_hr + b_hr)
        zg = jax.nn.sigmoid(x @ w_iz + b_iz + h @ w_hz + b_hz)
        n = jnp.tanh(x @ w_in + b_in + r * (h @ w_hn + b_hn))
        h = (1.0 - zg) * n + zg * h
        x = x + (h @ w_out + b_out)
        outs.append(x)
    return jnp.stack(outs, axis=1)


if __name__ == "__main__":
    key = jax.random.PRNGKey(0)
    k_z, k_p = jax.random.split(key)
    bs = 2
    z = jax.random.normal(k_z, (bs, IN_FEATS), jnp.float32)
    params = init_params(k_p)

    out = jax.block_until_ready(gru_trajectory_predict(z, params))

    ref = reference(z, params)
    assert out.shape == (bs, PRED_LEN, 2)
    # bf16 MXU operands (f32 accumulation) -> looser tolerance than the f32 build.
    assert jnp.allclose(out, ref, atol=5e-2, rtol=5e-2), "mismatch vs JAX reference"

    print("KERNEL_OK")
</pallas_src>

<mosaic_0001>
module attributes {stable_mosaic.version = 11 : i64} {
  func.func @gru_traj_kernel(%arg0: i32, %arg1: memref<16x384xbf16, #tpu.memory_space<vmem>>, %arg2: memref<384x256xbf16, #tpu.memory_space<vmem>>, %arg3: memref<256x128xbf16, #tpu.memory_space<vmem>>, %arg4: memref<1x128xf32, #tpu.memory_space<vmem>>, %arg5: memref<128x64xbf16, #tpu.memory_space<vmem>>, %arg6: memref<1x64xf32, #tpu.memory_space<vmem>>, %arg7: memref<64x256xbf16, #tpu.memory_space<vmem>>, %arg8: memref<1x256xf32, #tpu.memory_space<vmem>>, %arg9: memref<2x192xf32, #tpu.memory_space<vmem>>, %arg10: memref<1x64xf32, #tpu.memory_space<vmem>>, %arg11: memref<16x16xf32, #tpu.memory_space<vmem>>) attributes {dimension_semantics = [#tpu.dimension_semantics<parallel>], iteration_bounds = array<i64: 1>, scalar_prefetch = 0 : i64, scratch_operands = 0 : i64, tpu.core_type = #tpu.core_type<tc>, window_params = [{transform_indices = @transform_0, window_bounds = array<i64: 16, 384>}, {pipeline_mode = #tpu.pipeline_mode<synchronous>, transform_indices = @transform_1, window_bounds = array<i64: 384, 256>}, {pipeline_mode = #tpu.pipeline_mode<synchronous>, transform_indices = @transform_2, window_bounds = array<i64: 256, 128>}, {pipeline_mode = #tpu.pipeline_mode<synchronous>, transform_indices = @transform_3, window_bounds = array<i64: 1, 128>}, {pipeline_mode = #tpu.pipeline_mode<synchronous>, transform_indices = @transform_4, window_bounds = array<i64: 128, 64>}, {pipeline_mode = #tpu.pipeline_mode<synchronous>, transform_indices = @transform_5, window_bounds = array<i64: 1, 64>}, {pipeline_mode = #tpu.pipeline_mode<synchronous>, transform_indices = @transform_6, window_bounds = array<i64: 64, 256>}, {pipeline_mode = #tpu.pipeline_mode<synchronous>, transform_indices = @transform_7, window_bounds = array<i64: 1, 256>}, {pipeline_mode = #tpu.pipeline_mode<synchronous>, transform_indices = @transform_8, window_bounds = array<i64: 2, 192>}, {pipeline_mode = #tpu.pipeline_mode<synchronous>, transform_indices = @transform_9, window_bounds = array<i64: 1, 64>}, {transform_indices = @transform_10, window_bounds = array<i64: 16, 16>}]} {
    %c0 = arith.constant 0 : index
    %c0_0 = arith.constant 0 : index
    %0 = vector.load %arg1[%c0, %c0_0] : memref<16x384xbf16, #tpu.memory_space<vmem>>, vector<16x384xbf16>
    %c0_1 = arith.constant 0 : index
    %c0_2 = arith.constant 0 : index
    %1 = vector.load %arg2[%c0_1, %c0_2] : memref<384x256xbf16, #tpu.memory_space<vmem>>, vector<384x256xbf16>
    %cst = arith.constant dense<0.000000e+00> : vector<16x256xf32>
    %2 = tpu.matmul %0, %1, %cst {dimension_numbers = #tpu.dot_dimension_numbers<[1], [0], [0], [1], [0, 0, 1, 1], [], []>} : vector<16x384xbf16>, vector<384x256xbf16>, vector<16x256xf32> -> vector<16x256xf32>
    %cst_3 = arith.constant 0.000000e+00 : f32
    %3 = vector.broadcast %cst_3 : f32 to vector<16x256xf32>
    %4 = arith.maximumf %2, %3 : vector<16x256xf32>
    %5 = arith.truncf %4 : vector<16x256xf32> to vector<16x256xbf16>
    %c0_4 = arith.constant 0 : index
    %c0_5 = arith.constant 0 : index
    %6 = vector.load %arg3[%c0_4, %c0_5] : memref<256x128xbf16, #tpu.memory_space<vmem>>, vector<256x128xbf16>
    %cst_6 = arith.constant dense<0.000000e+00> : vector<16x128xf32>
    %7 = tpu.matmul %5, %6, %cst_6 {dimension_numbers = #tpu.dot_dimension_numbers<[1], [0], [0], [1], [0, 0, 1, 1], [], []>} : vector<16x256xbf16>, vector<256x128xbf16>, vector<16x128xf32> -> vector<16x128xf32>
    %c0_7 = arith.constant 0 : index
    %c0_8 = arith.constant 0 : index
    %8 = vector.load %arg4[%c0_7, %c0_8] : memref<1x128xf32, #tpu.memory_space<vmem>>, vector<1x128xf32>
    %9 = vector.broadcast %8 : vector<1x128xf32> to vector<16x128xf32>
    %10 = arith.addf %7, %9 : vector<16x128xf32>
    %cst_9 = arith.constant 0.000000e+00 : f32
    %11 = vector.broadcast %cst_9 : f32 to vector<16x128xf32>
    %12 = arith.maximumf %10, %11 : vector<16x128xf32>
    %13 = arith.truncf %12 : vector<16x128xf32> to vector<16x128xbf16>
    %c0_10 = arith.constant 0 : index
    %c0_11 = arith.constant 0 : index
    %14 = vector.load %arg5[%c0_10, %c0_11] : memref<128x64xbf16, #tpu.memory_space<vmem>>, vector<128x64xbf16>
    %cst_12 = arith.constant dense<0.000000e+00> : vector<16x64xf32>
    %15 = tpu.matmul %13, %14, %cst_12 {dimension_numbers = #tpu.dot_dimension_numbers<[1], [0], [0], [1], [0, 0, 1, 1], [], []>} : vector<16x128xbf16>, vector<128x64xbf16>, vector<16x64xf32> -> vector<16x64xf32>
    %c0_13 = arith.constant 0 : index
    %c0_14 = arith.constant 0 : index
    %16 = vector.load %arg6[%c0_13, %c0_14] : memref<1x64xf32, #tpu.memory_space<vmem>>, vector<1x64xf32>
    %17 = vector.broadcast %16 : vector<1x64xf32> to vector<16x64xf32>
    %18 = arith.addf %15, %17 : vector<16x64xf32>
    %cst_15 = arith.constant 0.000000e+00 : f32
    %19 = vector.broadcast %cst_15 : f32 to vector<16x64xf32>
    %20 = arith.maximumf %18, %19 : vector<16x64xf32>
    %c0_16 = arith.constant 0 : index
    %c0_17 = arith.constant 0 : index
    %21 = vector.load %arg7[%c0_16, %c0_17] : memref<64x256xbf16, #tpu.memory_space<vmem>>, vector<64x256xbf16>
    %c0_18 = arith.constant 0 : index
    %c0_19 = arith.constant 0 : index
    %22 = vector.load %arg8[%c0_18, %c0_19] : memref<1x256xf32, #tpu.memory_space<vmem>>, vector<1x256xf32>
    %c0_20 = arith.constant 0 : index
    %c0_21 = arith.constant 0 : index
    %23 = vector.load %arg10[%c0_20, %c0_21] : memref<1x64xf32, #tpu.memory_space<vmem>>, vector<1x64xf32>
    %c0_22 = arith.constant 0 : index
    %c0_23 = arith.constant 0 : index
    %24 = vector.load %arg9[%c0_22, %c0_23] : memref<2x192xf32, #tpu.memory_space<vmem>>, vector<1x192xf32>
    %c1 = arith.constant 1 : index
    %c0_24 = arith.constant 0 : index
    %25 = vector.load %arg9[%c1, %c0_24] : memref<2x192xf32, #tpu.memory_space<vmem>>, vector<1x192xf32>
    %26 = vector.extract_strided_slice %20 {offsets = [0, 0], sizes = [8, 64], strides = [1, 1]} : vector<16x64xf32> to vector<8x64xf32>
    %27 = vector.extract_strided_slice %20 {offsets = [8, 0], sizes = [8, 64], strides = [1, 1]} : vector<16x64xf32> to vector<8x64xf32>
    %28 = arith.truncf %26 : vector<8x64xf32> to vector<8x64xbf16>
    %cst_25 = arith.constant dense<0.000000e+00> : vector<8x256xf32>
    %29 = tpu.matmul %28, %21, %cst_25 {dimension_numbers = #tpu.dot_dimension_numbers<[1], [0], [0], [1], [0, 0, 1, 1], [], []>} : vector<8x64xbf16>, vector<64x256xbf16>, vector<8x256xf32> -> vector<8x256xf32>
    %30 = vector.broadcast %22 : vector<1x256xf32> to vector<8x256xf32>
    %31 = arith.addf %29, %30 : vector<8x256xf32>
    %32 = arith.truncf %27 : vector<8x64xf32> to vector<8x64xbf16>
    %cst_26 = arith.constant dense<0.000000e+00> : vector<8x256xf32>
    %33 = tpu.matmul %32, %21, %cst_26 {dimension_numbers = #tpu.dot_dimension_numbers<[1], [0], [0], [1], [0, 0, 1, 1], [], []>} : vector<8x64xbf16>, vector<64x256xbf16>, vector<8x256xf32> -> vector<8x256xf32>
    %34 = vector.broadcast %22 : vector<1x256xf32> to vector<8x256xf32>
    %35 = arith.addf %33, %34 : vector<8x256xf32>
    %cst_27 = arith.constant 0.000000e+00 : f32
    %36 = vector.broadcast %cst_27 : f32 to vector<8x2xf32>
    %cst_28 = arith.constant 0.000000e+00 : f32
    %37 = vector.broadcast %cst_28 : f32 to vector<8x2xf32>
    %38 = vector.extract_strided_slice %31 {offsets = [0, 0], sizes = [8, 64], strides = [1, 1]} : vector<8x256xf32> to vector<8x64xf32>
    %39 = vector.extract_strided_slice %31 {offsets = [0, 64], sizes = [8, 64], strides = [1, 1]} : vector<8x256xf32> to vector<8x64xf32>
    %40 = vector.extract_strided_slice %31 {offsets = [0, 128], sizes = [8, 64], strides = [1, 1]} : vector<8x256xf32> to vector<8x64xf32>
    %41 = arith.negf %38 : vector<8x64xf32>
    %42 = math.exp %41 : vector<8x64xf32>
    %cst_29 = arith.constant 1.000000e+00 : f32
    %43 = vector.broadcast %cst_29 : f32 to vector<8x64xf32>
    %44 = arith.addf %43, %42 : vector<8x64xf32>
    %45 = arith.divf %43, %44 : vector<8x64xf32>
    %46 = arith.negf %39 : vector<8x64xf32>
    %47 = math.exp %46 : vector<8x64xf32>
    %cst_30 = arith.constant 1.000000e+00 : f32
    %48 = vector.broadcast %cst_30 : f32 to vector<8x64xf32>
    %49 = arith.addf %48, %47 : vector<8x64xf32>
    %50 = arith.divf %48, %49 : vector<8x64xf32>
    %51 = arith.mulf %45, %40 : vector<8x64xf32>
    %52 = vector.broadcast %23 : vector<1x64xf32> to vector<8x64xf32>
    %53 = arith.addf %52, %51 : vector<8x64xf32>
    %54 = math.tanh %53 : vector<8x64xf32>
    %cst_31 = arith.constant 1.000000e+00 : f32
    %55 = vector.broadcast %cst_31 : f32 to vector<8x64xf32>
    %56 = arith.subf %55, %50 : vector<8x64xf32>
    %57 = arith.mulf %56, %54 : vector<8x64xf32>
    %58 = arith.mulf %50, %26 : vector<8x64xf32>
    %59 = arith.addf %57, %58 : vector<8x64xf32>
    %60 = arith.truncf %59 : vector<8x64xf32> to vector<8x64xbf16>
    %cst_32 = arith.constant dense<0.000000e+00> : vector<8x256xf32>
    %61 = tpu.matmul %60, %21, %cst_32 {dimension_numbers = #tpu.dot_dimension_numbers<[1], [0], [0], [1], [0, 0, 1, 1], [], []>} : vector<8x64xbf16>, vector<64x256xbf16>, vector<8x256xf32> -> vector<8x256xf32>
    %62 = vector.broadcast %22 : vector<1x256xf32> to vector<8x256xf32>
    %63 = arith.addf %61, %62 : vector<8x256xf32>
    %64 = vector.extract_strided_slice %63 {offsets = [0, 192], sizes = [8, 2], strides = [1, 1]} : vector<8x256xf32> to vector<8x2xf32>
    %65 = arith.addf %36, %64 : vector<8x2xf32>
    %66 = vector.extract_strided_slice %35 {offsets = [0, 0], sizes = [8, 64], strides = [1, 1]} : vector<8x256xf32> to vector<8x64xf32>
    %67 = vector.extract_strided_slice %35 {offsets = [0, 64], sizes = [8, 64], strides = [1, 1]} : vector<8x256xf32> to vector<8x64xf32>
    %68 = vector.extract_strided_slice %35 {offsets = [0, 128], sizes = [8, 64], strides = [1, 1]} : vector<8x256xf32> to vector<8x64xf32>
    %69 = arith.negf %66 : vector<8x64xf32>
    %70 = math.exp %69 : vector<8x64xf32>
    %cst_33 = arith.constant 1.000000e+00 : f32
    %71 = vector.broadcast %cst_33 : f32 to vector<8x64xf32>
    %72 = arith.addf %71, %70 : vector<8x64xf32>
    %73 = arith.divf %71, %72 : vector<8x64xf32>
    %74 = arith.negf %67 : vector<8x64xf32>
    %75 = math.exp %74 : vector<8x64xf32>
    %cst_34 = arith.constant 1.000000e+00 : f32
    %76 = vector.broadcast %cst_34 : f32 to vector<8x64xf32>
    %77 = arith.addf %76, %75 : vector<8x64xf32>
    %78 = arith.divf %76, %77 : vector<8x64xf32>
    %79 = arith.mulf %73, %68 : vector<8x64xf32>
    %80 = vector.broadcast %23 : vector<1x64xf32> to vector<8x64xf32>
    %81 = arith.addf %80, %79 : vector<8x64xf32>
    %82 = math.tanh %81 : vector<8x64xf32>
    %cst_35 = arith.constant 1.000000e+00 : f32
    %83 = vector.broadcast %cst_35 : f32 to vector<8x64xf32>
    %84 = arith.subf %83, %78 : vector<8x64xf32>
    %85 = arith.mulf %84, %82 : vector<8x64xf32>
    %86 = arith.mulf %78, %27 : vector<8x64xf32>
    %87 = arith.addf %85, %86 : vector<8x64xf32>
    %88 = arith.truncf %87 : vector<8x64xf32> to vector<8x64xbf16>
    %cst_36 = arith.constant dense<0.000000e+00> : vector<8x256xf32>
    %89 = tpu.matmul %88, %21, %cst_36 {dimension_numbers = #tpu.dot_dimension_numbers<[1], [0], [0], [1], [0, 0, 1, 1], [], []>} : vector<8x64xbf16>, vector<64x256xbf16>, vector<8x256xf32> -> vector<8x256xf32>
    %90 = vector.broadcast %22 : vector<1x256xf32> to vector<8x256xf32>
    %91 = arith.addf %89, %90 : vector<8x256xf32>
    %92 = vector.extract_strided_slice %91 {offsets = [0, 192], sizes = [8, 2], strides = [1, 1]} : vector<8x256xf32> to vector<8x2xf32>
    %93 = arith.addf %37, %92 : vector<8x2xf32>
    %c0_37 = arith.constant 0 : index
    %c0_38 = arith.constant 0 : index
    %94 = vector.load %arg11[%c0_37, %c0_38] : memref<16x16xf32, #tpu.memory_space<vmem>>, vector<8x2xf32>
    tpu.vector_store %arg11[%c0_37, %c0_38], %65 {strides = array<i32>} : memref<16x16xf32, #tpu.memory_space<vmem>>, vector<8x2xf32>,
    %c8 = arith.constant 8 : index
    %c0_39 = arith.constant 0 : index
    %95 = vector.load %arg11[%c8, %c0_39] : memref<16x16xf32, #tpu.memory_space<vmem>>, vector<8x2xf32>
    tpu.vector_store %arg11[%c8, %c0_39], %93 {strides = array<i32>} : memref<16x16xf32, #tpu.memory_space<vmem>>, vector<8x2xf32>,
    %96 = vector.extract_strided_slice %63 {offsets = [0, 0], sizes = [8, 64], strides = [1, 1]} : vector<8x256xf32> to vector<8x64xf32>
    %97 = vector.extract_strided_slice %63 {offsets = [0, 64], sizes = [8, 64], strides = [1, 1]} : vector<8x256xf32> to vector<8x64xf32>
    %98 = vector.extract_strided_slice %63 {offsets = [0, 128], sizes = [8, 64], strides = [1, 1]} : vector<8x256xf32> to vector<8x64xf32>
    %99 = vector.extract_strided_slice %65 {offsets = [0, 0], sizes = [8, 1], strides = [1, 1]} : vector<8x2xf32> to vector<8x1xf32>
    %100 = vector.broadcast %99 : vector<8x1xf32> to vector<8x192xf32>
    %101 = vector.broadcast %24 : vector<1x192xf32> to vector<8x192xf32>
    %102 = arith.mulf %100, %101 : vector<8x192xf32>
    %103 = vector.extract_strided_slice %65 {offsets = [0, 1], sizes = [8, 1], strides = [1, 1]} : vector<8x2xf32> to vector<8x1xf32>
    %104 = vector.broadcast %103 : vector<8x1xf32> to vector<8x192xf32>
    %105 = vector.broadcast %25 : vector<1x192xf32> to vector<8x192xf32>
    %106 = arith.mulf %104, %105 : vector<8x192xf32>
    %107 = arith.addf %102, %106 : vector<8x192xf32>
    %108 = vector.extract_strided_slice %107 {offsets = [0, 0], sizes = [8, 64], strides = [1, 1]} : vector<8x192xf32> to vector<8x64xf32>
    %109 = arith.addf %108, %96 : vector<8x64xf32>
    %110 = arith.negf %109 : vector<8x64xf32>
    %111 = math.exp %110 : vector<8x64xf32>
    %cst_40 = arith.constant 1.000000e+00 : f32
    %112 = vector.broadcast %cst_40 : f32 to vector<8x64xf32>
    %113 = arith.addf %112, %111 : vector<8x64xf32>
    %114 = arith.divf %112, %113 : vector<8x64xf32>
    %115 = vector.extract_strided_slice %107 {offsets = [0, 64], sizes = [8, 64], strides = [1, 1]} : vector<8x192xf32> to vector<8x64xf32>
    %116 = arith.addf %115, %97 : vector<8x64xf32>
    %117 = arith.negf %116 : vector<8x64xf32>
    %118 = math.exp %117 : vector<8x64xf32>
    %cst_41 = arith.constant 1.000000e+00 : f32
    %119 = vector.broadcast %cst_41 : f32 to vector<8x64xf32>
    %120 = arith.addf %119, %118 : vector<8x64xf32>
    %121 = arith.divf %119, %120 : vector<8x64xf32>
    %122 = vector.extract_strided_slice %107 {offsets = [0, 128], sizes = [8, 64], strides = [1, 1]} : vector<8x192xf32> to vector<8x64xf32>
    %123 = vector.broadcast %23 : vector<1x64xf32> to vector<8x64xf32>
    %124 = arith.addf %122, %123 : vector<8x64xf32>
    %125 = arith.mulf %114, %98 : vector<8x64xf32>
    %126 = arith.addf %124, %125 : vector<8x64xf32>
    %127 = math.tanh %126 : vector<8x64xf32>
    %cst_42 = arith.constant 1.000000e+00 : f32
    %128 = vector.broadcast %cst_42 : f32 to vector<8x64xf32>
    %129 = arith.subf %128, %121 : vector<8x64xf32>
    %130 = arith.mulf %129, %127 : vector<8x64xf32>
    %131 = arith.mulf %121, %59 : vector<8x64xf32>
    %132 = arith.addf %130, %131 : vector<8x64xf32>
    %133 = arith.truncf %132 : vector<8x64xf32> to vector<8x64xbf16>
    %cst_43 = arith.constant dense<0.000000e+00> : vector<8x256xf32>
    %134 = tpu.matmul %133, %21, %cst_43 {dimension_numbers = #tpu.dot_dimension_numbers<[1], [0], [0], [1], [0, 0, 1, 1], [], []>} : vector<8x64xbf16>, vector<64x256xbf16>, vector<8x256xf32> -> vector<8x256xf32>
    %135 = vector.broadcast %22 : vector<1x256xf32> to vector<8x256xf32>
    %136 = arith.addf %134, %135 : vector<8x256xf32>
    %137 = vector.extract_strided_slice %136 {offsets = [0, 192], sizes = [8, 2], strides = [1, 1]} : vector<8x256xf32> to vector<8x2xf32>
    %138 = arith.addf %65, %137 : vector<8x2xf32>
    %139 = vector.extract_strided_slice %91 {offsets = [0, 0], sizes = [8, 64], strides = [1, 1]} : vector<8x256xf32> to vector<8x64xf32>
    %140 = vector.extract_strided_slice %91 {offsets = [0, 64], sizes = [8, 64], strides = [1, 1]} : vector<8x256xf32> to vector<8x64xf32>
    %141 = vector.extract_strided_slice %91 {offsets = [0, 128], sizes = [8, 64], strides = [1, 1]} : vector<8x256xf32> to vector<8x64xf32>
    %142 = vector.extract_strided_slice %93 {offsets = [0, 0], sizes = [8, 1], strides = [1, 1]} : vector<8x2xf32> to vector<8x1xf32>
    %143 = vector.broadcast %142 : vector<8x1xf32> to vector<8x192xf32>
    %144 = vector.broadcast %24 : vector<1x192xf32> to vector<8x192xf32>
    %145 = arith.mulf %143, %144 : vector<8x192xf32>
    %146 = vector.extract_strided_slice %93 {offsets = [0, 1], sizes = [8, 1], strides = [1, 1]} : vector<8x2xf32> to vector<8x1xf32>
    %147 = vector.broadcast %146 : vector<8x1xf32> to vector<8x192xf32>
    %148 = vector.broadcast %25 : vector<1x192xf32> to vector<8x192xf32>
    %149 = arith.mulf %147, %148 : vector<8x192xf32>
    %150 = arith.addf %145, %149 : vector<8x192xf32>
    %151 = vector.extract_strided_slice %150 {offsets = [0, 0], sizes = [8, 64], strides = [1, 1]} : vector<8x192xf32> to vector<8x64xf32>
    %152 = arith.addf %151, %139 : vector<8x64xf32>
    %153 = arith.negf %152 : vector<8x64xf32>
    %154 = math.exp %153 : vector<8x64xf32>
    %cst_44 = arith.constant 1.000000e+00 : f32
    %155 = vector.broadcast %cst_44 : f32 to vector<8x64xf32>
    %156 = arith.addf %155, %154 : vector<8x64xf32>
    %157 = arith.divf %155, %156 : vector<8x64xf32>
    %158 = vector.extract_strided_slice %150 {offsets = [0, 64], sizes = [8, 64], strides = [1, 1]} : vector<8x192xf32> to vector<8x64xf32>
    %159 = arith.addf %158, %140 : vector<8x64xf32>
    %160 = arith.negf %159 : vector<8x64xf32>
    %161 = math.exp %160 : vector<8x64xf32>
    %cst_45 = arith.constant 1.000000e+00 : f32
    %162 = vector.broadcast %cst_45 : f32 to vector<8x64xf32>
    %163 = arith.addf %162, %161 : vector<8x64xf32>
    %164 = arith.divf %162, %163 : vector<8x64xf32>
    %165 = vector.extract_strided_slice %150 {offsets = [0, 128], sizes = [8, 64], strides = [1, 1]} : vector<8x192xf32> to vector<8x64xf32>
    %166 = vector.broadcast %23 : vector<1x64xf32> to vector<8x64xf32>
    %167 = arith.addf %165, %166 : vector<8x64xf32>
    %168 = arith.mulf %157, %141 : vector<8x64xf32>
    %169 = arith.addf %167, %168 : vector<8x64xf32>
    %170 = math.tanh %169 : vector<8x64xf32>
    %cst_46 = arith.constant 1.000000e+00 : f32
    %171 = vector.broadcast %cst_46 : f32 to vector<8x64xf32>
    %172 = arith.subf %171, %164 : vector<8x64xf32>
    %173 = arith.mulf %172, %170 : vector<8x64xf32>
    %174 = arith.mulf %164, %87 : vector<8x64xf32>
    %175 = arith.addf %173, %174 : vector<8x64xf32>
    %176 = arith.truncf %175 : vector<8x64xf32> to vector<8x64xbf16>
    %cst_47 = arith.constant dense<0.000000e+00> : vector<8x256xf32>
    %177 = tpu.matmul %176, %21, %cst_47 {dimension_numbers = #tpu.dot_dimension_numbers<[1], [0], [0], [1], [0, 0, 1, 1], [], []>} : vector<8x64xbf16>, vector<64x256xbf16>, vector<8x256xf32> -> vector<8x256xf32>
    %178 = vector.broadcast %22 : vector<1x256xf32> to vector<8x256xf32>
    %179 = arith.addf %177, %178 : vector<8x256xf32>
    %180 = vector.extract_strided_slice %179 {offsets = [0, 192], sizes = [8, 2], strides = [1, 1]} : vector<8x256xf32> to vector<8x2xf32>
    %181 = arith.addf %93, %180 : vector<8x2xf32>
    %c0_48 = arith.constant 0 : index
    %c2 = arith.constant 2 : index
    %182 = vector.load %arg11[%c0_48, %c2] : memref<16x16xf32, #tpu.memory_space<vmem>>, vector<8x2xf32>
    tpu.vector_store %arg11[%c0_48, %c2], %138 {strides = array<i32>} : memref<16x16xf32, #tpu.memory_space<vmem>>, vector<8x2xf32>,
    %c8_49 = arith.constant 8 : index
    %c2_50 = arith.constant 2 : index
    %183 = vector.load %arg11[%c8_49, %c2_50] : memref<16x16xf32, #tpu.memory_space<vmem>>, vector<8x2xf32>
    tpu.vector_store %arg11[%c8_49, %c2_50], %181 {strides = array<i32>} : memref<16x16xf32, #tpu.memory_space<vmem>>, vector<8x2xf32>,
    %184 = vector.extract_strided_slice %136 {offsets = [0, 0], sizes = [8, 64], strides = [1, 1]} : vector<8x256xf32> to vector<8x64xf32>
    %185 = vector.extract_strided_slice %136 {offsets = [0, 64], sizes = [8, 64], strides = [1, 1]} : vector<8x256xf32> to vector<8x64xf32>
    %186 = vector.extract_strided_slice %136 {offsets = [0, 128], sizes = [8, 64], strides = [1, 1]} : vector<8x256xf32> to vector<8x64xf32>
    %187 = vector.extract_strided_slice %138 {offsets = [0, 0], sizes = [8, 1], strides = [1, 1]} : vector<8x2xf32> to vector<8x1xf32>
    %188 = vector.broadcast %187 : vector<8x1xf32> to vector<8x192xf32>
    %189 = vector.broadcast %24 : vector<1x192xf32> to vector<8x192xf32>
    %190 = arith.mulf %188, %189 : vector<8x192xf32>
    %191 = vector.extract_strided_slice %138 {offsets = [0, 1], sizes = [8, 1], strides = [1, 1]} : vector<8x2xf32> to vector<8x1xf32>
    %192 = vector.broadcast %191 : vector<8x1xf32> to vector<8x192xf32>
    %193 = vector.broadcast %25 : vector<1x192xf32> to vector<8x192xf32>
    %194 = arith.mulf %192, %193 : vector<8x192xf32>
    %195 = arith.addf %190, %194 : vector<8x192xf32>
    %196 = vector.extract_strided_slice %195 {offsets = [0, 0], sizes = [8, 64], strides = [1, 1]} : vector<8x192xf32> to vector<8x64xf32>
    %197 = arith.addf %196, %184 : vector<8x64xf32>
    %198 = arith.negf %197 : vector<8x64xf32>
    %199 = math.exp %198 : vector<8x64xf32>
    %cst_51 = arith.constant 1.000000e+00 : f32
    %200 = vector.broadcast %cst_51 : f32 to vector<8x64xf32>
    %201 = arith.addf %200, %199 : vector<8x64xf32>
    %202 = arith.divf %200, %201 : vector<8x64xf32>
    %203 = vector.extract_strided_slice %195 {offsets = [0, 64], sizes = [8, 64], strides = [1, 1]} : vector<8x192xf32> to vector<8x64xf32>
    %204 = arith.addf %203, %185 : vector<8x64xf32>
    %205 = arith.negf %204 : vector<8x64xf32>
    %206 = math.exp %205 : vector<8x64xf32>
    %cst_52 = arith.constant 1.000000e+00 : f32
    %207 = vector.broadcast %cst_52 : f32 to vector<8x64xf32>
    %208 = arith.addf %207, %206 : vector<8x64xf32>
    %209 = arith.divf %207, %208 : vector<8x64xf32>
    %210 = vector.extract_strided_slice %195 {offsets = [0, 128], sizes = [8, 64], strides = [1, 1]} : vector<8x192xf32> to vector<8x64xf32>
    %211 = vector.broadcast %23 : vector<1x64xf32> to vector<8x64xf32>
    %212 = arith.addf %210, %211 : vector<8x64xf32>
    %213 = arith.mulf %202, %186 : vector<8x64xf32>
    %214 = arith.addf %212, %213 : vector<8x64xf32>
    %215 = math.tanh %214 : vector<8x64xf32>
    %cst_53 = arith.constant 1.000000e+00 : f32
    %216 = vector.broadcast %cst_53 : f32 to vector<8x64xf32>
    %217 = arith.subf %216, %209 : vector<8x64xf32>
    %218 = arith.mulf %217, %215 : vector<8x64xf32>
    %219 = arith.mulf %209, %132 : vector<8x64xf32>
    %220 = arith.addf %218, %219 : vector<8x64xf32>
    %221 = arith.truncf %220 : vector<8x64xf32> to vector<8x64xbf16>
    %cst_54 = arith.constant dense<0.000000e+00> : vector<8x256xf32>
    %222 = tpu.matmul %221, %21, %cst_54 {dimension_numbers = #tpu.dot_dimension_numbers<[1], [0], [0], [1], [0, 0, 1, 1], [], []>} : vector<8x64xbf16>, vector<64x256xbf16>, vector<8x256xf32> -> vector<8x256xf32>
    %223 = vector.broadcast %22 : vector<1x256xf32> to vector<8x256xf32>
    %224 = arith.addf %222, %223 : vector<8x256xf32>
    %225 = vector.extract_strided_slice %224 {offsets = [0, 192], sizes = [8, 2], strides = [1, 1]} : vector<8x256xf32> to vector<8x2xf32>
    %226 = arith.addf %138, %225 : vector<8x2xf32>
    %227 = vector.extract_strided_slice %179 {offsets = [0, 0], sizes = [8, 64], strides = [1, 1]} : vector<8x256xf32> to vector<8x64xf32>
    %228 = vector.extract_strided_slice %179 {offsets = [0, 64], sizes = [8, 64], strides = [1, 1]} : vector<8x256xf32> to vector<8x64xf32>
    %229 = vector.extract_strided_slice %179 {offsets = [0, 128], sizes = [8, 64], strides = [1, 1]} : vector<8x256xf32> to vector<8x64xf32>
    %230 = vector.extract_strided_slice %181 {offsets = [0, 0], sizes = [8, 1], strides = [1, 1]} : vector<8x2xf32> to vector<8x1xf32>
    %231 = vector.broadcast %230 : vector<8x1xf32> to vector<8x192xf32>
    %232 = vector.broadcast %24 : vector<1x192xf32> to vector<8x192xf32>
    %233 = arith.mulf %231, %232 : vector<8x192xf32>
    %234 = vector.extract_strided_slice %181 {offsets = [0, 1], sizes = [8, 1], strides = [1, 1]} : vector<8x2xf32> to vector<8x1xf32>
    %235 = vector.broadcast %234 : vector<8x1xf32> to vector<8x192xf32>
    %236 = vector.broadcast %25 : vector<1x192xf32> to vector<8x192xf32>
    %237 = arith.mulf %235, %236 : vector<8x192xf32>
    %238 = arith.addf %233, %237 : vector<8x192xf32>
    %239 = vector.extract_strided_slice %238 {offsets = [0, 0], sizes = [8, 64], strides = [1, 1]} : vector<8x192xf32> to vector<8x64xf32>
    %240 = arith.addf %239, %227 : vector<8x64xf32>
    %241 = arith.negf %240 : vector<8x64xf32>
    %242 = math.exp %241 : vector<8x64xf32>
    %cst_55 = arith.constant 1.000000e+00 : f32
    %243 = vector.broadcast %cst_55 : f32 to vector<8x64xf32>
    %244 = arith.addf %243, %242 : vector<8x64xf32>
    %245 = arith.divf %243, %244 : vector<8x64xf32>
    %246 = vector.extract_strided_slice %238 {offsets = [0, 64], sizes = [8, 64], strides = [1, 1]} : vector<8x192xf32> to vector<8x64xf32>
    %247 = arith.addf %246, %228 : vector<8x64xf32>
    %248 = arith.negf %247 : vector<8x64xf32>
    %249 = math.exp %248 : vector<8x64xf32>
    %cst_56 = arith.constant 1.000000e+00 : f32
    %250 = vector.broadcast %cst_56 : f32 to vector<8x64xf32>
    %251 = arith.addf %250, %249 : vector<8x64xf32>
    %252 = arith.divf %250, %251 : vector<8x64xf32>
    %253 = vector.extract_strided_slice %238 {offsets = [0, 128], sizes = [8, 64], strides = [1, 1]} : vector<8x192xf32> to vector<8x64xf32>
    %254 = vector.broadcast %23 : vector<1x64xf32> to vector<8x64xf32>
    %255 = arith.addf %253, %254 : vector<8x64xf32>
    %256 = arith.mulf %245, %229 : vector<8x64xf32>
    %257 = arith.addf %255, %256 : vector<8x64xf32>
    %258 = math.tanh %257 : vector<8x64xf32>
    %cst_57 = arith.constant 1.000000e+00 : f32
    %259 = vector.broadcast %cst_57 : f32 to vector<8x64xf32>
    %260 = arith.subf %259, %252 : vector<8x64xf32>
    %261 = arith.mulf %260, %258 : vector<8x64xf32>
    %262 = arith.mulf %252, %175 : vector<8x64xf32>
    %263 = arith.addf %261, %262 : vector<8x64xf32>
    %264 = arith.truncf %263 : vector<8x64xf32> to vector<8x64xbf16>
    %cst_58 = arith.constant dense<0.000000e+00> : vector<8x256xf32>
    %265 = tpu.matmul %264, %21, %cst_58 {dimension_numbers = #tpu.dot_dimension_numbers<[1], [0], [0], [1], [0, 0, 1, 1], [], []>} : vector<8x64xbf16>, vector<64x256xbf16>, vector<8x256xf32> -> vector<8x256xf32>
    %266 = vector.broadcast %22 : vector<1x256xf32> to vector<8x256xf32>
    %267 = arith.addf %265, %266 : vector<8x256xf32>
    %268 = vector.extract_strided_slice %267 {offsets = [0, 192], sizes = [8, 2], strides = [1, 1]} : vector<8x256xf32> to vector<8x2xf32>
    %269 = arith.addf %181, %268 : vector<8x2xf32>
    %c0_59 = arith.constant 0 : index
    %c4 = arith.constant 4 : index
    %270 = vector.load %arg11[%c0_59, %c4] : memref<16x16xf32, #tpu.memory_space<vmem>>, vector<8x2xf32>
    tpu.vector_store %arg11[%c0_59, %c4], %226 {strides = array<i32>} : memref<16x16xf32, #tpu.memory_space<vmem>>, vector<8x2xf32>,
    %c8_60 = arith.constant 8 : index
    %c4_61 = arith.constant 4 : index
    %271 = vector.load %arg11[%c8_60, %c4_61] : memref<16x16xf32, #tpu.memory_space<vmem>>, vector<8x2xf32>
    tpu.vector_store %arg11[%c8_60, %c4_61], %269 {strides = array<i32>} : memref<16x16xf32, #tpu.memory_space<vmem>>, vector<8x2xf32>,
    %272 = vector.extract_strided_slice %224 {offsets = [0, 0], sizes = [8, 64], strides = [1, 1]} : vector<8x256xf32> to vector<8x64xf32>
    %273 = vector.extract_strided_slice %224 {offsets = [0, 64], sizes = [8, 64], strides = [1, 1]} : vector<8x256xf32> to vector<8x64xf32>
    %274 = vector.extract_strided_slice %224 {offsets = [0, 128], sizes = [8, 64], strides = [1, 1]} : vector<8x256xf32> to vector<8x64xf32>
    %275 = vector.extract_strided_slice %226 {offsets = [0, 0], sizes = [8, 1], strides = [1, 1]} : vector<8x2xf32> to vector<8x1xf32>
    %276 = vector.broadcast %275 : vector<8x1xf32> to vector<8x192xf32>
    %277 = vector.broadcast %24 : vector<1x192xf32> to vector<8x192xf32>
    %278 = arith.mulf %276, %277 : vector<8x192xf32>
    %279 = vector.extract_strided_slice %226 {offsets = [0, 1], sizes = [8, 1], strides = [1, 1]} : vector<8x2xf32> to vector<8x1xf32>
    %280 = vector.broadcast %279 : vector<8x1xf32> to vector<8x192xf32>
    %281 = vector.broadcast %25 : vector<1x192xf32> to vector<8x192xf32>
    %282 = arith.mulf %280, %281 : vector<8x192xf32>
    %283 = arith.addf %278, %282 : vector<8x192xf32>
    %284 = vector.extract_strided_slice %283 {offsets = [0, 0], sizes = [8, 64], strides = [1, 1]} : vector<8x192xf32> to vector<8x64xf32>
    %285 = arith.addf %284, %272 : vector<8x64xf32>
    %286 = arith.negf %285 : vector<8x64xf32>
    %287 = math.exp %286 : vector<8x64xf32>
    %cst_62 = arith.constant 1.000000e+00 : f32
    %288 = vector.broadcast %cst_62 : f32 to vector<8x64xf32>
    %289 = arith.addf %288, %287 : vector<8x64xf32>
    %290 = arith.divf %288, %289 : vector<8x64xf32>
    %291 = vector.extract_strided_slice %283 {offsets = [0, 64], sizes = [8, 64], strides = [1, 1]} : vector<8x192xf32> to vector<8x64xf32>
    %292 = arith.addf %291, %273 : vector<8x64xf32>
    %293 = arith.negf %292 : vector<8x64xf32>
    %294 = math.exp %293 : vector<8x64xf32>
    %cst_63 = arith.constant 1.000000e+00 : f32
    %295 = vector.broadcast %cst_63 : f32 to vector<8x64xf32>
    %296 = arith.addf %295, %294 : vector<8x64xf32>
    %297 = arith.divf %295, %296 : vector<8x64xf32>
    %298 = vector.extract_strided_slice %283 {offsets = [0, 128], sizes = [8, 64], strides = [1, 1]} : vector<8x192xf32> to vector<8x64xf32>
    %299 = vector.broadcast %23 : vector<1x64xf32> to vector<8x64xf32>
    %300 = arith.addf %298, %299 : vector<8x64xf32>
    %301 = arith.mulf %290, %274 : vector<8x64xf32>
    %302 = arith.addf %300, %301 : vector<8x64xf32>
    %303 = math.tanh %302 : vector<8x64xf32>
    %cst_64 = arith.constant 1.000000e+00 : f32
    %304 = vector.broadcast %cst_64 : f32 to vector<8x64xf32>
    %305 = arith.subf %304, %297 : vector<8x64xf32>
    %306 = arith.mulf %305, %303 : vector<8x64xf32>
    %307 = arith.mulf %297, %220 : vector<8x64xf32>
    %308 = arith.addf %306, %307 : vector<8x64xf32>
    %309 = arith.truncf %308 : vector<8x64xf32> to vector<8x64xbf16>
    %cst_65 = arith.constant dense<0.000000e+00> : vector<8x256xf32>
    %310 = tpu.matmul %309, %21, %cst_65 {dimension_numbers = #tpu.dot_dimension_numbers<[1], [0], [0], [1], [0, 0, 1, 1], [], []>} : vector<8x64xbf16>, vector<64x256xbf16>, vector<8x256xf32> -> vector<8x256xf32>
    %311 = vector.broadcast %22 : vector<1x256xf32> to vector<8x256xf32>
    %312 = arith.addf %310, %311 : vector<8x256xf32>
    %313 = vector.extract_strided_slice %312 {offsets = [0, 192], sizes = [8, 2], strides = [1, 1]} : vector<8x256xf32> to vector<8x2xf32>
    %314 = arith.addf %226, %313 : vector<8x2xf32>
    %315 = vector.extract_strided_slice %267 {offsets = [0, 0], sizes = [8, 64], strides = [1, 1]} : vector<8x256xf32> to vector<8x64xf32>
    %316 = vector.extract_strided_slice %267 {offsets = [0, 64], sizes = [8, 64], strides = [1, 1]} : vector<8x256xf32> to vector<8x64xf32>
    %317 = vector.extract_strided_slice %267 {offsets = [0, 128], sizes = [8, 64], strides = [1, 1]} : vector<8x256xf32> to vector<8x64xf32>
    %318 = vector.extract_strided_slice %269 {offsets = [0, 0], sizes = [8, 1], strides = [1, 1]} : vector<8x2xf32> to vector<8x1xf32>
    %319 = vector.broadcast %318 : vector<8x1xf32> to vector<8x192xf32>
    %320 = vector.broadcast %24 : vector<1x192xf32> to vector<8x192xf32>
    %321 = arith.mulf %319, %320 : vector<8x192xf32>
    %322 = vector.extract_strided_slice %269 {offsets = [0, 1], sizes = [8, 1], strides = [1, 1]} : vector<8x2xf32> to vector<8x1xf32>
    %323 = vector.broadcast %322 : vector<8x1xf32> to vector<8x192xf32>
    %324 = vector.broadcast %25 : vector<1x192xf32> to vector<8x192xf32>
    %325 = arith.mulf %323, %324 : vector<8x192xf32>
    %326 = arith.addf %321, %325 : vector<8x192xf32>
    %327 = vector.extract_strided_slice %326 {offsets = [0, 0], sizes = [8, 64], strides = [1, 1]} : vector<8x192xf32> to vector<8x64xf32>
    %328 = arith.addf %327, %315 : vector<8x64xf32>
    %329 = arith.negf %328 : vector<8x64xf32>
    %330 = math.exp %329 : vector<8x64xf32>
    %cst_66 = arith.constant 1.000000e+00 : f32
    %331 = vector.broadcast %cst_66 : f32 to vector<8x64xf32>
    %332 = arith.addf %331, %330 : vector<8x64xf32>
    %333 = arith.divf %331, %332 : vector<8x64xf32>
    %334 = vector.extract_strided_slice %326 {offsets = [0, 64], sizes = [8, 64], strides = [1, 1]} : vector<8x192xf32> to vector<8x64xf32>
    %335 = arith.addf %334, %316 : vector<8x64xf32>
    %336 = arith.negf %335 : vector<8x64xf32>
    %337 = math.exp %336 : vector<8x64xf32>
    %cst_67 = arith.constant 1.000000e+00 : f32
    %338 = vector.broadcast %cst_67 : f32 to vector<8x64xf32>
    %339 = arith.addf %338, %337 : vector<8x64xf32>
    %340 = arith.divf %338, %339 : vector<8x64xf32>
    %341 = vector.extract_strided_slice %326 {offsets = [0, 128], sizes = [8, 64], strides = [1, 1]} : vector<8x192xf32> to vector<8x64xf32>
    %342 = vector.broadcast %23 : vector<1x64xf32> to vector<8x64xf32>
    %343 = arith.addf %341, %342 : vector<8x64xf32>
    %344 = arith.mulf %333, %317 : vector<8x64xf32>
    %345 = arith.addf %343, %344 : vector<8x64xf32>
    %346 = math.tanh %345 : vector<8x64xf32>
    %cst_68 = arith.constant 1.000000e+00 : f32
    %347 = vector.broadcast %cst_68 : f32 to vector<8x64xf32>
    %348 = arith.subf %347, %340 : vector<8x64xf32>
    %349 = arith.mulf %348, %346 : vector<8x64xf32>
    %350 = arith.mulf %340, %263 : vector<8x64xf32>
    %351 = arith.addf %349, %350 : vector<8x64xf32>
    %352 = arith.truncf %351 : vector<8x64xf32> to vector<8x64xbf16>
    %cst_69 = arith.constant dense<0.000000e+00> : vector<8x256xf32>
    %353 = tpu.matmul %352, %21, %cst_69 {dimension_numbers = #tpu.dot_dimension_numbers<[1], [0], [0], [1], [0, 0, 1, 1], [], []>} : vector<8x64xbf16>, vector<64x256xbf16>, vector<8x256xf32> -> vector<8x256xf32>
    %354 = vector.broadcast %22 : vector<1x256xf32> to vector<8x256xf32>
    %355 = arith.addf %353, %354 : vector<8x256xf32>
    %356 = vector.extract_strided_slice %355 {offsets = [0, 192], sizes = [8, 2], strides = [1, 1]} : vector<8x256xf32> to vector<8x2xf32>
    %357 = arith.addf %269, %356 : vector<8x2xf32>
    %c0_70 = arith.constant 0 : index
    %c6 = arith.constant 6 : index
    %358 = vector.load %arg11[%c0_70, %c6] : memref<16x16xf32, #tpu.memory_space<vmem>>, vector<8x2xf32>
    tpu.vector_store %arg11[%c0_70, %c6], %314 {strides = array<i32>} : memref<16x16xf32, #tpu.memory_space<vmem>>, vector<8x2xf32>,
    %c8_71 = arith.constant 8 : index
    %c6_72 = arith.constant 6 : index
    %359 = vector.load %arg11[%c8_71, %c6_72] : memref<16x16xf32, #tpu.memory_space<vmem>>, vector<8x2xf32>
    tpu.vector_store %arg11[%c8_71, %c6_72], %357 {strides = array<i32>} : memref<16x16xf32, #tpu.memory_space<vmem>>, vector<8x2xf32>,
    %360 = vector.extract_strided_slice %312 {offsets = [0, 0], sizes = [8, 64], strides = [1, 1]} : vector<8x256xf32> to vector<8x64xf32>
    %361 = vector.extract_strided_slice %312 {offsets = [0, 64], sizes = [8, 64], strides = [1, 1]} : vector<8x256xf32> to vector<8x64xf32>
    %362 = vector.extract_strided_slice %312 {offsets = [0, 128], sizes = [8, 64], strides = [1, 1]} : vector<8x256xf32> to vector<8x64xf32>
    %363 = vector.extract_strided_slice %314 {offsets = [0, 0], sizes = [8, 1], strides = [1, 1]} : vector<8x2xf32> to vector<8x1xf32>
    %364 = vector.broadcast %363 : vector<8x1xf32> to vector<8x192xf32>
    %365 = vector.broadcast %24 : vector<1x192xf32> to vector<8x192xf32>
    %366 = arith.mulf %364, %365 : vector<8x192xf32>
    %367 = vector.extract_strided_slice %314 {offsets = [0, 1], sizes = [8, 1], strides = [1, 1]} : vector<8x2xf32> to vector<8x1xf32>
    %368 = vector.broadcast %367 : vector<8x1xf32> to vector<8x192xf32>
    %369 = vector.broadcast %25 : vector<1x192xf32> to vector<8x192xf32>
    %370 = arith.mulf %368, %369 : vector<8x192xf32>
    %371 = arith.addf %366, %370 : vector<8x192xf32>
    %372 = vector.extract_strided_slice %371 {offsets = [0, 0], sizes = [8, 64], strides = [1, 1]} : vector<8x192xf32> to vector<8x64xf32>
    %373 = arith.addf %372, %360 : vector<8x64xf32>
    %374 = arith.negf %373 : vector<8x64xf32>
    %375 = math.exp %374 : vector<8x64xf32>
    %cst_73 = arith.constant 1.000000e+00 : f32
    %376 = vector.broadcast %cst_73 : f32 to vector<8x64xf32>
    %377 = arith.addf %376, %375 : vector<8x64xf32>
    %378 = arith.divf %376, %377 : vector<8x64xf32>
    %379 = vector.extract_strided_slice %371 {offsets = [0, 64], sizes = [8, 64], strides = [1, 1]} : vector<8x192xf32> to vector<8x64xf32>
    %380 = arith.addf %379, %361 : vector<8x64xf32>
    %381 = arith.negf %380 : vector<8x64xf32>
    %382 = math.exp %381 : vector<8x64xf32>
    %cst_74 = arith.constant 1.000000e+00 : f32
    %383 = vector.broadcast %cst_74 : f32 to vector<8x64xf32>
    %384 = arith.addf %383, %382 : vector<8x64xf32>
    %385 = arith.divf %383, %384 : vector<8x64xf32>
    %386 = vector.extract_strided_slice %371 {offsets = [0, 128], sizes = [8, 64], strides = [1, 1]} : vector<8x192xf32> to vector<8x64xf32>
    %387 = vector.broadcast %23 : vector<1x64xf32> to vector<8x64xf32>
    %388 = arith.addf %386, %387 : vector<8x64xf32>
    %389 = arith.mulf %378, %362 : vector<8x64xf32>
    %390 = arith.addf %388, %389 : vector<8x64xf32>
    %391 = math.tanh %390 : vector<8x64xf32>
    %cst_75 = arith.constant 1.000000e+00 : f32
    %392 = vector.broadcast %cst_75 : f32 to vector<8x64xf32>
    %393 = arith.subf %392, %385 : vector<8x64xf32>
    %394 = arith.mulf %393, %391 : vector<8x64xf32>
    %395 = arith.mulf %385, %308 : vector<8x64xf32>
    %396 = arith.addf %394, %395 : vector<8x64xf32>
    %397 = arith.truncf %396 : vector<8x64xf32> to vector<8x64xbf16>
    %cst_76 = arith.constant dense<0.000000e+00> : vector<8x256xf32>
    %398 = tpu.matmul %397, %21, %cst_76 {dimension_numbers = #tpu.dot_dimension_numbers<[1], [0], [0], [1], [0, 0, 1, 1], [], []>} : vector<8x64xbf16>, vector<64x256xbf16>, vector<8x256xf32> -> vector<8x256xf32>
    %399 = vector.broadcast %22 : vector<1x256xf32> to vector<8x256xf32>
    %400 = arith.addf %398, %399 : vector<8x256xf32>
    %401 = vector.extract_strided_slice %400 {offsets = [0, 192], sizes = [8, 2], strides = [1, 1]} : vector<8x256xf32> to vector<8x2xf32>
    %402 = arith.addf %314, %401 : vector<8x2xf32>
    %403 = vector.extract_strided_slice %355 {offsets = [0, 0], sizes = [8, 64], strides = [1, 1]} : vector<8x256xf32> to vector<8x64xf32>
    %404 = vector.extract_strided_slice %355 {offsets = [0, 64], sizes = [8, 64], strides = [1, 1]} : vector<8x256xf32> to vector<8x64xf32>
    %405 = vector.extract_strided_slice %355 {offsets = [0, 128], sizes = [8, 64], strides = [1, 1]} : vector<8x256xf32> to vector<8x64xf32>
    %406 = vector.extract_strided_slice %357 {offsets = [0, 0], sizes = [8, 1], strides = [1, 1]} : vector<8x2xf32> to vector<8x1xf32>
    %407 = vector.broadcast %406 : vector<8x1xf32> to vector<8x192xf32>
    %408 = vector.broadcast %24 : vector<1x192xf32> to vector<8x192xf32>
    %409 = arith.mulf %407, %408 : vector<8x192xf32>
    %410 = vector.extract_strided_slice %357 {offsets = [0, 1], sizes = [8, 1], strides = [1, 1]} : vector<8x2xf32> to vector<8x1xf32>
    %411 = vector.broadcast %410 : vector<8x1xf32> to vector<8x192xf32>
    %412 = vector.broadcast %25 : vector<1x192xf32> to vector<8x192xf32>
    %413 = arith.mulf %411, %412 : vector<8x192xf32>
    %414 = arith.addf %409, %413 : vector<8x192xf32>
    %415 = vector.extract_strided_slice %414 {offsets = [0, 0], sizes = [8, 64], strides = [1, 1]} : vector<8x192xf32> to vector<8x64xf32>
    %416 = arith.addf %415, %403 : vector<8x64xf32>
    %417 = arith.negf %416 : vector<8x64xf32>
    %418 = math.exp %417 : vector<8x64xf32>
    %cst_77 = arith.constant 1.000000e+00 : f32
    %419 = vector.broadcast %cst_77 : f32 to vector<8x64xf32>
    %420 = arith.addf %419, %418 : vector<8x64xf32>
    %421 = arith.divf %419, %420 : vector<8x64xf32>
    %422 = vector.extract_strided_slice %414 {offsets = [0, 64], sizes = [8, 64], strides = [1, 1]} : vector<8x192xf32> to vector<8x64xf32>
    %423 = arith.addf %422, %404 : vector<8x64xf32>
    %424 = arith.negf %423 : vector<8x64xf32>
    %425 = math.exp %424 : vector<8x64xf32>
    %cst_78 = arith.constant 1.000000e+00 : f32
    %426 = vector.broadcast %cst_78 : f32 to vector<8x64xf32>
    %427 = arith.addf %426, %425 : vector<8x64xf32>
    %428 = arith.divf %426, %427 : vector<8x64xf32>
    %429 = vector.extract_strided_slice %414 {offsets = [0, 128], sizes = [8, 64], strides = [1, 1]} : vector<8x192xf32> to vector<8x64xf32>
    %430 = vector.broadcast %23 : vector<1x64xf32> to vector<8x64xf32>
    %431 = arith.addf %429, %430 : vector<8x64xf32>
    %432 = arith.mulf %421, %405 : vector<8x64xf32>
    %433 = arith.addf %431, %432 : vector<8x64xf32>
    %434 = math.tanh %433 : vector<8x64xf32>
    %cst_79 = arith.constant 1.000000e+00 : f32
    %435 = vector.broadcast %cst_79 : f32 to vector<8x64xf32>
    %436 = arith.subf %435, %428 : vector<8x64xf32>
    %437 = arith.mulf %436, %434 : vector<8x64xf32>
    %438 = arith.mulf %428, %351 : vector<8x64xf32>
    %439 = arith.addf %437, %438 : vector<8x64xf32>
    %440 = arith.truncf %439 : vector<8x64xf32> to vector<8x64xbf16>
    %cst_80 = arith.constant dense<0.000000e+00> : vector<8x256xf32>
    %441 = tpu.matmul %440, %21, %cst_80 {dimension_numbers = #tpu.dot_dimension_numbers<[1], [0], [0], [1], [0, 0, 1, 1], [], []>} : vector<8x64xbf16>, vector<64x256xbf16>, vector<8x256xf32> -> vector<8x256xf32>
    %442 = vector.broadcast %22 : vector<1x256xf32> to vector<8x256xf32>
    %443 = arith.addf %441, %442 : vector<8x256xf32>
    %444 = vector.extract_strided_slice %443 {offsets = [0, 192], sizes = [8, 2], strides = [1, 1]} : vector<8x256xf32> to vector<8x2xf32>
    %445 = arith.addf %357, %444 : vector<8x2xf32>
    %c0_81 = arith.constant 0 : index
    %c8_82 = arith.constant 8 : index
    %446 = vector.load %arg11[%c0_81, %c8_82] : memref<16x16xf32, #tpu.memory_space<vmem>>, vector<8x2xf32>
    tpu.vector_store %arg11[%c0_81, %c8_82], %402 {strides = array<i32>} : memref<16x16xf32, #tpu.memory_space<vmem>>, vector<8x2xf32>,
    %c8_83 = arith.constant 8 : index
    %c8_84 = arith.constant 8 : index
    %447 = vector.load %arg11[%c8_83, %c8_84] : memref<16x16xf32, #tpu.memory_space<vmem>>, vector<8x2xf32>
    tpu.vector_store %arg11[%c8_83, %c8_84], %445 {strides = array<i32>} : memref<16x16xf32, #tpu.memory_space<vmem>>, vector<8x2xf32>,
    %448 = vector.extract_strided_slice %400 {offsets = [0, 0], sizes = [8, 64], strides = [1, 1]} : vector<8x256xf32> to vector<8x64xf32>
    %449 = vector.extract_strided_slice %400 {offsets = [0, 64], sizes = [8, 64], strides = [1, 1]} : vector<8x256xf32> to vector<8x64xf32>
    %450 = vector.extract_strided_slice %400 {offsets = [0, 128], sizes = [8, 64], strides = [1, 1]} : vector<8x256xf32> to vector<8x64xf32>
    %451 = vector.extract_strided_slice %402 {offsets = [0, 0], sizes = [8, 1], strides = [1, 1]} : vector<8x2xf32> to vector<8x1xf32>
    %452 = vector.broadcast %451 : vector<8x1xf32> to vector<8x192xf32>
    %453 = vector.broadcast %24 : vector<1x192xf32> to vector<8x192xf32>
    %454 = arith.mulf %452, %453 : vector<8x192xf32>
    %455 = vector.extract_strided_slice %402 {offsets = [0, 1], sizes = [8, 1], strides = [1, 1]} : vector<8x2xf32> to vector<8x1xf32>
    %456 = vector.broadcast %455 : vector<8x1xf32> to vector<8x192xf32>
    %457 = vector.broadcast %25 : vector<1x192xf32> to vector<8x192xf32>
    %458 = arith.mulf %456, %457 : vector<8x192xf32>
    %459 = arith.addf %454, %458 : vector<8x192xf32>
    %460 = vector.extract_strided_slice %459 {offsets = [0, 0], sizes = [8, 64], strides = [1, 1]} : vector<8x192xf32> to vector<8x64xf32>
    %461 = arith.addf %460, %448 : vector<8x64xf32>
    %462 = arith.negf %461 : vector<8x64xf32>
    %463 = math.exp %462 : vector<8x64xf32>
    %cst_85 = arith.constant 1.000000e+00 : f32
    %464 = vector.broadcast %cst_85 : f32 to vector<8x64xf32>
    %465 = arith.addf %464, %463 : vector<8x64xf32>
    %466 = arith.divf %464, %465 : vector<8x64xf32>
    %467 = vector.extract_strided_slice %459 {offsets = [0, 64], sizes = [8, 64], strides = [1, 1]} : vector<8x192xf32> to vector<8x64xf32>
    %468 = arith.addf %467, %449 : vector<8x64xf32>
    %469 = arith.negf %468 : vector<8x64xf32>
    %470 = math.exp %469 : vector<8x64xf32>
    %cst_86 = arith.constant 1.000000e+00 : f32
    %471 = vector.broadcast %cst_86 : f32 to vector<8x64xf32>
    %472 = arith.addf %471, %470 : vector<8x64xf32>
    %473 = arith.divf %471, %472 : vector<8x64xf32>
    %474 = vector.extract_strided_slice %459 {offsets = [0, 128], sizes = [8, 64], strides = [1, 1]} : vector<8x192xf32> to vector<8x64xf32>
    %475 = vector.broadcast %23 : vector<1x64xf32> to vector<8x64xf32>
    %476 = arith.addf %474, %475 : vector<8x64xf32>
    %477 = arith.mulf %466, %450 : vector<8x64xf32>
    %478 = arith.addf %476, %477 : vector<8x64xf32>
    %479 = math.tanh %478 : vector<8x64xf32>
    %cst_87 = arith.constant 1.000000e+00 : f32
    %480 = vector.broadcast %cst_87 : f32 to vector<8x64xf32>
    %481 = arith.subf %480, %473 : vector<8x64xf32>
    %482 = arith.mulf %481, %479 : vector<8x64xf32>
    %483 = arith.mulf %473, %396 : vector<8x64xf32>
    %484 = arith.addf %482, %483 : vector<8x64xf32>
    %485 = arith.truncf %484 : vector<8x64xf32> to vector<8x64xbf16>
    %cst_88 = arith.constant dense<0.000000e+00> : vector<8x256xf32>
    %486 = tpu.matmul %485, %21, %cst_88 {dimension_numbers = #tpu.dot_dimension_numbers<[1], [0], [0], [1], [0, 0, 1, 1], [], []>} : vector<8x64xbf16>, vector<64x256xbf16>, vector<8x256xf32> -> vector<8x256xf32>
    %487 = vector.broadcast %22 : vector<1x256xf32> to vector<8x256xf32>
    %488 = arith.addf %486, %487 : vector<8x256xf32>
    %489 = vector.extract_strided_slice %488 {offsets = [0, 192], sizes = [8, 2], strides = [1, 1]} : vector<8x256xf32> to vector<8x2xf32>
    %490 = arith.addf %402, %489 : vector<8x2xf32>
    %491 = vector.extract_strided_slice %443 {offsets = [0, 0], sizes = [8, 64], strides = [1, 1]} : vector<8x256xf32> to vector<8x64xf32>
    %492 = vector.extract_strided_slice %443 {offsets = [0, 64], sizes = [8, 64], strides = [1, 1]} : vector<8x256xf32> to vector<8x64xf32>
    %493 = vector.extract_strided_slice %443 {offsets = [0, 128], sizes = [8, 64], strides = [1, 1]} : vector<8x256xf32> to vector<8x64xf32>
    %494 = vector.extract_strided_slice %445 {offsets = [0, 0], sizes = [8, 1], strides = [1, 1]} : vector<8x2xf32> to vector<8x1xf32>
    %495 = vector.broadcast %494 : vector<8x1xf32> to vector<8x192xf32>
    %496 = vector.broadcast %24 : vector<1x192xf32> to vector<8x192xf32>
    %497 = arith.mulf %495, %496 : vector<8x192xf32>
    %498 = vector.extract_strided_slice %445 {offsets = [0, 1], sizes = [8, 1], strides = [1, 1]} : vector<8x2xf32> to vector<8x1xf32>
    %499 = vector.broadcast %498 : vector<8x1xf32> to vector<8x192xf32>
    %500 = vector.broadcast %25 : vector<1x192xf32> to vector<8x192xf32>
    %501 = arith.mulf %499, %500 : vector<8x192xf32>
    %502 = arith.addf %497, %501 : vector<8x192xf32>
    %503 = vector.extract_strided_slice %502 {offsets = [0, 0], sizes = [8, 64], strides = [1, 1]} : vector<8x192xf32> to vector<8x64xf32>
    %504 = arith.addf %503, %491 : vector<8x64xf32>
    %505 = arith.negf %504 : vector<8x64xf32>
    %506 = math.exp %505 : vector<8x64xf32>
    %cst_89 = arith.constant 1.000000e+00 : f32
    %507 = vector.broadcast %cst_89 : f32 to vector<8x64xf32>
    %508 = arith.addf %507, %506 : vector<8x64xf32>
    %509 = arith.divf %507, %508 : vector<8x64xf32>
    %510 = vector.extract_strided_slice %502 {offsets = [0, 64], sizes = [8, 64], strides = [1, 1]} : vector<8x192xf32> to vector<8x64xf32>
    %511 = arith.addf %510, %492 : vector<8x64xf32>
    %512 = arith.negf %511 : vector<8x64xf32>
    %513 = math.exp %512 : vector<8x64xf32>
    %cst_90 = arith.constant 1.000000e+00 : f32
    %514 = vector.broadcast %cst_90 : f32 to vector<8x64xf32>
    %515 = arith.addf %514, %513 : vector<8x64xf32>
    %516 = arith.divf %514, %515 : vector<8x64xf32>
    %517 = vector.extract_strided_slice %502 {offsets = [0, 128], sizes = [8, 64], strides = [1, 1]} : vector<8x192xf32> to vector<8x64xf32>
    %518 = vector.broadcast %23 : vector<1x64xf32> to vector<8x64xf32>
    %519 = arith.addf %517, %518 : vector<8x64xf32>
    %520 = arith.mulf %509, %493 : vector<8x64xf32>
    %521 = arith.addf %519, %520 : vector<8x64xf32>
    %522 = math.tanh %521 : vector<8x64xf32>
    %cst_91 = arith.constant 1.000000e+00 : f32
    %523 = vector.broadcast %cst_91 : f32 to vector<8x64xf32>
    %524 = arith.subf %523, %516 : vector<8x64xf32>
    %525 = arith.mulf %524, %522 : vector<8x64xf32>
    %526 = arith.mulf %516, %439 : vector<8x64xf32>
    %527 = arith.addf %525, %526 : vector<8x64xf32>
    %528 = arith.truncf %527 : vector<8x64xf32> to vector<8x64xbf16>
    %cst_92 = arith.constant dense<0.000000e+00> : vector<8x256xf32>
    %529 = tpu.matmul %528, %21, %cst_92 {dimension_numbers = #tpu.dot_dimension_numbers<[1], [0], [0], [1], [0, 0, 1, 1], [], []>} : vector<8x64xbf16>, vector<64x256xbf16>, vector<8x256xf32> -> vector<8x256xf32>
    %530 = vector.broadcast %22 : vector<1x256xf32> to vector<8x256xf32>
    %531 = arith.addf %529, %530 : vector<8x256xf32>
    %532 = vector.extract_strided_slice %531 {offsets = [0, 192], sizes = [8, 2], strides = [1, 1]} : vector<8x256xf32> to vector<8x2xf32>
    %533 = arith.addf %445, %532 : vector<8x2xf32>
    %c0_93 = arith.constant 0 : index
    %c10 = arith.constant 10 : index
    %534 = vector.load %arg11[%c0_93, %c10] : memref<16x16xf32, #tpu.memory_space<vmem>>, vector<8x2xf32>
    tpu.vector_store %arg11[%c0_93, %c10], %490 {strides = array<i32>} : memref<16x16xf32, #tpu.memory_space<vmem>>, vector<8x2xf32>,
    %c8_94 = arith.constant 8 : index
    %c10_95 = arith.constant 10 : index
    %535 = vector.load %arg11[%c8_94, %c10_95] : memref<16x16xf32, #tpu.memory_space<vmem>>, vector<8x2xf32>
    tpu.vector_store %arg11[%c8_94, %c10_95], %533 {strides = array<i32>} : memref<16x16xf32, #tpu.memory_space<vmem>>, vector<8x2xf32>,
    %536 = vector.extract_strided_slice %488 {offsets = [0, 0], sizes = [8, 64], strides = [1, 1]} : vector<8x256xf32> to vector<8x64xf32>
    %537 = vector.extract_strided_slice %488 {offsets = [0, 64], sizes = [8, 64], strides = [1, 1]} : vector<8x256xf32> to vector<8x64xf32>
    %538 = vector.extract_strided_slice %488 {offsets = [0, 128], sizes = [8, 64], strides = [1, 1]} : vector<8x256xf32> to vector<8x64xf32>
    %539 = vector.extract_strided_slice %490 {offsets = [0, 0], sizes = [8, 1], strides = [1, 1]} : vector<8x2xf32> to vector<8x1xf32>
    %540 = vector.broadcast %539 : vector<8x1xf32> to vector<8x192xf32>
    %541 = vector.broadcast %24 : vector<1x192xf32> to vector<8x192xf32>
    %542 = arith.mulf %540, %541 : vector<8x192xf32>
    %543 = vector.extract_strided_slice %490 {offsets = [0, 1], sizes = [8, 1], strides = [1, 1]} : vector<8x2xf32> to vector<8x1xf32>
    %544 = vector.broadcast %543 : vector<8x1xf32> to vector<8x192xf32>
    %545 = vector.broadcast %25 : vector<1x192xf32> to vector<8x192xf32>
    %546 = arith.mulf %544, %545 : vector<8x192xf32>
    %547 = arith.addf %542, %546 : vector<8x192xf32>
    %548 = vector.extract_strided_slice %547 {offsets = [0, 0], sizes = [8, 64], strides = [1, 1]} : vector<8x192xf32> to vector<8x64xf32>
    %549 = arith.addf %548, %536 : vector<8x64xf32>
    %550 = arith.negf %549 : vector<8x64xf32>
    %551 = math.exp %550 : vector<8x64xf32>
    %cst_96 = arith.constant 1.000000e+00 : f32
    %552 = vector.broadcast %cst_96 : f32 to vector<8x64xf32>
    %553 = arith.addf %552, %551 : vector<8x64xf32>
    %554 = arith.divf %552, %553 : vector<8x64xf32>
    %555 = vector.extract_strided_slice %547 {offsets = [0, 64], sizes = [8, 64], strides = [1, 1]} : vector<8x192xf32> to vector<8x64xf32>
    %556 = arith.addf %555, %537 : vector<8x64xf32>
    %557 = arith.negf %556 : vector<8x64xf32>
    %558 = math.exp %557 : vector<8x64xf32>
    %cst_97 = arith.constant 1.000000e+00 : f32
    %559 = vector.broadcast %cst_97 : f32 to vector<8x64xf32>
    %560 = arith.addf %559, %558 : vector<8x64xf32>
    %561 = arith.divf %559, %560 : vector<8x64xf32>
    %562 = vector.extract_strided_slice %547 {offsets = [0, 128], sizes = [8, 64], strides = [1, 1]} : vector<8x192xf32> to vector<8x64xf32>
    %563 = vector.broadcast %23 : vector<1x64xf32> to vector<8x64xf32>
    %564 = arith.addf %562, %563 : vector<8x64xf32>
    %565 = arith.mulf %554, %538 : vector<8x64xf32>
    %566 = arith.addf %564, %565 : vector<8x64xf32>
    %567 = math.tanh %566 : vector<8x64xf32>
    %cst_98 = arith.constant 1.000000e+00 : f32
    %568 = vector.broadcast %cst_98 : f32 to vector<8x64xf32>
    %569 = arith.subf %568, %561 : vector<8x64xf32>
    %570 = arith.mulf %569, %567 : vector<8x64xf32>
    %571 = arith.mulf %561, %484 : vector<8x64xf32>
    %572 = arith.addf %570, %571 : vector<8x64xf32>
    %573 = arith.truncf %572 : vector<8x64xf32> to vector<8x64xbf16>
    %cst_99 = arith.constant dense<0.000000e+00> : vector<8x256xf32>
    %574 = tpu.matmul %573, %21, %cst_99 {dimension_numbers = #tpu.dot_dimension_numbers<[1], [0], [0], [1], [0, 0, 1, 1], [], []>} : vector<8x64xbf16>, vector<64x256xbf16>, vector<8x256xf32> -> vector<8x256xf32>
    %575 = vector.broadcast %22 : vector<1x256xf32> to vector<8x256xf32>
    %576 = arith.addf %574, %575 : vector<8x256xf32>
    %577 = vector.extract_strided_slice %576 {offsets = [0, 192], sizes = [8, 2], strides = [1, 1]} : vector<8x256xf32> to vector<8x2xf32>
    %578 = arith.addf %490, %577 : vector<8x2xf32>
    %579 = vector.extract_strided_slice %531 {offsets = [0, 0], sizes = [8, 64], strides = [1, 1]} : vector<8x256xf32> to vector<8x64xf32>
    %580 = vector.extract_strided_slice %531 {offsets = [0, 64], sizes = [8, 64], strides = [1, 1]} : vector<8x256xf32> to vector<8x64xf32>
    %581 = vector.extract_strided_slice %531 {offsets = [0, 128], sizes = [8, 64], strides = [1, 1]} : vector<8x256xf32> to vector<8x64xf32>
    %582 = vector.extract_strided_slice %533 {offsets = [0, 0], sizes = [8, 1], strides = [1, 1]} : vector<8x2xf32> to vector<8x1xf32>
    %583 = vector.broadcast %582 : vector<8x1xf32> to vector<8x192xf32>
    %584 = vector.broadcast %24 : vector<1x192xf32> to vector<8x192xf32>
    %585 = arith.mulf %583, %584 : vector<8x192xf32>
    %586 = vector.extract_strided_slice %533 {offsets = [0, 1], sizes = [8, 1], strides = [1, 1]} : vector<8x2xf32> to vector<8x1xf32>
    %587 = vector.broadcast %586 : vector<8x1xf32> to vector<8x192xf32>
    %588 = vector.broadcast %25 : vector<1x192xf32> to vector<8x192xf32>
    %589 = arith.mulf %587, %588 : vector<8x192xf32>
    %590 = arith.addf %585, %589 : vector<8x192xf32>
    %591 = vector.extract_strided_slice %590 {offsets = [0, 0], sizes = [8, 64], strides = [1, 1]} : vector<8x192xf32> to vector<8x64xf32>
    %592 = arith.addf %591, %579 : vector<8x64xf32>
    %593 = arith.negf %592 : vector<8x64xf32>
    %594 = math.exp %593 : vector<8x64xf32>
    %cst_100 = arith.constant 1.000000e+00 : f32
    %595 = vector.broadcast %cst_100 : f32 to vector<8x64xf32>
    %596 = arith.addf %595, %594 : vector<8x64xf32>
    %597 = arith.divf %595, %596 : vector<8x64xf32>
    %598 = vector.extract_strided_slice %590 {offsets = [0, 64], sizes = [8, 64], strides = [1, 1]} : vector<8x192xf32> to vector<8x64xf32>
    %599 = arith.addf %598, %580 : vector<8x64xf32>
    %600 = arith.negf %599 : vector<8x64xf32>
    %601 = math.exp %600 : vector<8x64xf32>
    %cst_101 = arith.constant 1.000000e+00 : f32
    %602 = vector.broadcast %cst_101 : f32 to vector<8x64xf32>
    %603 = arith.addf %602, %601 : vector<8x64xf32>
    %604 = arith.divf %602, %603 : vector<8x64xf32>
    %605 = vector.extract_strided_slice %590 {offsets = [0, 128], sizes = [8, 64], strides = [1, 1]} : vector<8x192xf32> to vector<8x64xf32>
    %606 = vector.broadcast %23 : vector<1x64xf32> to vector<8x64xf32>
    %607 = arith.addf %605, %606 : vector<8x64xf32>
    %608 = arith.mulf %597, %581 : vector<8x64xf32>
    %609 = arith.addf %607, %608 : vector<8x64xf32>
    %610 = math.tanh %609 : vector<8x64xf32>
    %cst_102 = arith.constant 1.000000e+00 : f32
    %611 = vector.broadcast %cst_102 : f32 to vector<8x64xf32>
    %612 = arith.subf %611, %604 : vector<8x64xf32>
    %613 = arith.mulf %612, %610 : vector<8x64xf32>
    %614 = arith.mulf %604, %527 : vector<8x64xf32>
    %615 = arith.addf %613, %614 : vector<8x64xf32>
    %616 = arith.truncf %615 : vector<8x64xf32> to vector<8x64xbf16>
    %cst_103 = arith.constant dense<0.000000e+00> : vector<8x256xf32>
    %617 = tpu.matmul %616, %21, %cst_103 {dimension_numbers = #tpu.dot_dimension_numbers<[1], [0], [0], [1], [0, 0, 1, 1], [], []>} : vector<8x64xbf16>, vector<64x256xbf16>, vector<8x256xf32> -> vector<8x256xf32>
    %618 = vector.broadcast %22 : vector<1x256xf32> to vector<8x256xf32>
    %619 = arith.addf %617, %618 : vector<8x256xf32>
    %620 = vector.extract_strided_slice %619 {offsets = [0, 192], sizes = [8, 2], strides = [1, 1]} : vector<8x256xf32> to vector<8x2xf32>
    %621 = arith.addf %533, %620 : vector<8x2xf32>
    %c0_104 = arith.constant 0 : index
    %c12 = arith.constant 12 : index
    %622 = vector.load %arg11[%c0_104, %c12] : memref<16x16xf32, #tpu.memory_space<vmem>>, vector<8x2xf32>
    tpu.vector_store %arg11[%c0_104, %c12], %578 {strides = array<i32>} : memref<16x16xf32, #tpu.memory_space<vmem>>, vector<8x2xf32>,
    %c8_105 = arith.constant 8 : index
    %c12_106 = arith.constant 12 : index
    %623 = vector.load %arg11[%c8_105, %c12_106] : memref<16x16xf32, #tpu.memory_space<vmem>>, vector<8x2xf32>
    tpu.vector_store %arg11[%c8_105, %c12_106], %621 {strides = array<i32>} : memref<16x16xf32, #tpu.memory_space<vmem>>, vector<8x2xf32>,
    %624 = vector.extract_strided_slice %576 {offsets = [0, 0], sizes = [8, 64], strides = [1, 1]} : vector<8x256xf32> to vector<8x64xf32>
    %625 = vector.extract_strided_slice %576 {offsets = [0, 64], sizes = [8, 64], strides = [1, 1]} : vector<8x256xf32> to vector<8x64xf32>
    %626 = vector.extract_strided_slice %576 {offsets = [0, 128], sizes = [8, 64], strides = [1, 1]} : vector<8x256xf32> to vector<8x64xf32>
    %627 = vector.extract_strided_slice %578 {offsets = [0, 0], sizes = [8, 1], strides = [1, 1]} : vector<8x2xf32> to vector<8x1xf32>
    %628 = vector.broadcast %627 : vector<8x1xf32> to vector<8x192xf32>
    %629 = vector.broadcast %24 : vector<1x192xf32> to vector<8x192xf32>
    %630 = arith.mulf %628, %629 : vector<8x192xf32>
    %631 = vector.extract_strided_slice %578 {offsets = [0, 1], sizes = [8, 1], strides = [1, 1]} : vector<8x2xf32> to vector<8x1xf32>
    %632 = vector.broadcast %631 : vector<8x1xf32> to vector<8x192xf32>
    %633 = vector.broadcast %25 : vector<1x192xf32> to vector<8x192xf32>
    %634 = arith.mulf %632, %633 : vector<8x192xf32>
    %635 = arith.addf %630, %634 : vector<8x192xf32>
    %636 = vector.extract_strided_slice %635 {offsets = [0, 0], sizes = [8, 64], strides = [1, 1]} : vector<8x192xf32> to vector<8x64xf32>
    %637 = arith.addf %636, %624 : vector<8x64xf32>
    %638 = arith.negf %637 : vector<8x64xf32>
    %639 = math.exp %638 : vector<8x64xf32>
    %cst_107 = arith.constant 1.000000e+00 : f32
    %640 = vector.broadcast %cst_107 : f32 to vector<8x64xf32>
    %641 = arith.addf %640, %639 : vector<8x64xf32>
    %642 = arith.divf %640, %641 : vector<8x64xf32>
    %643 = vector.extract_strided_slice %635 {offsets = [0, 64], sizes = [8, 64], strides = [1, 1]} : vector<8x192xf32> to vector<8x64xf32>
    %644 = arith.addf %643, %625 : vector<8x64xf32>
    %645 = arith.negf %644 : vector<8x64xf32>
    %646 = math.exp %645 : vector<8x64xf32>
    %cst_108 = arith.constant 1.000000e+00 : f32
    %647 = vector.broadcast %cst_108 : f32 to vector<8x64xf32>
    %648 = arith.addf %647, %646 : vector<8x64xf32>
    %649 = arith.divf %647, %648 : vector<8x64xf32>
    %650 = vector.extract_strided_slice %635 {offsets = [0, 128], sizes = [8, 64], strides = [1, 1]} : vector<8x192xf32> to vector<8x64xf32>
    %651 = vector.broadcast %23 : vector<1x64xf32> to vector<8x64xf32>
    %652 = arith.addf %650, %651 : vector<8x64xf32>
    %653 = arith.mulf %642, %626 : vector<8x64xf32>
    %654 = arith.addf %652, %653 : vector<8x64xf32>
    %655 = math.tanh %654 : vector<8x64xf32>
    %cst_109 = arith.constant 1.000000e+00 : f32
    %656 = vector.broadcast %cst_109 : f32 to vector<8x64xf32>
    %657 = arith.subf %656, %649 : vector<8x64xf32>
    %658 = arith.mulf %657, %655 : vector<8x64xf32>
    %659 = arith.mulf %649, %572 : vector<8x64xf32>
    %660 = arith.addf %658, %659 : vector<8x64xf32>
    %661 = arith.truncf %660 : vector<8x64xf32> to vector<8x64xbf16>
    %cst_110 = arith.constant dense<0.000000e+00> : vector<8x256xf32>
    %662 = tpu.matmul %661, %21, %cst_110 {dimension_numbers = #tpu.dot_dimension_numbers<[1], [0], [0], [1], [0, 0, 1, 1], [], []>} : vector<8x64xbf16>, vector<64x256xbf16>, vector<8x256xf32> -> vector<8x256xf32>
    %663 = vector.broadcast %22 : vector<1x256xf32> to vector<8x256xf32>
    %664 = arith.addf %662, %663 : vector<8x256xf32>
    %665 = vector.extract_strided_slice %664 {offsets = [0, 192], sizes = [8, 2], strides = [1, 1]} : vector<8x256xf32> to vector<8x2xf32>
    %666 = arith.addf %578, %665 : vector<8x2xf32>
    %667 = vector.extract_strided_slice %619 {offsets = [0, 0], sizes = [8, 64], strides = [1, 1]} : vector<8x256xf32> to vector<8x64xf32>
    %668 = vector.extract_strided_slice %619 {offsets = [0, 64], sizes = [8, 64], strides = [1, 1]} : vector<8x256xf32> to vector<8x64xf32>
    %669 = vector.extract_strided_slice %619 {offsets = [0, 128], sizes = [8, 64], strides = [1, 1]} : vector<8x256xf32> to vector<8x64xf32>
    %670 = vector.extract_strided_slice %621 {offsets = [0, 0], sizes = [8, 1], strides = [1, 1]} : vector<8x2xf32> to vector<8x1xf32>
    %671 = vector.broadcast %670 : vector<8x1xf32> to vector<8x192xf32>
    %672 = vector.broadcast %24 : vector<1x192xf32> to vector<8x192xf32>
    %673 = arith.mulf %671, %672 : vector<8x192xf32>
    %674 = vector.extract_strided_slice %621 {offsets = [0, 1], sizes = [8, 1], strides = [1, 1]} : vector<8x2xf32> to vector<8x1xf32>
    %675 = vector.broadcast %674 : vector<8x1xf32> to vector<8x192xf32>
    %676 = vector.broadcast %25 : vector<1x192xf32> to vector<8x192xf32>
    %677 = arith.mulf %675, %676 : vector<8x192xf32>
    %678 = arith.addf %673, %677 : vector<8x192xf32>
    %679 = vector.extract_strided_slice %678 {offsets = [0, 0], sizes = [8, 64], strides = [1, 1]} : vector<8x192xf32> to vector<8x64xf32>
    %680 = arith.addf %679, %667 : vector<8x64xf32>
    %681 = arith.negf %680 : vector<8x64xf32>
    %682 = math.exp %681 : vector<8x64xf32>
    %cst_111 = arith.constant 1.000000e+00 : f32
    %683 = vector.broadcast %cst_111 : f32 to vector<8x64xf32>
    %684 = arith.addf %683, %682 : vector<8x64xf32>
    %685 = arith.divf %683, %684 : vector<8x64xf32>
    %686 = vector.extract_strided_slice %678 {offsets = [0, 64], sizes = [8, 64], strides = [1, 1]} : vector<8x192xf32> to vector<8x64xf32>
    %687 = arith.addf %686, %668 : vector<8x64xf32>
    %688 = arith.negf %687 : vector<8x64xf32>
    %689 = math.exp %688 : vector<8x64xf32>
    %cst_112 = arith.constant 1.000000e+00 : f32
    %690 = vector.broadcast %cst_112 : f32 to vector<8x64xf32>
    %691 = arith.addf %690, %689 : vector<8x64xf32>
    %692 = arith.divf %690, %691 : vector<8x64xf32>
    %693 = vector.extract_strided_slice %678 {offsets = [0, 128], sizes = [8, 64], strides = [1, 1]} : vector<8x192xf32> to vector<8x64xf32>
    %694 = vector.broadcast %23 : vector<1x64xf32> to vector<8x64xf32>
    %695 = arith.addf %693, %694 : vector<8x64xf32>
    %696 = arith.mulf %685, %669 : vector<8x64xf32>
    %697 = arith.addf %695, %696 : vector<8x64xf32>
    %698 = math.tanh %697 : vector<8x64xf32>
    %cst_113 = arith.constant 1.000000e+00 : f32
    %699 = vector.broadcast %cst_113 : f32 to vector<8x64xf32>
    %700 = arith.subf %699, %692 : vector<8x64xf32>
    %701 = arith.mulf %700, %698 : vector<8x64xf32>
    %702 = arith.mulf %692, %615 : vector<8x64xf32>
    %703 = arith.addf %701, %702 : vector<8x64xf32>
    %704 = arith.truncf %703 : vector<8x64xf32> to vector<8x64xbf16>
    %cst_114 = arith.constant dense<0.000000e+00> : vector<8x256xf32>
    %705 = tpu.matmul %704, %21, %cst_114 {dimension_numbers = #tpu.dot_dimension_numbers<[1], [0], [0], [1], [0, 0, 1, 1], [], []>} : vector<8x64xbf16>, vector<64x256xbf16>, vector<8x256xf32> -> vector<8x256xf32>
    %706 = vector.broadcast %22 : vector<1x256xf32> to vector<8x256xf32>
    %707 = arith.addf %705, %706 : vector<8x256xf32>
    %708 = vector.extract_strided_slice %707 {offsets = [0, 192], sizes = [8, 2], strides = [1, 1]} : vector<8x256xf32> to vector<8x2xf32>
    %709 = arith.addf %621, %708 : vector<8x2xf32>
    %c0_115 = arith.constant 0 : index
    %c14 = arith.constant 14 : index
    %710 = vector.load %arg11[%c0_115, %c14] : memref<16x16xf32, #tpu.memory_space<vmem>>, vector<8x2xf32>
    tpu.vector_store %arg11[%c0_115, %c14], %666 {strides = array<i32>} : memref<16x16xf32, #tpu.memory_space<vmem>>, vector<8x2xf32>,
    %c8_116 = arith.constant 8 : index
    %c14_117 = arith.constant 14 : index
    %711 = vector.load %arg11[%c8_116, %c14_117] : memref<16x16xf32, #tpu.memory_space<vmem>>, vector<8x2xf32>
    tpu.vector_store %arg11[%c8_116, %c14_117], %709 {strides = array<i32>} : memref<16x16xf32, #tpu.memory_space<vmem>>, vector<8x2xf32>,
    return
  }
  func.func @transform_0(%arg0: i32) -> (i32, i32) {
    %c0_i32 = arith.constant 0 : i32
    %c0_i32_0 = arith.constant 0 : i32
    return %arg0, %c0_i32 : i32, i32
  }
  func.func @transform_1(%arg0: i32) -> (i32, i32) {
    %c0_i32 = arith.constant 0 : i32
    %c0_i32_0 = arith.constant 0 : i32
    %c0_i32_1 = arith.constant 0 : i32
    return %c0_i32, %c0_i32_0 : i32, i32
  }
  func.func @transform_2(%arg0: i32) -> (i32, i32) {
    %c0_i32 = arith.constant 0 : i32
    %c0_i32_0 = arith.constant 0 : i32
    %c0_i32_1 = arith.constant 0 : i32
    return %c0_i32, %c0_i32_0 : i32, i32
  }
  func.func @transform_3(%arg0: i32) -> (i32, i32) {
    %c0_i32 = arith.constant 0 : i32
    %c0_i32_0 = arith.constant 0 : i32
    %c0_i32_1 = arith.constant 0 : i32
    return %c0_i32, %c0_i32_0 : i32, i32
  }
  func.func @transform_4(%arg0: i32) -> (i32, i32) {
    %c0_i32 = arith.constant 0 : i32
    %c0_i32_0 = arith.constant 0 : i32
    %c0_i32_1 = arith.constant 0 : i32
    return %c0_i32, %c0_i32_0 : i32, i32
  }
  func.func @transform_5(%arg0: i32) -> (i32, i32) {
    %c0_i32 = arith.constant 0 : i32
    %c0_i32_0 = arith.constant 0 : i32
    %c0_i32_1 = arith.constant 0 : i32
    return %c0_i32, %c0_i32_0 : i32, i32
  }
  func.func @transform_6(%arg0: i32) -> (i32, i32) {
    %c0_i32 = arith.constant 0 : i32
    %c0_i32_0 = arith.constant 0 : i32
    %c0_i32_1 = arith.constant 0 : i32
    return %c0_i32, %c0_i32_0 : i32, i32
  }
  func.func @transform_7(%arg0: i32) -> (i32, i32) {
    %c0_i32 = arith.constant 0 : i32
    %c0_i32_0 = arith.constant 0 : i32
    %c0_i32_1 = arith.constant 0 : i32
    return %c0_i32, %c0_i32_0 : i32, i32
  }
  func.func @transform_8(%arg0: i32) -> (i32, i32) {
    %c0_i32 = arith.constant 0 : i32
    %c0_i32_0 = arith.constant 0 : i32
    %c0_i32_1 = arith.constant 0 : i32
    return %c0_i32, %c0_i32_0 : i32, i32
  }
  func.func @transform_9(%arg0: i32) -> (i32, i32) {
    %c0_i32 = arith.constant 0 : i32
    %c0_i32_0 = arith.constant 0 : i32
    %c0_i32_1 = arith.constant 0 : i32
    return %c0_i32, %c0_i32_0 : i32, i32
  }
  func.func @transform_10(%arg0: i32) -> (i32, i32) {
    %c0_i32 = arith.constant 0 : i32
    %c0_i32_0 = arith.constant 0 : i32
    return %arg0, %c0_i32 : i32, i32
  }
}

</mosaic_0001>

<bundles_post_ra>
// kernel: tpu_custom_call.1
= control target key start
LH: loop header
LB: loop body
LE: loop exit
PB: predicated region body
PF: predicated region fallthrough
CT: control target
= control target key end

     0   :  { %15 = vsyncpa [#allocation3], 0  ;;  %s3608_s0 = inlined_call_operand.vmem [shape: bf16[16,384], index: 0, kind: input, shape index: {}]   ;;  %s3609_s1 = inlined_call_operand.hbm [shape: bf16[384,256], index: 1, kind: input, shape index: {}]   ;;  %s3610_s2 = inlined_call_operand.hbm [shape: bf16[256,128], index: 2, kind: input, shape index: {}]   ;;  %s3611_s3 = inlined_call_operand.vmem [shape: f32[1,128], index: 3, kind: input, shape index: {}]   ;;  %s3612_s4 = inlined_call_operand.vmem [shape: bf16[128,64], index: 4, kind: input, shape index: {}]   ;;  %s3613_s5 = inlined_call_operand.vmem [shape: f32[1,64], index: 5, kind: input, shape index: {}]   ;;  %s3614_s6 = inlined_call_operand.vmem [shape: bf16[64,256], index: 6, kind: input, shape index: {}]   ;;  %s3615_s7 = inlined_call_operand.vmem [shape: f32[1,256], index: 7, kind: input, shape index: {}]   ;;  %s3616_s8 = inlined_call_operand.vmem [shape: f32[2,192], index: 8, kind: input, shape index: {}]   ;;  %s3617_s9 = inlined_call_operand.vmem [shape: f32[1,64], index: 9, kind: input, shape index: {}]   ;;  %s3618_s10 = inlined_call_operand.hbm [shape: f32[16,16], index: 10, kind: output, shape index: {}]  }
   0x1   :  { %16 = vsyncpa [#allocation6], 0 }
   0x2   :  { %17 = vsyncpa [#allocation4], 0  ;;  %s2835_s13 = smov [#allocation2]  }
   0x3   :  { %s25_s14 = sshll.u32 %s2835_s13, 4  ;;  %s26_s14 = int_to_ptr.vmem [resolvable:$true] %s25_s14 }
   0x4   :  { %s2777_s15 = scalar_lea.vmem %s26_s14, 6144  ;;  %p2782_p1 = scmp.lt.s32.totalorder %s26_s14, %s26_s14 }
   0x5   :  { %p2778_p0 = scmp.ne.s32.totalorder %s26_s14, %s2777_s15  ;;  %p2783_p2 = scmp.lt.s32.totalorder %s2777_s15, %s2777_s15 }
   0x7   :  { %p2784_p3 = por %p2783_p2, %p2782_p1 }
   0x9   :  { %p2785_p4 = pnand %p2784_p3, %p2778_p0 }
   0xb   :  { %2788 = shalt.err (!%p2785_p4)
}
   0xc   :  { %s2836_s16 = smov 128   ;;  %s2837_s17 = smov 8  }
   0xd   :  { %31 = dma.hbm_to_vmem [thread:$0]  %s3609_s1, 6144, %s26_s14, [#allocation3], %s2836_s16, %s2836_s16, %s2837_s17  }
   0xe   :  { %s2838_s20 = smov [#allocation5]  }
   0xf   :  { %s37_s21 = sshll.u32 %s2838_s20, 4  ;;  %s38_s21 = int_to_ptr.vmem [resolvable:$true] %s37_s21 }
  0x10   :  { %s2797_s22 = scalar_lea.vmem %s38_s21, 2048  ;;  %p2802_p6 = scmp.lt.s32.totalorder %s38_s21, %s38_s21 }
  0x11   :  { %p2798_p5 = scmp.ne.s32.totalorder %s38_s21, %s2797_s22  ;;  %p2803_p7 = scmp.lt.s32.totalorder %s2797_s22, %s2797_s22 }
  0x13   :  { %p2804_p8 = por %p2803_p7, %p2802_p6 }
  0x15   :  { %p2805_p9 = pnand %p2804_p8, %p2798_p5 }
  0x17   :  { %2808 = shalt.err (!%p2805_p9)
}
  0x18   :  { %s2839_s23 = smov 64   ;;  %s2840_s24 = smov 4  }
  0x19   :  { %43 = dma.hbm_to_vmem [thread:$0]  %s3610_s2, 2048, %s38_s21, [#allocation6], %s2839_s23, %s2839_s23, %s2840_s24  }
  0x1a   :  { %2829 = dma.done.wait [#allocation3], 6144  }
  0x1b   :  { %2830 = vsyncadd [#allocation3], 4294961152 }
  0x1c   :  { %2831 = dma.done.wait [#allocation6], 2048  }
  0x1d   :  { %2832 = vsyncadd [#allocation6], 4294965248  ;;  %v2841_v0 = vmov 0   ;;  %v2552_v1 = vld [vmem:[#allocation2 + $0x74] ss:$8 sps:$4 sm:$0xff]   ;;  %v2632_v48 = vld [vmem:[#allocation5 + $0x68] sm:$0xff]  }
  0x1e   :  { %448 = vmatprep.mubr.bf16.mxu1 %v2841_v0  ;;  %v2554_v2 = vld [vmem:[#allocation2 + $0x70] ss:$8 sps:$4 sm:$0xff]   ;;  %373 = vmatprep.subr.bf16.mxu0 %v2552_v1  ;;  %v2555_v3 = vld [vmem:[#allocation2 + $0x64] ss:$8 sps:$4 sm:$0xff]   ;;  %v2557_v4 = vld [vmem:[#allocation2 + $0x60] ss:$8 sps:$4 sm:$0xff]  }
  0x1f   :  { %374 = vmatpush1.bf16.msra.mxu0 %v2554_v2  ;;  %v2558_v5 = vld [vmem:[#allocation2 + $0x54] ss:$8 sps:$4 sm:$0xff]   ;;  %v2560_v6 = vld [vmem:[#allocation2 + $0x50] ss:$8 sps:$4 sm:$0xff]   ;;  %v2561_v7 = vld [vmem:[#allocation2 + $0x44] ss:$8 sps:$4 sm:$0xff]  }
  0x20   :  { %375 = vmatprep.subr.bf16.mxu0 %v2555_v3  ;;  %v2573_v8 = vld [vmem:[#allocation2 + $0x174] ss:$8 sps:$4 sm:$0xff]   ;;  %v2575_v9 = vld [vmem:[#allocation2 + $0x170] ss:$8 sps:$4 sm:$0xff]   ;;  %v2563_v10 = vld [vmem:[#allocation2 + $0x40] ss:$8 sps:$4 sm:$0xff]  }
  0x21   :  { %v2564_v11 = vld [vmem:[#allocation2 + $0x34] ss:$8 sps:$4 sm:$0xff]   ;;  %416 = vmatprep.subr.bf16.mxu1 %v2573_v8  ;;  %v2579_v12 = vld [vmem:[#allocation2 + $0x164] ss:$8 sps:$4 sm:$0xff]   ;;  %v2581_v13 = vld [vmem:[#allocation2 + $0x160] ss:$8 sps:$4 sm:$0xff]  }
  0x22   :  { %417 = vmatpush1.bf16.msra.mxu1 %v2575_v9  ;;  %v2566_v14 = vld [vmem:[#allocation2 + $0x30] ss:$8 sps:$4 sm:$0xff]   ;;  %v2585_v15 = vld [vmem:[#allocation2 + $0x154] ss:$8 sps:$4 sm:$0xff]   ;;  %v2567_v16 = vld [vmem:[#allocation2 + $0x24] ss:$8 sps:$4 sm:$0xff]  }
  0x23   :  { %376 = vmatpush1.bf16.msra.mxu0 %v2557_v4  ;;  %418 = vmatprep.subr.bf16.mxu1 %v2579_v12  ;;  %v2587_v17 = vld [vmem:[#allocation2 + $0x150] ss:$8 sps:$4 sm:$0xff]   ;;  %v2591_v18 = vld [vmem:[#allocation2 + $0x144] ss:$8 sps:$4 sm:$0xff]   ;;  %v2569_v19 = vld [vmem:[#allocation2 + $0x20] ss:$8 sps:$4 sm:$0xff]  }
  0x24   :  { %377 = vmatprep.subr.bf16.mxu0 %v2558_v5  ;;  %v2570_v20 = vld [vmem:[#allocation2 + $0x14] ss:$8 sps:$4 sm:$0xff]   ;;  %v2593_v21 = vld [vmem:[#allocation2 + $0x140] ss:$8 sps:$4 sm:$0xff]   ;;  %v2572_v23 = vld [vmem:[#allocation2 + $0x10] ss:$8 sps:$4 sm:$0xff]  }
  0x25   :  { %v2597_v22 = vld [vmem:[#allocation2 + $0x134] ss:$8 sps:$4 sm:$0xff]   ;;  %v2576_v24 = vld [vmem:[#allocation2 + $0x4] ss:$8 sps:$4 sm:$0xff]   ;;  %v2599_v25 = vld [vmem:[#allocation2 + $0x130] ss:$8 sps:$4 sm:$0xff]  }
  0x26   :  { %419 = vmatpush1.bf16.msra.mxu1 %v2581_v13  ;;  %v2603_v26 = vld [vmem:[#allocation2 + $0x124] ss:$8 sps:$4 sm:$0xff]   ;;  %v2578_v27 = vld [vmem:[#allocation2] ss:$8 sps:$4 sm:$0xff]   ;;  %v2582_v28 = vld [vmem:[#allocation2 + $0xf4] ss:$8 sps:$4 sm:$0xff]  }
  0x27   :  { %378 = vmatpush1.bf16.msra.mxu0 %v2560_v6  ;;  %420 = vmatprep.subr.bf16.mxu1 %v2585_v15  ;;  %v2605_v29 = vld [vmem:[#allocation2 + $0x120] ss:$8 sps:$4 sm:$0xff]   ;;  %v2609_v30 = vld [vmem:[#allocation2 + $0x114] ss:$8 sps:$4 sm:$0xff]   ;;  %v2584_v31 = vld [vmem:[#allocation2 + $0xf0] ss:$8 sps:$4 sm:$0xff]  }
  0x28   :  { %379 = vmatprep.subr.bf16.mxu0 %v2561_v7  ;;  %v2588_v32 = vld [vmem:[#allocation2 + $0xe4] ss:$8 sps:$4 sm:$0xff]   ;;  %v2611_v33 = vld [vmem:[#allocation2 + $0x110] ss:$8 sps:$4 sm:$0xff]   ;;  %v2590_v36 = vld [vmem:[#allocation2 + $0xe0] ss:$8 sps:$4 sm:$0xff]  }
  0x29   :  { %v2615_v34 = vld [vmem:[#allocation2 + $0x104] ss:$8 sps:$4 sm:$0xff]   ;;  %v2594_v37 = vld [vmem:[#allocation2 + $0xd4] ss:$8 sps:$4 sm:$0xff]   ;;  %v2596_v38 = vld [vmem:[#allocation2 + $0xd0] ss:$8 sps:$4 sm:$0xff]  }
  0x2a   :  { %421 = vmatpush1.bf16.msra.mxu1 %v2587_v17  ;;  %v2627_v35 = vld [vmem:[%s3608_s0 + $0x4] ss:$12 sps:$4 sm:$0xff]   ;;  %v2617_v39 = vld [vmem:[#allocation2 + $0x100] ss:$8 sps:$4 sm:$0xff]   ;;  %v2628_v42 = vld [vmem:[#allocation5 + $0x78] sm:$0xff]   ;;  %v2842_v6 = vmov 0.0  }
  0x2b   :  { %380 = vmatpush1.bf16.msra.mxu0 %v2563_v10  ;;  %422 = vmatprep.subr.bf16.mxu1 %v2591_v18  ;;  %v2600_v40 = vld [vmem:[#allocation2 + $0xc4] ss:$8 sps:$4 sm:$0xff]   ;;  %v2621_v41 = vld [vmem:[%s3608_s0 + $0x8] ss:$12 sps:$4 sm:$0xff]   ;;  %v2629_v43 = vld [vmem:[#allocation5 + $0x38] sm:$0xff]   ;;  %vm2843_vm0 = vmmov 0  }
  0x2c   :  { %381 = vmatprep.subr.bf16.mxu0 %v2564_v11  ;;  %405 = vmatprep.mubr.bf16.mxu0 %v2627_v35  ;;  %v2630_v44 = vld [vmem:[#allocation5 + $0x70] sm:$0xff]   ;;  %v2602_v45 = vld [vmem:[#allocation2 + $0xc0] ss:$8 sps:$4 sm:$0xff]   ;;  %v2612_v50 = vld [vmem:[#allocation2 + $0xa4] ss:$8 sps:$4 sm:$0xff]   ;;  %vm823_vm1 = vcmask 523264  }
  0x2d   :  { %v2606_v46 = vld [vmem:[#allocation2 + $0xb4] ss:$8 sps:$4 sm:$0xff]   ;;  %v2608_v49 = vld [vmem:[#allocation2 + $0xb0] ss:$8 sps:$4 sm:$0xff]   ;;  %v2633_v51 = vld [vmem:[#allocation5 + $0x28] sm:$0xff]   ;;  %s2848_s1 = smov 70  }
  0x2e   :  { %423 = vmatpush1.bf16.msra.mxu1 %v2593_v21  ;;  %v2631_v47 = vld [vmem:[#allocation5 + $0x30] sm:$0xff]   ;;  %v2614_v52 = vld [vmem:[#allocation2 + $0xa0] ss:$8 sps:$4 sm:$0xff]   ;;  %v2622_v55 = vld [vmem:[#allocation2 + $0x84] ss:$8 sps:$4 sm:$0xff]   ;;  %s2850_s2 = smov 74  }
  0x2f   :  { %382 = vmatpush1.bf16.msra.mxu0 %v2566_v14  ;;  %424 = vmatprep.subr.bf16.mxu1 %v2597_v22  ;;  %v2618_v53 = vld [vmem:[#allocation2 + $0x94] ss:$8 sps:$4 sm:$0xff]   ;;  %v2620_v54 = vld [vmem:[#allocation2 + $0x90] ss:$8 sps:$4 sm:$0xff]   ;;  %v2624_v56 = vld [vmem:[#allocation2 + $0x80] ss:$8 sps:$4 sm:$0xff]  }
  0x30   :  { %383 = vmatprep.subr.bf16.mxu0 %v2567_v16  ;;  %v2625_v57 = vld [vmem:[%s3608_s0] ss:$12 sps:$4 sm:$0xff]   ;;  %v2636_v60 = vld [vmem:[#allocation5 + $0x58] sm:$0xff]   ;;  %v2638_v62 = vld [vmem:[#allocation5 + $0x50] sm:$0xff]   ;;  %s2851_s27 = smov 76   ;;  %vm1063_vm2 = vcmask 15360  }
  0x31   :  { %v2634_v58 = vld [vmem:[#allocation5 + $0x60] sm:$0xff]   ;;  %v2637_v61 = vld [vmem:[#allocation5 + $0x18] sm:$0xff]   ;;  %v2639_v63 = vld [vmem:[#allocation5 + $0x10] sm:$0xff]   ;;  %vm1260_vm3 = vcmask 31760   ;;  %vm1435_vm4 = vcmask 48160   ;;  %vm1610_vm5 = vcmask 64560  }
  0x32   :  { %425 = vmatpush1.bf16.msra.mxu1 %v2599_v25  ;;  %v2635_v59 = vld [vmem:[#allocation5 + $0x20] sm:$0xff]   ;;  %v2640_v1 = vld [vmem:[#allocation5 + $0x48] sm:$0xff]   ;;  %v2644_v5 = vld [vmem:[%s3612_s4 + $0x38] sm:$0xff]   ;;  %vm1785_vm6 = vcmask 80960   ;;  %vm1960_vm7 = vcmask 97360   ;;  %vm2135_vm8 = vcmask 113760  }
  0x33   :  { %384 = vmatpush1.bf16.msra.mxu0 %v2569_v19  ;;  %426 = vmatprep.subr.bf16.mxu1 %v2603_v26  ;;  %v2641_v2 = vld [vmem:[#allocation5 + $0x8] sm:$0xff]   ;;  %v2642_v3 = vld [vmem:[#allocation5 + $0x40] sm:$0xff]   ;;  %v2645_v7 = vld [vmem:[%s3612_s4 + $0x30] sm:$0xff]   ;;  %vm2308_vm9 = vcmask 130160   ;;  %s2853_s28 = smov [#allocation7]  }
  0x34   :  { %385 = vmatprep.subr.bf16.mxu0 %v2570_v20  ;;  %v2643_v4 = vld [vmem:[#allocation5] sm:$0xff]   ;;  %v2646_v8 = vld [vmem:[%s3612_s4 + $0x28] sm:$0xff]   ;;  %s2320_s29 = sshll.u32 %s2853_s28, 4  ;;  %s2321_s29 = int_to_ptr.vmem [resolvable:$true] %s2320_s29 }
  0x35   :  { %v2647_v9 = vld [vmem:[%s3612_s4 + $0x20] sm:$0xff]   ;;  %s2809_s30 = scalar_lea.vmem %s2321_s29, 256  ;;  %p2814_p11 = scmp.lt.s32.totalorder %s2321_s29, %s2321_s29 }
  0x36   :  { %427 = vmatpush1.bf16.msra.mxu1 %v2605_v29  ;;  %v2649_v29 = vld [vmem:[%s3612_s4 + $0x10] sm:$0xff]   ;;  %v2976_v35 = vld [vmem:[%s3614_s6 + $0x20] ss:$8 sps:$4 sm:$0xff]   ;;  %p2810_p10 = scmp.ne.s32.totalorder %s2321_s29, %s2809_s30  ;;  %p2815_p12 = scmp.lt.s32.totalorder %s2809_s30, %s2809_s30 }
  0x37   :  { %386 = vmatpush1.bf16.msra.mxu0 %v2572_v23  ;;  %428 = vmatprep.subr.bf16.mxu1 %v2609_v30  ;;  %v2650_v30 = vld [vmem:[%s3612_s4 + $0x8] sm:$0xff]  }
  0x38   :  { %387 = vmatprep.subr.bf16.mxu0 %v2576_v24  ;;  %p2816_p13 = por %p2815_p12, %p2814_p11 }
  0x3a   :  { %429 = vmatpush1.bf16.msra.mxu1 %v2611_v33  ;;  %v2963_v33 = vld [vmem:[%s3614_s6 + $0x30] ss:$8 sps:$4 sm:$0xff]   ;;  %p2817_p0 = pnand %p2816_p13, %p2810_p10 }
  0x3b   :  { %388 = vmatpush1.bf16.msra.mxu0 %v2578_v27  ;;  %430 = vmatprep.subr.bf16.mxu1 %v2615_v34  ;;  %v2968_v34 = vld [vmem:[%s3614_s6 + $0x24] ss:$8 sps:$4 sm:$0xff]  }
  0x3c   :  { %389 = vmatprep.subr.bf16.mxu0 %v2582_v28  ;;  %v2648_v28 = vld [vmem:[%s3612_s4 + $0x18] sm:$0xff]  }
  0x3e   :  { %431 = vmatpush1.bf16.msra.mxu1 %v2617_v39 }
  0x3f   :  { %390 = vmatpush2.bf16.msra.mxu0 %v2584_v31  ;;  %2454 = vmatprep.subr.bf16.mxu1 %v2628_v42  ;;  %v2651_v31 = vld [vmem:[%s3612_s4] sm:$0xff]  }
  0x40   :  { %391 = vmatprep.subr.bf16.mxu0 %v2588_v32  ;;  %v2958_v32 = vld [vmem:[%s3614_s6 + $0x34] ss:$8 sps:$4 sm:$0xff]  }
  0x41   :  { %449 = vmatmul.mubr.bf16.vlgmr.msra.gmra.mxu1 %v2621_v41  ;;  %v2384_v41 = vld [vmem:[%s3611_s3] ss:$0 sm:$0xff] }
  0x42   :  { %2455 = vmatpush3.bf16.msra.mxu1 %v2629_v43 }
  0x43   :  { %392 = vmatpush2.bf16.msra.mxu0 %v2590_v36  ;;  %2456 = vmatprep.subr.bf16.mxu1 %v2630_v44  ;;  %v2982_v36 = vld [vmem:[%s3614_s6 + $0x14] ss:$8 sps:$4 sm:$0xff]  }
  0x44   :  { %393 = vmatprep.subr.bf16.mxu0 %v2594_v37  ;;  %v2988_v37 = vld [vmem:[%s3614_s6 + $0x10] ss:$8 sps:$4 sm:$0xff]  }
  0x46   :  { %2457 = vmatpush3.bf16.msra.mxu1 %v2631_v47 }
  0x47   :  { %394 = vmatpush2.bf16.msra.mxu0 %v2596_v38  ;;  %2458 = vmatprep.subr.bf16.mxu1 %v2632_v48 }
  0x48   :  { %395 = vmatprep.subr.bf16.mxu0 %v2600_v40 }
  0x4a   :  { %2459 = vmatpush3.bf16.msra.mxu1 %v2633_v51  ;;  %v3009_v51 = vld [vmem:[%s3614_s6] ss:$8 sps:$4 sm:$0xff]  }
  0x4b   :  { %396 = vmatpush2.bf16.msra.mxu0 %v2602_v45  ;;  %2460 = vmatprep.subr.bf16.mxu1 %v2634_v58 }
  0x4c   :  { %397 = vmatprep.subr.bf16.mxu0 %v2606_v46 }
  0x4e   :  { %2461 = vmatpush3.bf16.msra.mxu1 %v2635_v59 }
  0x4f   :  { %398 = vmatpush2.bf16.msra.mxu0 %v2608_v49  ;;  %2462 = vmatprep.subr.bf16.mxu1 %v2636_v60 }
  0x50   :  { %399 = vmatprep.subr.bf16.mxu0 %v2612_v50  ;;  %v3004_v50 = vld [vmem:[%s3614_s6 + $0x4] ss:$8 sps:$4 sm:$0xff]  }
  0x52   :  { %2463 = vmatpush3.bf16.msra.mxu1 %v2637_v61 }
  0x53   :  { %400 = vmatpush2.bf16.msra.mxu0 %v2614_v52  ;;  %2464 = vmatprep.subr.bf16.mxu1 %v2638_v62  ;;  %v2401_v52 = vld [vmem:[%s3613_s5] ss:$0 sm:$0xff]  ;;  %s2847_s5 = smov 68  }
  0x54   :  { %401 = vmatprep.subr.bf16.mxu0 %v2618_v53 }
  0x56   :  { %2465 = vmatpush3.bf16.msra.mxu1 %v2639_v63  ;;  %v773_v63 = vlaneseq }
  0x57   :  { %402 = vmatpush2.bf16.msra.mxu0 %v2620_v54  ;;  %2466 = vmatprep.subr.bf16.mxu1 %v2640_v1 }
  0x58   :  { %403 = vmatprep.subr.bf16.mxu0 %v2622_v55  ;;  %v774_v1 = vshrl.u32 %v773_v63, 7 }
  0x5a   :  { %2467 = vmatpush3.bf16.msra.mxu1 %v2641_v2  ;;  %v3044_v2 = vsub.s32 0, %v774_v1 }
  0x5b   :  { %404 = vmatpush2.bf16.msra.mxu0 %v2624_v56  ;;  %2468 = vmatprep.subr.bf16.mxu1 %v2642_v3  ;;  %v766_v3 = vld [vmem:[%s3615_s7] sm:$0x3]  ;;  %s2849_s7 = smov 72  }
  0x5c   :  { %2485 = vmatprep.subr.bf16.mxu0 %v2842_v6 }
  0x5e   :  { %406 = vmatmul.mubr.bf16.vlgmr.msra.gmra.mxu0 %v2625_v57  ;;  %2469 = vmatpush3.bf16.msra.mxu1 %v2643_v4  ;;  %v3050_v4 = vrot.slane %v766_v3, %v3044_v2 }
  0x5f   :  { %2486 = vmatpush3.bf16.msra.mxu0 %v2644_v5  ;;  %2501 = vmatprep.mubr.msk.bf16.mxu0 %vm2843_vm0, %v2842_v6 }
  0x60   :  { %2487 = vmatprep.subr.bf16.mxu0 %v2842_v6  ;;  %835 = vmatprep.subr.bf16.mxu1 %v2958_v32 }
  0x63   :  { %2488 = vmatpush3.bf16.msra.mxu0 %v2645_v7 }
  0x64   :  { %2489 = vmatprep.subr.bf16.mxu0 %v2842_v6 }
  0x67   :  { %2490 = vmatpush3.bf16.msra.mxu0 %v2646_v8 }
  0x68   :  { %2491 = vmatprep.subr.bf16.mxu0 %v2842_v6 }
  0x6b   :  { %2492 = vmatpush3.bf16.msra.mxu0 %v2647_v9 }
  0x6c   :  { %2493 = vmatprep.subr.bf16.mxu0 %v2842_v6 }
  0x6f   :  { %2494 = vmatpush3.bf16.msra.mxu0 %v2648_v28 }
  0x70   :  { %2495 = vmatprep.subr.bf16.mxu0 %v2842_v6 }
  0x73   :  { %2496 = vmatpush3.bf16.msra.mxu0 %v2649_v29 }
  0x74   :  { %2497 = vmatprep.subr.bf16.mxu0 %v2842_v6 }
  0x77   :  { %2498 = vmatpush3.bf16.msra.mxu0 %v2650_v30 }
  0x78   :  { %2499 = vmatprep.subr.bf16.mxu0 %v2842_v6 }
  0x7b   :  { %2500 = vmatpush3.bf16.msra.mxu0 %v2651_v31 }
  0x7c   :  { %955 = vmatprep.subr.bf16.mxu0 %v2958_v32 }
 0x101   :  { %v450_v10 = vpop.f32.mrf.mxu1 }
 0x103   :  { %v452_v11 = vpop.f32.mrf.mxu1 }
 0x105   :  { %v454_v13 = vpop.f32.mrf.mxu1 }
 0x107   :  { %v456_v19 = vpop.f32.mrf.mxu1 }
 0x11e   :  { %v407_v12 = vpop.f32.mrf.mxu0 }
 0x11f   :  { %v451_v18 = vadd.f32 %v450_v10, %v407_v12 }
 0x120   :  { %v409_v14 = vpop.f32.mrf.mxu0 }
 0x121   :  { %v453_v16 = vadd.f32 %v452_v11, %v409_v14  ;;  %v459_v25 = vmax.f32 %v451_v18, 0.0 }
 0x122   :  { %v411_v15 = vpop.f32.mrf.mxu0 }
 0x123   :  { %v455_v17 = vadd.f32 %v454_v13, %v411_v15  ;;  %v460_v23 = vmax.f32 %v453_v16, 0.0 }
 0x124   :  { %v413_v20 = vpop.f32.mrf.mxu0 }
 0x125   :  { %v457_v21 = vadd.f32 %v456_v19, %v413_v20  ;;  %v461_v22 = vmax.f32 %v455_v17, 0.0  ;;  %v3054_v19 = vsub.s32 1, %v774_v1 }
 0x127   :  { %v462_v24 = vmax.f32 %v457_v21, 0.0  ;;  %v463_v27 = vpack.c.bf16 %v461_v22, %v459_v25  ;;  %v3057_v20 = vrot.slane %v766_v3, %v3054_v19 }
 0x129   :  { %v464_v26 = vpack.c.bf16 %v462_v24, %v460_v23  ;;  %v3063_v23 = vld [vmem:[%s3617_s9] ss:$0 sm:$0xff] }
 0x12b   :  { %632 = vmatprep.mubr.bf16.mxu1 %v464_v26 }
 0x12c   :  { %633 = vmatmul.mubr.bf16.vlgmr.msra.gmra.mxu1 %v463_v27 }
 0x12d   :  { %859 = vmatprep.mubr.bf16.mxu1 %v2841_v0  ;;  %836 = vmatpush1.bf16.msra.mxu1 %v2963_v33 }
 0x12e   :  { %837 = vmatprep.subr.bf16.mxu1 %v2968_v34 }
 0x131   :  { %838 = vmatpush1.bf16.msra.mxu1 %v2976_v35 }
 0x132   :  { %839 = vmatprep.subr.bf16.mxu1 %v2982_v36 }
 0x135   :  { %840 = vmatpush1.bf16.msra.mxu1 %v2988_v37 }
 0x136   :  { %841 = vmatprep.subr.bf16.mxu1 %v3004_v50 }
 0x139   :  { %842 = vmatpush1.bf16.msra.mxu1 %v3009_v51 }
 0x13a   :  { %880 = vmatprep.subr.bf16.mxu1 %v2958_v32 }
 0x1ec   :  { %v2470_v38 = vpop.f32.mrf.mxu1 }
 0x1ee   :  { %v2471_v39 = vpop.f32.mrf.mxu1 }
 0x1ef   :  { %v2472_v40 = vadd.f32 %v2471_v39, %v2470_v38 }
 0x1f0   :  { %v2473_v42 = vpop.f32.mrf.mxu1 }
 0x1f1   :  { %v635_v44 = vadd.f32 %v2472_v40, %v2384_v41 }
 0x1f2   :  { %v2474_v43 = vpop.f32.mrf.mxu1 }
 0x1f3   :  { %v2475_v45 = vadd.f32 %v2474_v43, %v2473_v42  ;;  %v641_v47 = vmax.f32 %v635_v44, 0.0 }
 0x1f5   :  { %v638_v46 = vadd.f32 %v2475_v45, %v2384_v41 }
 0x1f7   :  { %v642_v48 = vmax.f32 %v638_v46, 0.0 }
 0x1f9   :  { %v643_v49 = vpack.c.bf16 %v642_v48, %v641_v47 }
 0x1fb   :  { %2502 = vmatmul.mubr.bf16.vlgmr.msra.gmra.mxu0 %v643_v49 }
 0x1fc   :  { %956 = vmatpush1.bf16.msra.mxu0 %v2963_v33  ;;  %979 = vmatprep.mubr.bf16.mxu0 %v2841_v0 }
 0x1fd   :  { %957 = vmatprep.subr.bf16.mxu0 %v2968_v34 }
 0x200   :  { %958 = vmatpush1.bf16.msra.mxu0 %v2976_v35 }
 0x201   :  { %959 = vmatprep.subr.bf16.mxu0 %v2982_v36 }
 0x204   :  { %960 = vmatpush1.bf16.msra.mxu0 %v2988_v37 }
 0x205   :  { %961 = vmatprep.subr.bf16.mxu0 %v3004_v50 }
 0x208   :  { %962 = vmatpush1.bf16.msra.mxu0 %v3009_v51 }
 0x209   :  { %1140 = vmatprep.subr.bf16.mxu0 %v2958_v32 }
 0x2bb   :  { %v749_v53 = vpop.f32.mrf.mxu0 }
 0x2bc   :  { %v750_v54 = vadd.f32 %v2401_v52, %v749_v53 }
 0x2bd   :  { %v2503_v55 = vpop.f32.mrf.mxu0 }
 0x2be   :  { %v3020_v56 = vmax.f32 %v750_v54, 0.0 }
 0x2bf   :  { %v752_v57 = vpop.f32.mrf.mxu0 }
 0x2c0   :  { %v771_v58 = vpack.c.bf16 %v3020_v56, %v3020_v56  ;;  %v753_v60 = vadd.f32 %v2401_v52, %v752_v57 }
 0x2c1   :  { %v2504_v59 = vpop.f32.mrf.mxu0 }
 0x2c2   :  { %2419 = vmatmul.mubr.msk.bf16.vlgmr.msra.gmra.mxu1 %vm823_vm1, %v771_v58  ;;  %v757_v61 = vmax.f32 %v753_v60, 0.0  ;;  %v2844_v58 = vmov 65   ;;  %v2845_v59 = vmov 64  }
 0x2c3   :  { %881 = vmatpush1.bf16.msra.mxu1 %v2963_v33  ;;  %904 = vmatprep.mubr.bf16.mxu1 %v2841_v0 }
 0x2c4   :  { %882 = vmatprep.subr.bf16.mxu1 %v2968_v34  ;;  %v868_v62 = vpack.c.bf16 %v757_v61, %v757_v61  ;;  %2525 = vset.pattern.permute.xlu1 %v2844_v58 }
 0x2c5   :  { %2524 = vset.pattern.permute.xlu0 %v2845_v59 }
 0x2c7   :  { %883 = vmatpush1.bf16.msra.mxu1 %v2976_v35 }
 0x2c8   :  { %884 = vmatprep.subr.bf16.mxu1 %v2982_v36 }
 0x2cb   :  { %885 = vmatpush1.bf16.msra.mxu1 %v2988_v37 }
 0x2cc   :  { %886 = vmatprep.subr.bf16.mxu1 %v3004_v50 }
 0x2cf   :  { %887 = vmatpush1.bf16.msra.mxu1 %v3009_v51 }
 0x2d0   :  { %1025 = vmatprep.subr.bf16.mxu1 %v2958_v32 }
 0x2d2   :  { %2420 = vmatmul.mubr.msk.bf16.vlgmr.msra.gmra.mxu1 %vm823_vm1, %v868_v62 }
 0x2d3   :  { %1026 = vmatpush1.bf16.msra.mxu1 %v2963_v33  ;;  %1049 = vmatprep.mubr.bf16.mxu1 %v2841_v0 }
 0x2d4   :  { %1027 = vmatprep.subr.bf16.mxu1 %v2968_v34 }
 0x2d7   :  { %1028 = vmatpush1.bf16.msra.mxu1 %v2976_v35 }
 0x2d8   :  { %1029 = vmatprep.subr.bf16.mxu1 %v2982_v36 }
 0x2db   :  { %1030 = vmatpush1.bf16.msra.mxu1 %v2988_v37 }
 0x2dc   :  { %1031 = vmatprep.subr.bf16.mxu1 %v3004_v50 }
 0x2df   :  { %1032 = vmatpush1.bf16.msra.mxu1 %v3009_v51 }
 0x2e0   :  { %1222 = vmatprep.subr.bf16.mxu1 %v2958_v32 }
 0x382   :  { %v861_v5 = vpop.f32.mrf.mxu1 }
 0x383   :  { %v862_v6 = vadd.f32 %v861_v5, %v3050_v4 }
 0x384   :  { %v863_v7 = vpop.f32.mrf.mxu1 }
 0x385   :  { %v2421_v8 = vmul.f32 -1.442695, %v862_v6  ;;  %v864_v21 = vadd.f32 %v863_v7, %v3057_v20 }
 0x386   :  { %v865_v9 = vpop.f32.mrf.mxu1 }
 0x387   :  { %2664 = vpow2.f32 %v2421_v8  ;;  %v2410_v9 = vld [vmem:[%s3616_s8 + $0x1] ss:$2 sm:$0x3] }
 0x388   :  { %v866_v10 = vpop.f32.mrf.mxu1 }
 0x389   :  { %v768_v10 = vld [vmem:[%s3616_s8] ss:$2 sm:$0x3] }
 0x392   :  { %v906_v11 = vpop.f32.mrf.mxu1 }
 0x393   :  { %v907_v12 = vadd.f32 %v906_v11, %v3050_v4  ;;  %v3126_v11 = vrot.slane %v2410_v9, %v3044_v2 }
 0x394   :  { %v2665_v13 = vpop.eup %2664  ;;  %v908_v14 = vpop.f32.mrf.mxu1 }
 0x395   :  { %v916_v15 = vadd.f32 1.0, %v2665_v13  ;;  %v2424_v16 = vmul.f32 -1.442695, %v907_v12  ;;  %v909_v28 = vadd.f32 %v908_v14, %v3057_v20  ;;  %v3129_v12 = vrot.slane %v768_v10, %v3044_v2 }
 0x396   :  { %v910_v17 = vpop.f32.mrf.mxu1 }
 0x397   :  { %2666 = vrcp.f32 %v916_v15 }
 0x398   :  { %2668 = vpow2.f32 %v2424_v16  ;;  %v911_v18 = vpop.f32.mrf.mxu1 }
 0x3a4   :  { %v2667_v22 = vpop.eup %2666 }
 0x3a5   :  { %v2669_v24 = vpop.eup %2668  ;;  %v919_v25 = vmul.f32 %v2667_v22, %v864_v21  ;;  %v928_v41 = vsub.f32 1.0, %v2667_v22 }
 0x3a6   :  { %v992_v26 = vadd.f32 1.0, %v2669_v24 }
 0x3a7   :  { %v926_v27 = vadd.f32 %v3063_v23, %v919_v25 }
 0x3a8   :  { %2670 = vrcp.f32 %v992_v26 }
 0x3a9   :  { %2672 = vtanh.f32 %v926_v27 }
 0x3b5   :  { %v2671_v29 = vpop.eup %2670 }
 0x3b6   :  { %v2673_v30 = vpop.eup %2672  ;;  %v995_v31 = vmul.f32 %v2671_v29, %v909_v28  ;;  %v998_v48 = vsub.f32 1.0, %v2671_v29 }
 0x3b7   :  { %930 = vrot.lane.b32.xlu0 %v2673_v30, %s2839_s23 }
 0x3b8   :  { %v996_v38 = vadd.f32 %v3063_v23, %v995_v31 }
 0x3ba   :  { %2674 = vtanh.f32 %v996_v38 }
 0x3bb   :  { %935 = vrot.lane.b32.xlu0 %v3020_v56, %s2839_s23 }
 0x3c7   :  { %v2675_v39 = vpop.eup %2674 }
 0x3c8   :  { %1000 = vrot.lane.b32.xlu1 %v2675_v39, %s2839_s23  ;;  %v3138_v39 = vrot.slane %v2410_v9, %v3054_v19 }
 0x3cc   :  { %1005 = vrot.lane.b32.xlu1 %v757_v61, %s2839_s23 }
 0x429   :  { %v931_v40 = vpop.permute.xlu0 %930 }
 0x42a   :  { %v933_v43 = vmul.f32 %v931_v40, %v928_v41  ;;  %v3141_v40 = vrot.slane %v768_v10, %v3054_v19 }
 0x42d   :  { %v936_v42 = vpop.permute.xlu0 %935 }
 0x42e   :  { %v938_v44 = vmul.f32 %v2667_v22, %v936_v42 }
 0x430   :  { %v3073_v45 = vadd.f32 %v938_v44, %v933_v43 }
 0x432   :  { %v940_v46 = vpack.c.bf16 %v3073_v45, %v3073_v45 }
 0x434   :  { %942 = vrot.lane.b32.xlu0 %v940_v46, %s2839_s23 }
 0x43a   :  { %v1001_v47 = vpop.permute.xlu1 %1000 }
 0x43b   :  { %v1003_v52 = vmul.f32 %v1001_v47, %v998_v48 }
 0x43e   :  { %v1006_v49 = vpop.permute.xlu1 %1005 }
 0x43f   :  { %v1008_v53 = vmul.f32 %v2671_v29, %v1006_v49 }
 0x441   :  { %v3078_v54 = vadd.f32 %v1008_v53, %v1003_v52 }
 0x443   :  { %v1010_v55 = vpack.c.bf16 %v3078_v54, %v3078_v54 }
 0x445   :  { %1012 = vrot.lane.b32.xlu1 %v1010_v55, %s2839_s23 }
 0x4a6   :  { %v943_v56 = vpop.permute.xlu0 %942 }
 0x4a7   :  { %2423 = vmatmul.mubr.msk.bf16.vlgmr.msra.gmra.mxu0 %vm823_vm1, %v943_v56 }
 0x4a8   :  { %1141 = vmatpush1.bf16.msra.mxu0 %v2963_v33  ;;  %1164 = vmatprep.mubr.bf16.mxu0 %v2841_v0 }
 0x4a9   :  { %1142 = vmatprep.subr.bf16.mxu0 %v2968_v34 }
 0x4ac   :  { %1143 = vmatpush1.bf16.msra.mxu0 %v2976_v35 }
 0x4ad   :  { %1144 = vmatprep.subr.bf16.mxu0 %v2982_v36 }
 0x4b0   :  { %1145 = vmatpush1.bf16.msra.mxu0 %v2988_v37 }
 0x4b1   :  { %1146 = vmatprep.subr.bf16.mxu0 %v3004_v50 }
 0x4b4   :  { %1147 = vmatpush1.bf16.msra.mxu0 %v3009_v51 }
 0x4b5   :  { %1315 = vmatprep.subr.bf16.mxu0 %v2958_v32 }
 0x4b7   :  { %v1013_v57 = vpop.permute.xlu1 %1012 }
 0x4b8   :  { %2425 = vmatmul.mubr.msk.bf16.vlgmr.msra.gmra.mxu1 %vm823_vm1, %v1013_v57 }
 0x4b9   :  { %1223 = vmatpush1.bf16.msra.mxu1 %v2963_v33  ;;  %1246 = vmatprep.mubr.bf16.mxu1 %v2841_v0 }
 0x4ba   :  { %1224 = vmatprep.subr.bf16.mxu1 %v2968_v34 }
 0x4bd   :  { %1225 = vmatpush1.bf16.msra.mxu1 %v2976_v35 }
 0x4be   :  { %1226 = vmatprep.subr.bf16.mxu1 %v2982_v36 }
 0x4c1   :  { %1227 = vmatpush1.bf16.msra.mxu1 %v2988_v37 }
 0x4c2   :  { %1228 = vmatprep.subr.bf16.mxu1 %v3004_v50 }
 0x4c5   :  { %1229 = vmatpush1.bf16.msra.mxu1 %v3009_v51 }
 0x4c6   :  { %1397 = vmatprep.subr.bf16.mxu1 %v2958_v32 }
 0x567   :  { %v981_v60 = vpop.f32.mrf.mxu0 }
 0x568   :  { %v982_v17 = vadd.f32 %v981_v60, %v3050_v4 }
 0x569   :  { %v983_v61 = vpop.f32.mrf.mxu0 }
 0x56a   :  { %v3106_v62 = vadd.f32 %v983_v61, %v3057_v20 }
 0x56b   :  { %v985_v63 = vpop.f32.mrf.mxu0 }
 0x56c   :  { %1088 = vperm.xlu1 %2525, %v3106_v62   ;;  %1071 = vperm.xlu0 %2524, %v3106_v62  }
 0x56d   :  { %v986_v1 = vpop.f32.mrf.mxu0 }
 0x570   :  { %2526 = vset.pattern.permute.xlu1 %v2845_v59  ;;  %2527 = vset.pattern.permute.xlu0 %v2844_v58 }
 0x578   :  { %v1051_v3 = vpop.f32.mrf.mxu1 }
 0x579   :  { %v1052_v2 = vadd.f32 %v1051_v3, %v3050_v4 }
 0x57a   :  { %v1053_v5 = vpop.f32.mrf.mxu1 }
 0x57b   :  { %v3113_v6 = vadd.f32 %v1053_v5, %v3057_v20 }
 0x57c   :  { %v1055_v7 = vpop.f32.mrf.mxu1 }
 0x57d   :  { %1175 = vperm.xlu1 %2526, %v3113_v6   ;;  %1181 = vperm.xlu0 %2527, %v3113_v6  }
 0x57e   :  { %v1056_v8 = vpop.f32.mrf.mxu1 }
 0x581   :  { %2529 = vset.pattern.permute.xlu1 %v2844_v58  ;;  %2528 = vset.pattern.permute.xlu0 %v2845_v59 }
 0x5e7   :  { %v1089_v13 = vpop.permute.xlu1 %1088  ;;  %v1072_v14 = vpop.permute.xlu0 %1071 }
 0x5e8   :  { %v1102_v15 = vmul.f32 %v3126_v11, %v1089_v13  ;;  %v1085_v16 = vmul.f32 %v3129_v12, %v1072_v14  ;;  %v1103_v41 = vmul.f32 %v3138_v39, %v1089_v13  ;;  %v1086_v42 = vmul.f32 %v3141_v40, %v1072_v14 }
 0x5ea   :  { %v1104_v18 = vadd.f32 %v1102_v15, %v1085_v16  ;;  %v1105_v43 = vadd.f32 %v1103_v41, %v1086_v42 }
 0x5ec   :  { %v1106_v21 = vadd.f32 %v1104_v18, %v982_v17  ;;  %v1113_v47 = vadd.f32 %v3063_v23, %v1105_v43 }
 0x5ee   :  { %v2426_v22 = vmul.f32 -1.442695, %v1106_v21 }
 0x5f0   :  { %2676 = vpow2.f32 %v2426_v22 }
 0x5f8   :  { %v1176_v24 = vpop.permute.xlu1 %1175  ;;  %v1182_v25 = vpop.permute.xlu0 %1181 }
 0x5f9   :  { %v1178_v26 = vmul.f32 %v1176_v24, %v3129_v12  ;;  %v1184_v27 = vmul.f32 %v1182_v25, %v3126_v11  ;;  %v1179_v53 = vmul.f32 %v1176_v24, %v3141_v40  ;;  %v1185_v19 = vmul.f32 %v1182_v25, %v3138_v39 }
 0x5fb   :  { %v1186_v28 = vadd.f32 %v1184_v27, %v1178_v26  ;;  %v1187_v55 = vadd.f32 %v1185_v19, %v1179_v53 }
 0x5fd   :  { %v2677_v29 = vpop.eup %2676  ;;  %v1188_v30 = vadd.f32 %v1186_v28, %v1052_v2  ;;  %v1195_v60 = vadd.f32 %v3063_v23, %v1187_v55 }
 0x5fe   :  { %v1110_v31 = vadd.f32 1.0, %v2677_v29 }
 0x5ff   :  { %v2428_v38 = vmul.f32 -1.442695, %v1188_v30 }
 0x600   :  { %2678 = vrcp.f32 %v1110_v31 }
 0x601   :  { %2680 = vpow2.f32 %v2428_v38 }
 0x60d   :  { %v2679_v44 = vpop.eup %2678 }
 0x60e   :  { %v2681_v46 = vpop.eup %2680  ;;  %v1114_v48 = vmul.f32 %v2679_v44, %v3106_v62  ;;  %v1117_v3 = vsub.f32 1.0, %v2679_v44  ;;  %v1123_v7 = vmul.f32 %v2679_v44, %v3073_v45 }
 0x60f   :  { %v1192_v49 = vadd.f32 1.0, %v2681_v46 }
 0x610   :  { %v1115_v52 = vadd.f32 %v1114_v48, %v1113_v47 }
 0x611   :  { %2682 = vrcp.f32 %v1192_v49 }
 0x612   :  { %2684 = vtanh.f32 %v1115_v52 }
 0x61e   :  { %v2683_v56 = vpop.eup %2682 }
 0x61f   :  { %v2685_v57 = vpop.eup %2684  ;;  %v1196_v61 = vmul.f32 %v2683_v56, %v3113_v6  ;;  %v1199_v13 = vsub.f32 1.0, %v2683_v56  ;;  %v1205_v15 = vmul.f32 %v2683_v56, %v3078_v54 }
 0x620   :  { %1119 = vrot.lane.b32.xlu1 %v2685_v57, %s2839_s23 }
 0x621   :  { %v1197_v63 = vadd.f32 %v1196_v61, %v1195_v60 }
 0x623   :  { %2686 = vtanh.f32 %v1197_v63 }
 0x630   :  { %v2687_v1 = vpop.eup %2686 }
 0x631   :  { %1201 = vrot.lane.b32.xlu1 %v2687_v1, %s2839_s23 }
 0x692   :  { %v1120_v5 = vpop.permute.xlu1 %1119 }
 0x693   :  { %v1122_v8 = vmul.f32 %v1120_v5, %v1117_v3 }
 0x695   :  { %v3154_v9 = vadd.f32 %v1123_v7, %v1122_v8 }
 0x697   :  { %v1125_v10 = vpack.c.bf16 %v3154_v9, %v3154_v9 }
 0x699   :  { %1127 = vrot.lane.b32.xlu0 %v1125_v10, %s2839_s23 }
 0x6a3   :  { %v1202_v14 = vpop.permute.xlu1 %1201 }
 0x6a4   :  { %v1204_v16 = vmul.f32 %v1202_v14, %v1199_v13 }
 0x6a6   :  { %v3160_v17 = vadd.f32 %v1205_v15, %v1204_v16 }
 0x6a8   :  { %v1207_v18 = vpack.c.bf16 %v3160_v17, %v3160_v17 }
 0x6aa   :  { %1209 = vrot.lane.b32.xlu1 %v1207_v18, %s2839_s23 }
 0x70b   :  { %v1128_v45 = vpop.permute.xlu0 %1127 }
 0x70c   :  { %2427 = vmatmul.mubr.msk.bf16.vlgmr.msra.gmra.mxu0 %vm823_vm1, %v1128_v45 }
 0x70d   :  { %1316 = vmatpush1.bf16.msra.mxu0 %v2963_v33  ;;  %1339 = vmatprep.mubr.bf16.mxu0 %v2841_v0 }
 0x70e   :  { %1317 = vmatprep.subr.bf16.mxu0 %v2968_v34 }
 0x711   :  { %1318 = vmatpush1.bf16.msra.mxu0 %v2976_v35 }
 0x712   :  { %1319 = vmatprep.subr.bf16.mxu0 %v2982_v36 }
 0x715   :  { %1320 = vmatpush1.bf16.msra.mxu0 %v2988_v37 }
 0x716   :  { %1321 = vmatprep.subr.bf16.mxu0 %v3004_v50 }
 0x719   :  { %1322 = vmatpush1.bf16.msra.mxu0 %v3009_v51 }
 0x71a   :  { %1490 = vmatprep.subr.bf16.mxu0 %v2958_v32 }
 0x71c   :  { %v1210_v54 = vpop.permute.xlu1 %1209 }
 0x71d   :  { %2429 = vmatmul.mubr.msk.bf16.vlgmr.msra.gmra.mxu1 %vm823_vm1, %v1210_v54 }
 0x71e   :  { %1398 = vmatpush1.bf16.msra.mxu1 %v2963_v33  ;;  %1421 = vmatprep.mubr.bf16.mxu1 %v2841_v0 }
 0x71f   :  { %1399 = vmatprep.subr.bf16.mxu1 %v2968_v34 }
 0x722   :  { %1400 = vmatpush1.bf16.msra.mxu1 %v2976_v35 }
 0x723   :  { %1401 = vmatprep.subr.bf16.mxu1 %v2982_v36 }
 0x726   :  { %1402 = vmatpush1.bf16.msra.mxu1 %v2988_v37 }
 0x727   :  { %1403 = vmatprep.subr.bf16.mxu1 %v3004_v50 }
 0x72a   :  { %1404 = vmatpush1.bf16.msra.mxu1 %v3009_v51 }
 0x72b   :  { %1572 = vmatprep.subr.bf16.mxu1 %v2958_v32 }
 0x7cc   :  { %v1166_v21 = vpop.f32.mrf.mxu0 }
 0x7cd   :  { %v1167_v46 = vadd.f32 %v1166_v21, %v3050_v4 }
 0x7ce   :  { %v1168_v22 = vpop.f32.mrf.mxu0 }
 0x7cf   :  { %v1169_v24 = vadd.f32 %v1168_v22, %v3057_v20 }
 0x7d0   :  { %v1170_v25 = vpop.f32.mrf.mxu0 }
 0x7d1   :  { %v3187_v26 = vadd.f32 %v1169_v24, %v3106_v62 }
 0x7d2   :  { %v1171_v27 = vpop.f32.mrf.mxu0 }
 0x7d3   :  { %1268 = vperm.xlu0 %2528, %v3187_v26   ;;  %1274 = vperm.xlu1 %2529, %v3187_v26  }
 0x7d7   :  { %2531 = vset.pattern.permute.xlu0 %v2844_v58  ;;  %2530 = vset.pattern.permute.xlu1 %v2845_v59 }
 0x7dd   :  { %v1248_v2 = vpop.f32.mrf.mxu1 }
 0x7de   :  { %v1249_v56 = vadd.f32 %v1248_v2, %v3050_v4 }
 0x7df   :  { %v1250_v28 = vpop.f32.mrf.mxu1 }
 0x7e0   :  { %v1251_v29 = vadd.f32 %v1250_v28, %v3057_v20 }
 0x7e1   :  { %v1252_v30 = vpop.f32.mrf.mxu1 }
 0x7e2   :  { %v3195_v31 = vadd.f32 %v1251_v29, %v3113_v6 }
 0x7e3   :  { %v1253_v38 = vpop.f32.mrf.mxu1 }
 0x7e4   :  { %1356 = vperm.xlu0 %2531, %v3195_v31   ;;  %1350 = vperm.xlu1 %2530, %v3195_v31  }
 0x7e8   :  { %2532 = vset.pattern.permute.xlu0 %v2845_v59  ;;  %2533 = vset.pattern.permute.xlu1 %v2844_v58 }
 0x84e   :  { %v1269_v41 = vpop.permute.xlu0 %1268  ;;  %v1275_v42 = vpop.permute.xlu1 %1274 }
 0x84f   :  { %v1271_v43 = vmul.f32 %v1269_v41, %v3129_v12  ;;  %v1277_v44 = vmul.f32 %v1275_v42, %v3126_v11  ;;  %v1272_v3 = vmul.f32 %v1269_v41, %v3141_v40  ;;  %v1278_v5 = vmul.f32 %v1275_v42, %v3138_v39 }
 0x851   :  { %v1279_v47 = vadd.f32 %v1277_v44, %v1271_v43  ;;  %v1280_v7 = vadd.f32 %v1278_v5, %v1272_v3 }
 0x853   :  { %v1281_v48 = vadd.f32 %v1279_v47, %v1167_v46  ;;  %v1288_v13 = vadd.f32 %v3063_v23, %v1280_v7 }
 0x855   :  { %v2430_v49 = vmul.f32 -1.442695, %v1281_v48 }
 0x857   :  { %2688 = vpow2.f32 %v2430_v49 }
 0x85f   :  { %v1357_v52 = vpop.permute.xlu0 %1356  ;;  %v1351_v53 = vpop.permute.xlu1 %1350 }
 0x860   :  { %v1359_v19 = vmul.f32 %v1357_v52, %v3126_v11  ;;  %v1353_v55 = vmul.f32 %v1351_v53, %v3129_v12  ;;  %v1360_v18 = vmul.f32 %v1357_v52, %v3138_v39  ;;  %v1354_v45 = vmul.f32 %v1351_v53, %v3141_v40 }
 0x862   :  { %v1361_v57 = vadd.f32 %v1359_v19, %v1353_v55  ;;  %v1362_v54 = vadd.f32 %v1360_v18, %v1354_v45 }
 0x864   :  { %v2689_v60 = vpop.eup %2688  ;;  %v1363_v61 = vadd.f32 %v1361_v57, %v1249_v56  ;;  %v1370_v25 = vadd.f32 %v3063_v23, %v1362_v54 }
 0x865   :  { %v1285_v63 = vadd.f32 1.0, %v2689_v60 }
 0x866   :  { %v2432_v1 = vmul.f32 -1.442695, %v1363_v61 }
 0x867   :  { %2690 = vrcp.f32 %v1285_v63 }
 0x868   :  { %2692 = vpow2.f32 %v2432_v1 }
 0x874   :  { %v2691_v8 = vpop.eup %2690 }
 0x875   :  { %v2693_v10 = vpop.eup %2692  ;;  %v1289_v14 = vmul.f32 %v2691_v8, %v1169_v24  ;;  %v1292_v24 = vsub.f32 1.0, %v2691_v8  ;;  %v1298_v38 = vmul.f32 %v2691_v8, %v3154_v9 }
 0x876   :  { %v1367_v15 = vadd.f32 1.0, %v2693_v10 }
 0x877   :  { %v1290_v16 = vadd.f32 %v1289_v14, %v1288_v13 }
 0x878   :  { %2694 = vrcp.f32 %v1367_v15 }
 0x879   :  { %2696 = vtanh.f32 %v1290_v16 }
 0x885   :  { %v2695_v21 = vpop.eup %2694 }
 0x886   :  { %v2697_v22 = vpop.eup %2696  ;;  %v1371_v27 = vmul.f32 %v2695_v21, %v1251_v29  ;;  %v1374_v29 = vsub.f32 1.0, %v2695_v21  ;;  %v1380_v46 = vmul.f32 %v2695_v21, %v3160_v17 }
 0x887   :  { %1294 = vrot.lane.b32.xlu1 %v2697_v22, %s2839_s23 }
 0x888   :  { %v1372_v2 = vadd.f32 %v1371_v27, %v1370_v25 }
 0x88a   :  { %2698 = vtanh.f32 %v1372_v2 }
 0x897   :  { %v2699_v28 = vpop.eup %2698 }
 0x898   :  { %1376 = vrot.lane.b32.xlu1 %v2699_v28, %s2839_s23 }
 0x8f9   :  { %v1295_v30 = vpop.permute.xlu1 %1294 }
 0x8fa   :  { %v1297_v41 = vmul.f32 %v1295_v30, %v1292_v24 }
 0x8fc   :  { %v3216_v42 = vadd.f32 %v1298_v38, %v1297_v41 }
 0x8fe   :  { %v1300_v43 = vpack.c.bf16 %v3216_v42, %v3216_v42 }
 0x900   :  { %1302 = vrot.lane.b32.xlu0 %v1300_v43, %s2839_s23 }
 0x90a   :  { %v1377_v44 = vpop.permute.xlu1 %1376 }
 0x90b   :  { %v1379_v47 = vmul.f32 %v1377_v44, %v1374_v29 }
 0x90d   :  { %v3222_v48 = vadd.f32 %v1380_v46, %v1379_v47 }
 0x90f   :  { %v1382_v49 = vpack.c.bf16 %v3222_v48, %v3222_v48 }
 0x911   :  { %1384 = vrot.lane.b32.xlu1 %v1382_v49, %s2839_s23 }
 0x972   :  { %v1303_v9 = vpop.permute.xlu0 %1302 }
 0x973   :  { %2431 = vmatmul.mubr.msk.bf16.vlgmr.msra.gmra.mxu0 %vm823_vm1, %v1303_v9 }
 0x974   :  { %1491 = vmatpush1.bf16.msra.mxu0 %v2963_v33  ;;  %1514 = vmatprep.mubr.bf16.mxu0 %v2841_v0 }
 0x975   :  { %1492 = vmatprep.subr.bf16.mxu0 %v2968_v34 }
 0x978   :  { %1493 = vmatpush1.bf16.msra.mxu0 %v2976_v35 }
 0x979   :  { %1494 = vmatprep.subr.bf16.mxu0 %v2982_v36 }
 0x97c   :  { %1495 = vmatpush1.bf16.msra.mxu0 %v2988_v37 }
 0x97d   :  { %1496 = vmatprep.subr.bf16.mxu0 %v3004_v50 }
 0x980   :  { %1497 = vmatpush1.bf16.msra.mxu0 %v3009_v51 }
 0x981   :  { %1665 = vmatprep.subr.bf16.mxu0 %v2958_v32 }
 0x983   :  { %v1385_v17 = vpop.permute.xlu1 %1384 }
 0x984   :  { %2433 = vmatmul.mubr.msk.bf16.vlgmr.msra.gmra.mxu1 %vm823_vm1, %v1385_v17 }
 0x985   :  { %1573 = vmatpush1.bf16.msra.mxu1 %v2963_v33  ;;  %1596 = vmatprep.mubr.bf16.mxu1 %v2841_v0 }
 0x986   :  { %1574 = vmatprep.subr.bf16.mxu1 %v2968_v34 }
 0x989   :  { %1575 = vmatpush1.bf16.msra.mxu1 %v2976_v35 }
 0x98a   :  { %1576 = vmatprep.subr.bf16.mxu1 %v2982_v36 }
 0x98d   :  { %1577 = vmatpush1.bf16.msra.mxu1 %v2988_v37 }
 0x98e   :  { %1578 = vmatprep.subr.bf16.mxu1 %v3004_v50 }
 0x991   :  { %1579 = vmatpush1.bf16.msra.mxu1 %v3009_v51 }
 0x992   :  { %1747 = vmatprep.subr.bf16.mxu1 %v2958_v32 }
 0xa33   :  { %v1341_v52 = vpop.f32.mrf.mxu0 }
 0xa34   :  { %v1342_v14 = vadd.f32 %v1341_v52, %v3050_v4 }
 0xa35   :  { %v1343_v53 = vpop.f32.mrf.mxu0 }
 0xa36   :  { %v1344_v19 = vadd.f32 %v1343_v53, %v3057_v20 }
 0xa37   :  { %v1345_v55 = vpop.f32.mrf.mxu0 }
 0xa38   :  { %v3249_v56 = vadd.f32 %v1344_v19, %v3187_v26 }
 0xa39   :  { %v1346_v57 = vpop.f32.mrf.mxu0 }
 0xa3a   :  { %1443 = vperm.xlu0 %2532, %v3249_v56   ;;  %1449 = vperm.xlu1 %2533, %v3249_v56  }
 0xa3e   :  { %2535 = vset.pattern.permute.xlu0 %v2844_v58  ;;  %2534 = vset.pattern.permute.xlu1 %v2845_v59 }
 0xa44   :  { %v1423_v60 = vpop.f32.mrf.mxu1 }
 0xa45   :  { %v1424_v25 = vadd.f32 %v1423_v60, %v3050_v4 }
 0xa46   :  { %v1425_v61 = vpop.f32.mrf.mxu1 }
 0xa47   :  { %v1426_v63 = vadd.f32 %v1425_v61, %v3057_v20 }
 0xa48   :  { %v1427_v1 = vpop.f32.mrf.mxu1 }
 0xa49   :  { %v3257_v3 = vadd.f32 %v1426_v63, %v3195_v31 }
 0xa4a   :  { %v1428_v5 = vpop.f32.mrf.mxu1 }
 0xa4b   :  { %1531 = vperm.xlu0 %2535, %v3257_v3   ;;  %1525 = vperm.xlu1 %2534, %v3257_v3  }
 0xa4f   :  { %2536 = vset.pattern.permute.xlu0 %v2845_v59  ;;  %2537 = vset.pattern.permute.xlu1 %v2844_v58 }
 0xab5   :  { %v1444_v7 = vpop.permute.xlu0 %1443  ;;  %v1450_v8 = vpop.permute.xlu1 %1449 }
 0xab6   :  { %v1446_v10 = vmul.f32 %v1444_v7, %v3129_v12  ;;  %v1452_v13 = vmul.f32 %v1450_v8, %v3126_v11  ;;  %v1447_v38 = vmul.f32 %v1444_v7, %v3141_v40  ;;  %v1453_v41 = vmul.f32 %v1450_v8, %v3138_v39 }
 0xab8   :  { %v1454_v15 = vadd.f32 %v1452_v13, %v1446_v10  ;;  %v1455_v43 = vadd.f32 %v1453_v41, %v1447_v38 }
 0xaba   :  { %v1456_v16 = vadd.f32 %v1454_v15, %v1342_v14  ;;  %v1463_v46 = vadd.f32 %v3063_v23, %v1455_v43 }
 0xabc   :  { %v2434_v18 = vmul.f32 -1.442695, %v1456_v16 }
 0xabe   :  { %2700 = vpow2.f32 %v2434_v18 }
 0xac6   :  { %v1532_v45 = vpop.permute.xlu0 %1531  ;;  %v1526_v54 = vpop.permute.xlu1 %1525 }
 0xac7   :  { %v1534_v21 = vmul.f32 %v1532_v45, %v3126_v11  ;;  %v1528_v22 = vmul.f32 %v1526_v54, %v3129_v12  ;;  %v1535_v17 = vmul.f32 %v1532_v45, %v3138_v39  ;;  %v1529_v52 = vmul.f32 %v1526_v54, %v3141_v40 }
 0xac9   :  { %v1536_v27 = vadd.f32 %v1534_v21, %v1528_v22  ;;  %v1537_v53 = vadd.f32 %v1535_v17, %v1529_v52 }
 0xacb   :  { %v2701_v2 = vpop.eup %2700  ;;  %v1538_v28 = vadd.f32 %v1536_v27, %v1424_v25  ;;  %v1545_v60 = vadd.f32 %v3063_v23, %v1537_v53 }
 0xacc   :  { %v1460_v24 = vadd.f32 1.0, %v2701_v2 }
 0xacd   :  { %v2436_v30 = vmul.f32 -1.442695, %v1538_v28 }
 0xace   :  { %2702 = vrcp.f32 %v1460_v24 }
 0xacf   :  { %2704 = vpow2.f32 %v2436_v30 }
 0xadb   :  { %v2703_v29 = vpop.eup %2702 }
 0xadc   :  { %v2705_v44 = vpop.eup %2704  ;;  %v1464_v47 = vmul.f32 %v2703_v29, %v1344_v19  ;;  %v1467_v19 = vsub.f32 1.0, %v2703_v29  ;;  %v1473_v8 = vmul.f32 %v2703_v29, %v3216_v42 }
 0xadd   :  { %v1542_v49 = vadd.f32 1.0, %v2705_v44 }
 0xade   :  { %v1465_v9 = vadd.f32 %v1464_v47, %v1463_v46 }
 0xadf   :  { %2706 = vrcp.f32 %v1542_v49 }
 0xae0   :  { %2708 = vtanh.f32 %v1465_v9 }
 0xaec   :  { %v2707_v55 = vpop.eup %2706 }
 0xaed   :  { %v2709_v57 = vpop.eup %2708  ;;  %v1546_v61 = vmul.f32 %v2707_v55, %v1426_v63  ;;  %v1549_v63 = vsub.f32 1.0, %v2707_v55  ;;  %v1555_v16 = vmul.f32 %v2707_v55, %v3222_v48 }
 0xaee   :  { %1469 = vrot.lane.b32.xlu1 %v2709_v57, %s2839_s23 }
 0xaef   :  { %v1547_v1 = vadd.f32 %v1546_v61, %v1545_v60 }
 0xaf1   :  { %2710 = vtanh.f32 %v1547_v1 }
 0xafe   :  { %v2711_v5 = vpop.eup %2710 }
 0xaff   :  { %1551 = vrot.lane.b32.xlu1 %v2711_v5, %s2839_s23 }
 0xb60   :  { %v1470_v7 = vpop.permute.xlu1 %1469 }
 0xb61   :  { %v1472_v10 = vmul.f32 %v1470_v7, %v1467_v19 }
 0xb63   :  { %v3278_v13 = vadd.f32 %v1473_v8, %v1472_v10 }
 0xb65   :  { %v1475_v14 = vpack.c.bf16 %v3278_v13, %v3278_v13 }
 0xb67   :  { %1477 = vrot.lane.b32.xlu0 %v1475_v14, %s2839_s23 }
 0xb71   :  { %v1552_v15 = vpop.permute.xlu1 %1551 }
 0xb72   :  { %v1554_v18 = vmul.f32 %v1552_v15, %v1549_v63 }
 0xb74   :  { %v3284_v45 = vadd.f32 %v1555_v16, %v1554_v18 }
 0xb76   :  { %v1557_v54 = vpack.c.bf16 %v3284_v45, %v3284_v45 }
 0xb78   :  { %1559 = vrot.lane.b32.xlu1 %v1557_v54, %s2839_s23 }
 0xbd9   :  { %v1478_v42 = vpop.permute.xlu0 %1477 }
 0xbda   :  { %2435 = vmatmul.mubr.msk.bf16.vlgmr.msra.gmra.mxu0 %vm823_vm1, %v1478_v42 }
 0xbdb   :  { %1666 = vmatpush1.bf16.msra.mxu0 %v2963_v33  ;;  %1689 = vmatprep.mubr.bf16.mxu0 %v2841_v0 }
 0xbdc   :  { %1667 = vmatprep.subr.bf16.mxu0 %v2968_v34 }
 0xbdf   :  { %1668 = vmatpush1.bf16.msra.mxu0 %v2976_v35 }
 0xbe0   :  { %1669 = vmatprep.subr.bf16.mxu0 %v2982_v36 }
 0xbe3   :  { %1670 = vmatpush1.bf16.msra.mxu0 %v2988_v37 }
 0xbe4   :  { %1671 = vmatprep.subr.bf16.mxu0 %v3004_v50 }
 0xbe7   :  { %1672 = vmatpush1.bf16.msra.mxu0 %v3009_v51 }
 0xbe8   :  { %1840 = vmatprep.subr.bf16.mxu0 %v2958_v32 }
 0xbea   :  { %v1560_v48 = vpop.permute.xlu1 %1559 }
 0xbeb   :  { %2437 = vmatmul.mubr.msk.bf16.vlgmr.msra.gmra.mxu1 %vm823_vm1, %v1560_v48 }
 0xbec   :  { %1748 = vmatpush1.bf16.msra.mxu1 %v2963_v33  ;;  %1771 = vmatprep.mubr.bf16.mxu1 %v2841_v0 }
 0xbed   :  { %1749 = vmatprep.subr.bf16.mxu1 %v2968_v34 }
 0xbf0   :  { %1750 = vmatpush1.bf16.msra.mxu1 %v2976_v35 }
 0xbf1   :  { %1751 = vmatprep.subr.bf16.mxu1 %v2982_v36 }
 0xbf4   :  { %1752 = vmatpush1.bf16.msra.mxu1 %v2988_v37 }
 0xbf5   :  { %1753 = vmatprep.subr.bf16.mxu1 %v3004_v50 }
 0xbf8   :  { %1754 = vmatpush1.bf16.msra.mxu1 %v3009_v51 }
 0xbf9   :  { %1922 = vmatprep.subr.bf16.mxu1 %v2958_v32 }
 0xc9a   :  { %v1516_v21 = vpop.f32.mrf.mxu0 }
 0xc9b   :  { %v1517_v38 = vadd.f32 %v1516_v21, %v3050_v4 }
 0xc9c   :  { %v1518_v22 = vpop.f32.mrf.mxu0 }
 0xc9d   :  { %v1519_v33 = vadd.f32 %v1518_v22, %v3057_v20 }
 0xc9e   :  { %v1520_v25 = vpop.f32.mrf.mxu0 }
 0xc9f   :  { %v3311_v27 = vadd.f32 %v1519_v33, %v3249_v56 }
 0xca0   :  { %v1521_v34 = vpop.f32.mrf.mxu0 }
 0xca1   :  { %1618 = vperm.xlu0 %2536, %v3311_v27   ;;  %1624 = vperm.xlu1 %2537, %v3311_v27  }
 0xca5   :  { %2539 = vset.pattern.permute.xlu0 %v2844_v58  ;;  %2538 = vset.pattern.permute.xlu1 %v2845_v59 }
 0xcab   :  { %v1598_v35 = vpop.f32.mrf.mxu1 }
 0xcac   :  { %v1599_v9 = vadd.f32 %v1598_v35, %v3050_v4 }
 0xcad   :  { %v1600_v36 = vpop.f32.mrf.mxu1 }
 0xcae   :  { %v1601_v32 = vadd.f32 %v1600_v36, %v3057_v20 }
 0xcaf   :  { %v1602_v37 = vpop.f32.mrf.mxu1 }
 0xcb0   :  { %v3319_v50 = vadd.f32 %v1601_v32, %v3257_v3 }
 0xcb1   :  { %v1603_v51 = vpop.f32.mrf.mxu1 }
 0xcb2   :  { %1706 = vperm.xlu0 %2539, %v3319_v50   ;;  %1700 = vperm.xlu1 %2538, %v3319_v50  }
 0xcb6   :  { %2540 = vset.pattern.permute.xlu0 %v2845_v59  ;;  %2541 = vset.pattern.permute.xlu1 %v2844_v58 }
 0xd1c   :  { %v1619_v2 = vpop.permute.xlu0 %1618  ;;  %v1625_v28 = vpop.permute.xlu1 %1624 }
 0xd1d   :  { %v1621_v24 = vmul.f32 %v1619_v2, %v3129_v12  ;;  %v1627_v30 = vmul.f32 %v1625_v28, %v3126_v11  ;;  %v1622_v60 = vmul.f32 %v1619_v2, %v3141_v40  ;;  %v1628_v61 = vmul.f32 %v1625_v28, %v3138_v39 }
 0xd1f   :  { %v1629_v41 = vadd.f32 %v1627_v30, %v1621_v24  ;;  %v1630_v1 = vadd.f32 %v1628_v61, %v1622_v60 }
 0xd21   :  { %v1631_v43 = vadd.f32 %v1629_v41, %v1517_v38  ;;  %v1638_v7 = vadd.f32 %v3063_v23, %v1630_v1  ;;  %v3355_v38 = vld [vmem:[%s3614_s6 + $0x30] ss:$8 sps:$4 sm:$0xff]   ;;  %v3368_v41 = vld [vmem:[%s3614_s6 + $0x20] ss:$8 sps:$4 sm:$0xff]  }
 0xd23   :  { %v2438_v29 = vmul.f32 -1.442695, %v1631_v43  ;;  %v3374_v43 = vld [vmem:[%s3614_s6 + $0x14] ss:$8 sps:$4 sm:$0xff]  }
 0xd25   :  { %2712 = vpow2.f32 %v2438_v29  ;;  %v3380_v29 = vld [vmem:[%s3614_s6 + $0x10] ss:$8 sps:$4 sm:$0xff]  }
 0xd2d   :  { %v1707_v44 = vpop.permute.xlu0 %1706  ;;  %v1701_v46 = vpop.permute.xlu1 %1700 }
 0xd2e   :  { %v1709_v47 = vmul.f32 %v1707_v44, %v3126_v11  ;;  %v1703_v49 = vmul.f32 %v1701_v46, %v3129_v12  ;;  %v1710_v63 = vmul.f32 %v1707_v44, %v3138_v39  ;;  %v1704_v15 = vmul.f32 %v1701_v46, %v3141_v40  ;;  %v3386_v44 = vld [vmem:[%s3614_s6 + $0x4] ss:$8 sps:$4 sm:$0xff]   ;;  %v3392_v46 = vld [vmem:[%s3614_s6] ss:$8 sps:$4 sm:$0xff]  }
 0xd30   :  { %v1711_v17 = vadd.f32 %v1709_v47, %v1703_v49  ;;  %v1712_v16 = vadd.f32 %v1710_v63, %v1704_v15  ;;  %v3398_v47 = vld [vmem:[%s3614_s6 + $0x34] ss:$8 sps:$4 sm:$0xff]  }
 0xd32   :  { %v2713_v52 = vpop.eup %2712  ;;  %v1713_v53 = vadd.f32 %v1711_v17, %v1599_v9  ;;  %v1720_v42 = vadd.f32 %v3063_v23, %v1712_v16 }
 0xd33   :  { %v1635_v55 = vadd.f32 1.0, %v2713_v52 }
 0xd34   :  { %v2440_v57 = vmul.f32 -1.442695, %v1713_v53 }
 0xd35   :  { %2714 = vrcp.f32 %v1635_v55 }
 0xd36   :  { %2716 = vpow2.f32 %v2440_v57 }
 0xd42   :  { %v2715_v5 = vpop.eup %2714 }
 0xd43   :  { %v2717_v19 = vpop.eup %2716  ;;  %v1639_v8 = vmul.f32 %v2715_v5, %v1519_v33  ;;  %v1642_v33 = vsub.f32 1.0, %v2715_v5  ;;  %v1648_v34 = vmul.f32 %v2715_v5, %v3278_v13 }
 0xd44   :  { %v1717_v10 = vadd.f32 1.0, %v2717_v19 }
 0xd45   :  { %v1640_v14 = vadd.f32 %v1639_v8, %v1638_v7 }
 0xd46   :  { %2718 = vrcp.f32 %v1717_v10 }
 0xd47   :  { %2720 = vtanh.f32 %v1640_v14 }
 0xd53   :  { %v2719_v18 = vpop.eup %2718 }
 0xd54   :  { %v2721_v54 = vpop.eup %2720  ;;  %v1721_v48 = vmul.f32 %v2719_v18, %v1601_v32  ;;  %v1724_v32 = vsub.f32 1.0, %v2719_v18  ;;  %v1730_v2 = vmul.f32 %v2719_v18, %v3284_v45  ;;  %v3362_v45 = vld [vmem:[%s3614_s6 + $0x24] ss:$8 sps:$4 sm:$0xff]  }
 0xd55   :  { %1644 = vrot.lane.b32.xlu1 %v2721_v54, %s2839_s23 }
 0xd56   :  { %v1722_v21 = vadd.f32 %v1721_v48, %v1720_v42 }
 0xd58   :  { %2722 = vtanh.f32 %v1722_v21 }
 0xd65   :  { %v2723_v22 = vpop.eup %2722 }
 0xd66   :  { %1726 = vrot.lane.b32.xlu1 %v2723_v22, %s2839_s23 }
 0xdc7   :  { %v1645_v25 = vpop.permute.xlu1 %1644 }
 0xdc8   :  { %v1647_v35 = vmul.f32 %v1645_v25, %v1642_v33 }
 0xdca   :  { %v3340_v36 = vadd.f32 %v1648_v34, %v1647_v35 }
 0xdcc   :  { %v1650_v37 = vpack.c.bf16 %v3340_v36, %v3340_v36 }
 0xdce   :  { %1652 = vrot.lane.b32.xlu0 %v1650_v37, %s2839_s23 }
 0xdd8   :  { %v1727_v51 = vpop.permute.xlu1 %1726 }
 0xdd9   :  { %v1729_v28 = vmul.f32 %v1727_v51, %v1724_v32 }
 0xddb   :  { %v3346_v24 = vadd.f32 %v1730_v2, %v1729_v28 }
 0xddd   :  { %v1732_v30 = vpack.c.bf16 %v3346_v24, %v3346_v24 }
 0xddf   :  { %1734 = vrot.lane.b32.xlu1 %v1732_v30, %s2839_s23 }
 0xe40   :  { %v1653_v13 = vpop.permute.xlu0 %1652 }
 0xe41   :  { %2439 = vmatmul.mubr.msk.bf16.vlgmr.msra.gmra.mxu0 %vm823_vm1, %v1653_v13 }
 0xe42   :  { %1841 = vmatpush1.bf16.msra.mxu0 %v3355_v38  ;;  %1864 = vmatprep.mubr.bf16.mxu0 %v2841_v0 }
 0xe43   :  { %1842 = vmatprep.subr.bf16.mxu0 %v3362_v45 }
 0xe46   :  { %1843 = vmatpush1.bf16.msra.mxu0 %v3368_v41 }
 0xe47   :  { %1844 = vmatprep.subr.bf16.mxu0 %v3374_v43 }
 0xe4a   :  { %1845 = vmatpush1.bf16.msra.mxu0 %v3380_v29 }
 0xe4b   :  { %1846 = vmatprep.subr.bf16.mxu0 %v3386_v44 }
 0xe4e   :  { %1847 = vmatpush1.bf16.msra.mxu0 %v3392_v46 }
 0xe4f   :  { %2015 = vmatprep.subr.bf16.mxu0 %v3398_v47 }
 0xe51   :  { %v1735_v49 = vpop.permute.xlu1 %1734 }
 0xe52   :  { %2441 = vmatmul.mubr.msk.bf16.vlgmr.msra.gmra.mxu1 %vm823_vm1, %v1735_v49 }
 0xe53   :  { %1923 = vmatpush1.bf16.msra.mxu1 %v3355_v38  ;;  %1946 = vmatprep.mubr.bf16.mxu1 %v2841_v0 }
 0xe54   :  { %1924 = vmatprep.subr.bf16.mxu1 %v3362_v45 }
 0xe57   :  { %1925 = vmatpush1.bf16.msra.mxu1 %v3368_v41 }
 0xe58   :  { %1926 = vmatprep.subr.bf16.mxu1 %v3374_v43 }
 0xe5b   :  { %1927 = vmatpush1.bf16.msra.mxu1 %v3380_v29 }
 0xe5c   :  { %1928 = vmatprep.subr.bf16.mxu1 %v3386_v44 }
 0xe5f   :  { %1929 = vmatpush1.bf16.msra.mxu1 %v3392_v46 }
 0xe60   :  { %2097 = vmatprep.subr.bf16.mxu1 %v3398_v47 }
 0xf01   :  { %v1691_v9 = vpop.f32.mrf.mxu0 }
 0xf02   :  { %v1692_v15 = vadd.f32 %v1691_v9, %v3050_v4 }
 0xf03   :  { %v1693_v17 = vpop.f32.mrf.mxu0 }
 0xf04   :  { %v1694_v52 = vadd.f32 %v1693_v17, %v3057_v20 }
 0xf05   :  { %v1695_v53 = vpop.f32.mrf.mxu0 }
 0xf06   :  { %v3413_v55 = vadd.f32 %v1694_v52, %v3311_v27 }
 0xf07   :  { %v1696_v57 = vpop.f32.mrf.mxu0 }
 0xf08   :  { %1793 = vperm.xlu0 %2540, %v3413_v55   ;;  %1799 = vperm.xlu1 %2541, %v3413_v55  }
 0xf0c   :  { %2543 = vset.pattern.permute.xlu0 %v2844_v58  ;;  %2542 = vset.pattern.permute.xlu1 %v2845_v59 }
 0xf12   :  { %v1773_v60 = vpop.f32.mrf.mxu1 }
 0xf13   :  { %v1774_v33 = vadd.f32 %v1773_v60, %v3050_v4 }
 0xf14   :  { %v1775_v61 = vpop.f32.mrf.mxu1 }
 0xf15   :  { %v1776_v1 = vadd.f32 %v1775_v61, %v3057_v20 }
 0xf16   :  { %v1777_v5 = vpop.f32.mrf.mxu1 }
 0xf17   :  { %v3421_v19 = vadd.f32 %v1776_v1, %v3319_v50 }
 0xf18   :  { %v1778_v7 = vpop.f32.mrf.mxu1 }
 0xf19   :  { %1881 = vperm.xlu0 %2543, %v3421_v19   ;;  %1875 = vperm.xlu1 %2542, %v3421_v19  }
 0xf1d   :  { %2544 = vset.pattern.permute.xlu0 %v2845_v59  ;;  %2545 = vset.pattern.permute.xlu1 %v2844_v58 }
 0xf83   :  { %v1794_v8 = vpop.permute.xlu0 %1793  ;;  %v1800_v10 = vpop.permute.xlu1 %1799 }
 0xf84   :  { %v1796_v14 = vmul.f32 %v1794_v8, %v3129_v12  ;;  %v1802_v63 = vmul.f32 %v1800_v10, %v3126_v11  ;;  %v1797_v51 = vmul.f32 %v1794_v8, %v3141_v40  ;;  %v1803_v2 = vmul.f32 %v1800_v10, %v3138_v39  ;;  %v3441_v8 = vld [vmem:[%s3617_s9] ss:$0 sm:$0xff]  ;;  %s2846_s9 = smov 66  }
 0xf86   :  { %v1804_v16 = vadd.f32 %v1802_v63, %v1796_v14  ;;  %v1805_v28 = vadd.f32 %v1803_v2, %v1797_v51 }
 0xf88   :  { %v1806_v18 = vadd.f32 %v1804_v16, %v1692_v15  ;;  %v1813_v49 = vadd.f32 %v3063_v23, %v1805_v28 }
 0xf8a   :  { %v2442_v54 = vmul.f32 -1.442695, %v1806_v18 }
 0xf8c   :  { %2724 = vpow2.f32 %v2442_v54 }
 0xf94   :  { %v1882_v42 = vpop.permute.xlu0 %1881  ;;  %v1876_v48 = vpop.permute.xlu1 %1875 }
 0xf95   :  { %v1884_v21 = vmul.f32 %v1882_v42, %v3126_v11  ;;  %v1878_v22 = vmul.f32 %v1876_v48, %v3129_v12  ;;  %v1885_v57 = vmul.f32 %v1882_v42, %v3138_v39  ;;  %v1879_v60 = vmul.f32 %v1876_v48, %v3141_v40 }
 0xf97   :  { %v1886_v25 = vadd.f32 %v1884_v21, %v1878_v22  ;;  %v1887_v61 = vadd.f32 %v1885_v57, %v1879_v60 }
 0xf99   :  { %v2725_v34 = vpop.eup %2724  ;;  %v1888_v35 = vadd.f32 %v1886_v25, %v1774_v33  ;;  %v1895_v10 = vadd.f32 %v3441_v8, %v1887_v61 }
 0xf9a   :  { %v1810_v37 = vadd.f32 1.0, %v2725_v34 }
 0xf9b   :  { %v2444_v32 = vmul.f32 -1.442695, %v1888_v35 }
 0xf9c   :  { %2726 = vrcp.f32 %v1810_v37 }
 0xf9d   :  { %2728 = vpow2.f32 %v2444_v32 }
 0xfa9   :  { %v2727_v30 = vpop.eup %2726 }
 0xfaa   :  { %v2729_v13 = vpop.eup %2728  ;;  %v1814_v9 = vmul.f32 %v2727_v30, %v1694_v52  ;;  %v1817_v63 = vsub.f32 1.0, %v2727_v30  ;;  %v1823_v16 = vmul.f32 %v2727_v30, %v3340_v36 }
 0xfab   :  { %v1892_v17 = vadd.f32 1.0, %v2729_v13 }
 0xfac   :  { %v1815_v53 = vadd.f32 %v1814_v9, %v1813_v49 }
 0xfad   :  { %2730 = vrcp.f32 %v1892_v17 }
 0xfae   :  { %2732 = vtanh.f32 %v1815_v53 }
 0xfba   :  { %v2731_v5 = vpop.eup %2730 }
 0xfbb   :  { %v2733_v7 = vpop.eup %2732  ;;  %v1896_v23 = vmul.f32 %v2731_v5, %v1776_v1  ;;  %v1899_v1 = vsub.f32 1.0, %v2731_v5  ;;  %v1905_v21 = vmul.f32 %v2731_v5, %v3346_v24 }
 0xfbc   :  { %1819 = vrot.lane.b32.xlu1 %v2733_v7, %s2839_s23 }
 0xfbd   :  { %v1897_v52 = vadd.f32 %v1896_v23, %v1895_v10 }
 0xfbf   :  { %2734 = vtanh.f32 %v1897_v52 }
 0xfcc   :  { %v2735_v14 = vpop.eup %2734 }
 0xfcd   :  { %1901 = vrot.lane.b32.xlu1 %v2735_v14, %s2839_s23 }
0x102e   :  { %v1820_v15 = vpop.permute.xlu1 %1819 }
0x102f   :  { %v1822_v18 = vmul.f32 %v1820_v15, %v1817_v63 }
0x1031   :  { %v3447_v54 = vadd.f32 %v1823_v16, %v1822_v18 }
0x1033   :  { %v1825_v42 = vpack.c.bf16 %v3447_v54, %v3447_v54 }
0x1035   :  { %1827 = vrot.lane.b32.xlu0 %v1825_v42, %s2839_s23 }
0x103f   :  { %v1902_v48 = vpop.permute.xlu1 %1901 }
0x1040   :  { %v1904_v22 = vmul.f32 %v1902_v48, %v1899_v1 }
0x1042   :  { %v3453_v33 = vadd.f32 %v1905_v21, %v1904_v22 }
0x1044   :  { %v1907_v25 = vpack.c.bf16 %v3453_v33, %v3453_v33 }
0x1046   :  { %1909 = vrot.lane.b32.xlu1 %v1907_v25, %s2839_s23 }
0x10a7   :  { %v1828_v36 = vpop.permute.xlu0 %1827 }
0x10a8   :  { %2443 = vmatmul.mubr.msk.bf16.vlgmr.msra.gmra.mxu0 %vm823_vm1, %v1828_v36 }
0x10a9   :  { %2016 = vmatpush1.bf16.msra.mxu0 %v3355_v38  ;;  %2039 = vmatprep.mubr.bf16.mxu0 %v2841_v0 }
0x10aa   :  { %2017 = vmatprep.subr.bf16.mxu0 %v3362_v45 }
0x10ad   :  { %2018 = vmatpush1.bf16.msra.mxu0 %v3368_v41 }
0x10ae   :  { %2019 = vmatprep.subr.bf16.mxu0 %v3374_v43 }
0x10b1   :  { %2020 = vmatpush1.bf16.msra.mxu0 %v3380_v29 }
0x10b2   :  { %2021 = vmatprep.subr.bf16.mxu0 %v3386_v44 }
0x10b5   :  { %2022 = vmatpush1.bf16.msra.mxu0 %v3392_v46 }
0x10b6   :  { %2190 = vmatprep.subr.bf16.mxu0 %v3398_v47 }
0x10b8   :  { %v1910_v24 = vpop.permute.xlu1 %1909 }
0x10b9   :  { %2445 = vmatmul.mubr.msk.bf16.vlgmr.msra.gmra.mxu1 %vm823_vm1, %v1910_v24 }
0x10ba   :  { %2098 = vmatpush1.bf16.msra.mxu1 %v3355_v38  ;;  %2121 = vmatprep.mubr.bf16.mxu1 %v2841_v0 }
0x10bb   :  { %2099 = vmatprep.subr.bf16.mxu1 %v3362_v45 }
0x10be   :  { %2100 = vmatpush1.bf16.msra.mxu1 %v3368_v41 }
0x10bf   :  { %2101 = vmatprep.subr.bf16.mxu1 %v3374_v43 }
0x10c2   :  { %2102 = vmatpush1.bf16.msra.mxu1 %v3380_v29 }
0x10c3   :  { %2103 = vmatprep.subr.bf16.mxu1 %v3386_v44 }
0x10c6   :  { %2104 = vmatpush1.bf16.msra.mxu1 %v3392_v46 }
0x10c7   :  { %2271 = vmatprep.subr.bf16.mxu1 %v3398_v47 }
0x1168   :  { %v1866_v34 = vpop.f32.mrf.mxu0 }
0x1169   :  { %v1867_v61 = vadd.f32 %v1866_v34, %v3050_v4 }
0x116a   :  { %v1868_v35 = vpop.f32.mrf.mxu0 }
0x116b   :  { %v1869_v37 = vadd.f32 %v1868_v35, %v3057_v20 }
0x116c   :  { %v1870_v32 = vpop.f32.mrf.mxu0 }
0x116d   :  { %v3480_v51 = vadd.f32 %v1869_v37, %v3413_v55 }
0x116e   :  { %v1871_v2 = vpop.f32.mrf.mxu0 }
0x116f   :  { %1968 = vperm.xlu0 %2544, %v3480_v51   ;;  %1974 = vperm.xlu1 %2545, %v3480_v51  }
0x1173   :  { %2547 = vset.pattern.permute.xlu0 %v2844_v58  ;;  %2546 = vset.pattern.permute.xlu1 %v2845_v59 }
0x1179   :  { %v1948_v28 = vpop.f32.mrf.mxu1 }
0x117a   :  { %v1949_v15 = vadd.f32 %v1948_v28, %v3050_v4 }
0x117b   :  { %v1950_v30 = vpop.f32.mrf.mxu1 }
0x117c   :  { %v1951_v47 = vadd.f32 %v1950_v30, %v3057_v20 }
0x117d   :  { %v1952_v13 = vpop.f32.mrf.mxu1 }
0x117e   :  { %v3488_v49 = vadd.f32 %v1951_v47, %v3421_v19 }
0x117f   :  { %v1953_v9 = vpop.f32.mrf.mxu1 }
0x1180   :  { %2056 = vperm.xlu0 %2547, %v3488_v49   ;;  %2050 = vperm.xlu1 %2546, %v3488_v49  }
0x1184   :  { %2548 = vset.pattern.permute.xlu0 %v2845_v59  ;;  %2549 = vset.pattern.permute.xlu1 %v2844_v58 }
0x11ea   :  { %v1969_v17 = vpop.permute.xlu0 %1968  ;;  %v1975_v53 = vpop.permute.xlu1 %1974 }
0x11eb   :  { %v1971_v57 = vmul.f32 %v1969_v17, %v3129_v12  ;;  %v1977_v60 = vmul.f32 %v1975_v53, %v3126_v11  ;;  %v1972_v21 = vmul.f32 %v1969_v17, %v3141_v40  ;;  %v1978_v22 = vmul.f32 %v1975_v53, %v3138_v39 }
0x11ed   :  { %v1979_v5 = vadd.f32 %v1977_v60, %v1971_v57  ;;  %v1980_v25 = vadd.f32 %v1978_v22, %v1972_v21 }
0x11ef   :  { %v1981_v7 = vadd.f32 %v1979_v5, %v1867_v61  ;;  %v1988_v34 = vadd.f32 %v3441_v8, %v1980_v25 }
0x11f1   :  { %v2446_v10 = vmul.f32 -1.442695, %v1981_v7 }
0x11f3   :  { %2736 = vpow2.f32 %v2446_v10 }
0x11fb   :  { %v2057_v23 = vpop.permute.xlu0 %2056  ;;  %v2051_v52 = vpop.permute.xlu1 %2050 }
0x11fc   :  { %v2059_v14 = vmul.f32 %v2057_v23, %v3126_v11  ;;  %v2053_v63 = vmul.f32 %v2051_v52, %v3129_v12  ;;  %v2060_v28 = vmul.f32 %v2057_v23, %v3138_v39  ;;  %v2054_v30 = vmul.f32 %v2051_v52, %v3141_v40 }
0x11fe   :  { %v2061_v16 = vadd.f32 %v2059_v14, %v2053_v63  ;;  %v2062_v13 = vadd.f32 %v2060_v28, %v2054_v30 }
0x1200   :  { %v2737_v18 = vpop.eup %2736  ;;  %v2063_v42 = vadd.f32 %v2061_v16, %v1949_v15  ;;  %v2070_v17 = vadd.f32 %v3441_v8, %v2062_v13 }
0x1201   :  { %v1985_v1 = vadd.f32 1.0, %v2737_v18 }
0x1202   :  { %v2448_v48 = vmul.f32 -1.442695, %v2063_v42 }
0x1203   :  { %2738 = vrcp.f32 %v1985_v1 }
0x1204   :  { %2740 = vpow2.f32 %v2448_v48 }
0x1210   :  { %v2739_v36 = vpop.eup %2738 }
0x1211   :  { %v2741_v24 = vpop.eup %2740  ;;  %v1989_v35 = vmul.f32 %v2739_v36, %v1869_v37  ;;  %v1992_v37 = vsub.f32 1.0, %v2739_v36  ;;  %v1998_v7 = vmul.f32 %v2739_v36, %v3447_v54 }
0x1212   :  { %v2067_v32 = vadd.f32 1.0, %v2741_v24 }
0x1213   :  { %v1990_v2 = vadd.f32 %v1989_v35, %v1988_v34 }
0x1214   :  { %2742 = vrcp.f32 %v2067_v32 }
0x1215   :  { %2744 = vtanh.f32 %v1990_v2 }
0x1221   :  { %v2743_v9 = vpop.eup %2742 }
0x1222   :  { %v2745_v57 = vpop.eup %2744  ;;  %v2071_v53 = vmul.f32 %v2743_v9, %v1951_v47  ;;  %v2074_v47 = vsub.f32 1.0, %v2743_v9  ;;  %v2080_v63 = vmul.f32 %v2743_v9, %v3453_v33 }
0x1223   :  { %1994 = vrot.lane.b32.xlu1 %v2745_v57, %s2839_s23 }
0x1224   :  { %v2072_v60 = vadd.f32 %v2071_v53, %v2070_v17 }
0x1226   :  { %2746 = vtanh.f32 %v2072_v60 }
0x1233   :  { %v2747_v61 = vpop.eup %2746 }
0x1234   :  { %2076 = vrot.lane.b32.xlu1 %v2747_v61, %s2839_s23 }
0x1295   :  { %v1995_v5 = vpop.permute.xlu1 %1994 }
0x1296   :  { %v1997_v10 = vmul.f32 %v1995_v5, %v1992_v37 }
0x1298   :  { %v3509_v23 = vadd.f32 %v1998_v7, %v1997_v10 }
0x129a   :  { %v2000_v52 = vpack.c.bf16 %v3509_v23, %v3509_v23 }
0x129c   :  { %2002 = vrot.lane.b32.xlu0 %v2000_v52, %s2839_s23 }
0x12a6   :  { %v2077_v14 = vpop.permute.xlu1 %2076 }
0x12a7   :  { %v2079_v15 = vmul.f32 %v2077_v14, %v2074_v47 }
0x12a9   :  { %v3515_v16 = vadd.f32 %v2080_v63, %v2079_v15 }
0x12ab   :  { %v2082_v18 = vpack.c.bf16 %v3515_v16, %v3515_v16 }
0x12ad   :  { %2084 = vrot.lane.b32.xlu1 %v2082_v18, %s2839_s23 }
0x130e   :  { %v2003_v54 = vpop.permute.xlu0 %2002 }
0x130f   :  { %2447 = vmatmul.mubr.msk.bf16.vlgmr.msra.gmra.mxu0 %vm823_vm1, %v2003_v54 }
0x1310   :  { %2191 = vmatpush1.bf16.msra.mxu0 %v3355_v38  ;;  %2214 = vmatprep.mubr.bf16.mxu0 %v2841_v0 }
0x1311   :  { %2192 = vmatprep.subr.bf16.mxu0 %v3362_v45 }
0x1314   :  { %2193 = vmatpush1.bf16.msra.mxu0 %v3368_v41 }
0x1315   :  { %2194 = vmatprep.subr.bf16.mxu0 %v3374_v43 }
0x1318   :  { %2195 = vmatpush1.bf16.msra.mxu0 %v3380_v29 }
0x1319   :  { %2196 = vmatprep.subr.bf16.mxu0 %v3386_v44 }
0x131c   :  { %2197 = vmatpush1.bf16.msra.mxu0 %v3392_v46 }
0x131f   :  { %v2085_v33 = vpop.permute.xlu1 %2084 }
0x1320   :  { %2449 = vmatmul.mubr.msk.bf16.vlgmr.msra.gmra.mxu1 %vm823_vm1, %v2085_v33 }
0x1321   :  { %2272 = vmatpush1.bf16.msra.mxu1 %v3355_v38  ;;  %2295 = vmatprep.mubr.bf16.mxu1 %v2841_v0 }
0x1322   :  { %2273 = vmatprep.subr.bf16.mxu1 %v3362_v45 }
0x1325   :  { %2274 = vmatpush1.bf16.msra.mxu1 %v3368_v41 }
0x1326   :  { %2275 = vmatprep.subr.bf16.mxu1 %v3374_v43 }
0x1329   :  { %2276 = vmatpush1.bf16.msra.mxu1 %v3380_v29 }
0x132a   :  { %2277 = vmatprep.subr.bf16.mxu1 %v3386_v44 }
0x132d   :  { %2278 = vmatpush1.bf16.msra.mxu1 %v3392_v46 }
0x13cf   :  { %v2041_v42 = vpop.f32.mrf.mxu0 }
0x13d1   :  { %v2043_v1 = vpop.f32.mrf.mxu0 }
0x13d2   :  { %v2044_v48 = vadd.f32 %v2043_v1, %v3057_v20 }
0x13d3   :  { %v2045_v21 = vpop.f32.mrf.mxu0 }
0x13d4   :  { %v3540_v38 = vadd.f32 %v2044_v48, %v3480_v51 }
0x13d5   :  { %v2046_v0 = vpop.f32.mrf.mxu0 }
0x13d6   :  { %2143 = vperm.xlu0 %2548, %v3540_v38   ;;  %2149 = vperm.xlu1 %2549, %v3540_v38  }
0x13da   :  { %2551 = vset.pattern.permute.xlu0 %v2844_v58  ;;  %2550 = vset.pattern.permute.xlu1 %v2845_v59  ;;  %v2042_v59 = vadd.f32 %v2041_v42, %v3050_v4 }
0x13e0   :  { %v2123_v45 = vpop.f32.mrf.mxu1 }
0x13e1   :  { %v2124_v13 = vadd.f32 %v2123_v45, %v3050_v4 }
0x13e2   :  { %v2125_v41 = vpop.f32.mrf.mxu1 }
0x13e3   :  { %v2126_v43 = vadd.f32 %v2125_v41, %v3057_v20 }
0x13e4   :  { %v2127_v29 = vpop.f32.mrf.mxu1 }
0x13e5   :  { %v3548_v44 = vadd.f32 %v2126_v43, %v3488_v49 }
0x13e6   :  { %v2128_v46 = vpop.f32.mrf.mxu1 }
0x13e7   :  { %2230 = vperm.xlu0 %2551, %v3548_v44   ;;  %2224 = vperm.xlu1 %2550, %v3548_v44  }
0x1451   :  { %v2144_v22 = vpop.permute.xlu0 %2143  ;;  %v2150_v25 = vpop.permute.xlu1 %2149 }
0x1452   :  { %v2146_v36 = vmul.f32 %v2144_v22, %v3129_v12  ;;  %v2152_v58 = vmul.f32 %v2150_v25, %v3126_v11  ;;  %v2147_v61 = vmul.f32 %v2144_v22, %v3141_v40  ;;  %v2153_v37 = vmul.f32 %v2150_v25, %v3138_v39 }
0x1454   :  { %v2154_v24 = vadd.f32 %v2152_v58, %v2146_v36  ;;  %v2155_v5 = vadd.f32 %v2153_v37, %v2147_v61 }
0x1456   :  { %v2156_v34 = vadd.f32 %v2154_v24, %v2042_v59 }
0x1458   :  { %v2450_v35 = vmul.f32 -1.442695, %v2156_v34 }
0x145a   :  { %2748 = vpow2.f32 %v2450_v35 }
0x1462   :  { %v2231_v32 = vpop.permute.xlu0 %2230  ;;  %v2225_v2 = vpop.permute.xlu1 %2224 }
0x1463   :  { %v2233_v28 = vmul.f32 %v2231_v32, %v3126_v11  ;;  %v2227_v30 = vmul.f32 %v2225_v2, %v3129_v12  ;;  %v2163_v11 = vadd.f32 %v3441_v8, %v2155_v5  ;;  %v2234_v4 = vmul.f32 %v2231_v32, %v3138_v39 }
0x1464   :  { %v2228_v14 = vmul.f32 %v2225_v2, %v3141_v40 }
0x1465   :  { %v2235_v9 = vadd.f32 %v2233_v28, %v2227_v30 }
0x1466   :  { %v2236_v63 = vadd.f32 %v2234_v4, %v2228_v14 }
0x1467   :  { %v2749_v57 = vpop.eup %2748  ;;  %v2237_v17 = vadd.f32 %v2235_v9, %v2124_v13 }
0x1468   :  { %v2160_v53 = vadd.f32 1.0, %v2749_v57  ;;  %v2244_v54 = vadd.f32 %v3441_v8, %v2236_v63 }
0x1469   :  { %v2452_v60 = vmul.f32 -1.442695, %v2237_v17 }
0x146a   :  { %2750 = vrcp.f32 %v2160_v53 }
0x146b   :  { %2752 = vpow2.f32 %v2452_v60 }
0x1477   :  { %v2751_v7 = vpop.eup %2750 }
0x1478   :  { %v2753_v10 = vpop.eup %2752  ;;  %v2164_v52 = vmul.f32 %v2751_v7, %v2044_v48  ;;  %v2167_v48 = vsub.f32 1.0, %v2751_v7  ;;  %v2173_v39 = vmul.f32 %v2751_v7, %v3509_v23 }
0x1479   :  { %v2241_v12 = vadd.f32 1.0, %v2753_v10 }
0x147a   :  { %v2165_v47 = vadd.f32 %v2164_v52, %v2163_v11 }
0x147b   :  { %2754 = vrcp.f32 %v2241_v12 }
0x147c   :  { %2756 = vtanh.f32 %v2165_v47 }
0x1488   :  { %v2755_v15 = vpop.eup %2754 }
0x1489   :  { %v2757_v18 = vpop.eup %2756  ;;  %v2245_v33 = vmul.f32 %v2755_v15, %v2126_v43  ;;  %v2248_v8 = vsub.f32 1.0, %v2755_v15  ;;  %v2254_v29 = vmul.f32 %v2755_v15, %v3515_v16 }
0x148a   :  { %2169 = vrot.lane.b32.xlu1 %v2757_v18, %s2839_s23 }
0x148b   :  { %v2246_v42 = vadd.f32 %v2245_v33, %v2244_v54 }
0x148d   :  { %2758 = vtanh.f32 %v2246_v42 }
0x149a   :  { %v2759_v1 = vpop.eup %2758 }
0x149b   :  { %2250 = vrot.lane.b32.xlu1 %v2759_v1, %s2839_s23 }
0x14fc   :  { %v2170_v21 = vpop.permute.xlu1 %2169 }
0x14fd   :  { %v2172_v0 = vmul.f32 %v2170_v21, %v2167_v48 }
0x14ff   :  { %v2174_v45 = vadd.f32 %v2173_v39, %v2172_v0 }
0x1501   :  { %v2175_v40 = vpack.c.bf16 %v2174_v45, %v2174_v45 }
0x1503   :  { %2177 = vrot.lane.b32.xlu0 %v2175_v40, %s2839_s23 }
0x1507   :  { %1060 = vrot.lane.b32.xlu0 %v3106_v62, %s2839_s23 }
0x150b   :  { %1257 = vrot.lane.b32.xlu0 %v3187_v26, %s2846_s9 }
0x150d   :  { %v2251_v41 = vpop.permute.xlu1 %2250 }
0x150e   :  { %v2253_v43 = vmul.f32 %v2251_v41, %v2248_v8 }
0x150f   :  { %1432 = vrot.lane.b32.xlu0 %v3249_v56, %s2847_s5 }
0x1510   :  { %v2255_v46 = vadd.f32 %v2254_v29, %v2253_v43 }
0x1512   :  { %v2256_v23 = vpack.c.bf16 %v2255_v46, %v2255_v46 }
0x1513   :  { %1607 = vrot.lane.b32.xlu0 %v3311_v27, %s2848_s1 }
0x1514   :  { %2258 = vrot.lane.b32.xlu1 %v2256_v23, %s2839_s23 }
0x1517   :  { %1782 = vrot.lane.b32.xlu0 %v3413_v55, %s2849_s7 }
0x1518   :  { %1066 = vrot.lane.b32.xlu1 %v3113_v6, %s2839_s23  ;;  %s2852_s23 = smov 78  }
0x151b   :  { %1957 = vrot.lane.b32.xlu0 %v3480_v51, %s2850_s2 }
0x151c   :  { %1263 = vrot.lane.b32.xlu1 %v3195_v31, %s2846_s9 }
0x151f   :  { %2132 = vrot.lane.b32.xlu0 %v3540_v38, %s2851_s27 }
0x1520   :  { %1438 = vrot.lane.b32.xlu1 %v3257_v3, %s2847_s5 }
0x1524   :  { %1613 = vrot.lane.b32.xlu1 %v3319_v50, %s2848_s1 }
0x1528   :  { %1788 = vrot.lane.b32.xlu1 %v3421_v19, %s2849_s7 }
0x152c   :  { %1963 = vrot.lane.b32.xlu1 %v3488_v49, %s2850_s2 }
0x1530   :  { %2138 = vrot.lane.b32.xlu1 %v3548_v44, %s2851_s27 }
0x1575   :  { %v2178_v62 = vpop.permute.xlu0 %2177 }
0x1576   :  { %2451 = vmatmul.mubr.msk.bf16.vlgmr.msra.gmra.mxu0 %vm823_vm1, %v2178_v62 }
0x1579   :  { %v1061_v6 = vpop.permute.xlu0 %1060 }
0x157a   :  { %1064 = vst.msk [vmem:[#allocation7] sm:$0xff] %vm1063_vm2, %v1061_v6 }
0x157d   :  { %v1258_v26 = vpop.permute.xlu0 %1257 }
0x157e   :  { %1261 = vst.msk [vmem:[#allocation7] sm:$0xff] %vm1260_vm3, %v1258_v26 }
0x1581   :  { %v1433_v31 = vpop.permute.xlu0 %1432 }
0x1582   :  { %1436 = vst.msk [vmem:[#allocation7] sm:$0xff] %vm1435_vm4, %v1433_v31 }
0x1585   :  { %v1608_v56 = vpop.permute.xlu0 %1607 }
0x1586   :  { %v2259_v3 = vpop.permute.xlu1 %2258  ;;  %1611 = vst.msk [vmem:[#allocation7] sm:$0xff] %vm1610_vm5, %v1608_v56 }
0x1587   :  { %2453 = vmatmul.mubr.msk.bf16.vlgmr.msra.gmra.mxu1 %vm823_vm1, %v2259_v3 }
0x1589   :  { %v1783_v27 = vpop.permute.xlu0 %1782 }
0x158a   :  { %v1067_v50 = vpop.permute.xlu1 %1066  ;;  %1786 = vst.msk [vmem:[#allocation7] sm:$0xff] %vm1785_vm6, %v1783_v27 }
0x158b   :  { %1069 = vst.msk [vmem:[#allocation7 + $0x8] sm:$0xff] %vm1063_vm2, %v1067_v50 }
0x158d   :  { %v1958_v55 = vpop.permute.xlu0 %1957 }
0x158e   :  { %v1264_v19 = vpop.permute.xlu1 %1263  ;;  %1961 = vst.msk [vmem:[#allocation7] sm:$0xff] %vm1960_vm7, %v1958_v55 }
0x158f   :  { %1266 = vst.msk [vmem:[#allocation7 + $0x8] sm:$0xff] %vm1260_vm3, %v1264_v19 }
0x1591   :  { %v2133_v51 = vpop.permute.xlu0 %2132 }
0x1592   :  { %v1439_v49 = vpop.permute.xlu1 %1438  ;;  %2136 = vst.msk [vmem:[#allocation7] sm:$0xff] %vm2135_vm8, %v2133_v51 }
0x1593   :  { %1441 = vst.msk [vmem:[#allocation7 + $0x8] sm:$0xff] %vm1435_vm4, %v1439_v49 }
0x1596   :  { %v1614_v16 = vpop.permute.xlu1 %1613 }
0x1597   :  { %1616 = vst.msk [vmem:[#allocation7 + $0x8] sm:$0xff] %vm1610_vm5, %v1614_v16 }
0x159a   :  { %v1789_v22 = vpop.permute.xlu1 %1788 }
0x159b   :  { %1791 = vst.msk [vmem:[#allocation7 + $0x8] sm:$0xff] %vm1785_vm6, %v1789_v22 }
0x159e   :  { %v1964_v25 = vpop.permute.xlu1 %1963 }
0x159f   :  { %1966 = vst.msk [vmem:[#allocation7 + $0x8] sm:$0xff] %vm1960_vm7, %v1964_v25 }
0x15a2   :  { %v2139_v36 = vpop.permute.xlu1 %2138 }
0x15a3   :  { %2141 = vst.msk [vmem:[#allocation7 + $0x8] sm:$0xff] %vm2135_vm8, %v2139_v36 }
0x1636   :  { %v2216_v58 = vpop.f32.mrf.mxu0 }
0x1638   :  { %v2217_v59 = vpop.f32.mrf.mxu0 }
0x1639   :  { %v2218_v24 = vadd.f32 %v2217_v59, %v3057_v20 }
0x163a   :  { %v2219_v34 = vpop.f32.mrf.mxu0 }
0x163b   :  { %v2222_v35 = vadd.f32 %v2218_v24, %v3540_v38 }
0x163c   :  { %v2220_v32 = vpop.f32.mrf.mxu0 }
0x163d   :  { %2305 = vrot.lane.b32.xlu0 %v2222_v35, %s2852_s23 }
0x1647   :  { %v2297_v2 = vpop.f32.mrf.mxu1 }
0x1649   :  { %v2298_v28 = vpop.f32.mrf.mxu1 }
0x164a   :  { %v2299_v30 = vadd.f32 %v2298_v28, %v3057_v20 }
0x164b   :  { %v2300_v13 = vpop.f32.mrf.mxu1 }
0x164c   :  { %v2303_v9 = vadd.f32 %v2299_v30, %v3548_v44 }
0x164d   :  { %v2301_v57 = vpop.f32.mrf.mxu1 }
0x164e   :  { %2311 = vrot.lane.b32.xlu1 %v2303_v9, %s2852_s23 }
0x16af   :  { %v2306_v17 = vpop.permute.xlu0 %2305 }
0x16b0   :  { %2309 = vst.msk [vmem:[#allocation7] sm:$0xff] %vm2308_vm9, %v2306_v17 }
0x16c0   :  { %v2312_v53 = vpop.permute.xlu1 %2311 }
0x16c1   :  { %2314 = vst.msk [vmem:[#allocation7 + $0x8] sm:$0xff] %vm2308_vm9, %v2312_v53 }
0x16c2   :  { %2820 = shalt.err (!%p2817_p0)
}
0x16c3   :  { %2326 = dma.vmem_to_hbm [thread:$0]  %s2321_s29, 256, %s3618_s10, [#allocation4], %s2836_s16, %s2836_s16, %s2837_s17  }
0x16c4   :  { %2833 = dma.done.wait [#allocation4], 256  }
0x16c5   :  { %2834 = vsyncadd [#allocation4], 4294967040 }
0x16c6   :  { %2330 = vsyncpa [#allocation3], 1 }
0x16c7   :  { %2331 = vsyncpa [#allocation6], 1 }
0x16c8   :  { %2332 = vsyncpa [#allocation4], 1 }

</bundles_post_ra>
